<compile_context>
chip_gen: v6e
topology: v6e:2x2x1
jax: 0.10.0
libtpu: 0.0.40
codegen_flags: <defaults>
</compile_context>

<pallas_src>
import functools

import jax
import jax.numpy as jnp
from jax import lax
from jax.experimental import pallas as pl
from jax.experimental.pallas import tpu as pltpu


def _round_up(x, m):
    return ((x + m - 1) // m) * m


# ----------------------------- Pallas kernels ------------------------------

def _make_conv_kernel(q, cg, tiles):
    """Fused valid 3x3 conv + bias + ReLU + 2x2/2 max-pool.

    x_ref:   (Bblk*Mimg, 4*Cp)  quad-pixel rows, flattened pooled-spatial M
    w_ref:   (4, 4*Cp, 4*cg)    one weight per quad; N = 4 pool-pos groups
    b_ref:   (1, cg)            f32 bias (zero padded)
    o_ref:   (Bblk*Mimg, cg)    pooled output rows at m = ph*q + pw
    acc_ref: (Mt, 4*cg) f32     per-tile accumulator (VMEM)
    """
    offs = (0, 1, q, q + 1)                       # row shift of quad (ai, qi)

    def kernel(x_ref, w_ref, b_ref, o_ref, acc_ref):
        t0 = 0
        for mt in tiles:                          # static M tiling
            # 4 accumulating "shifted slab" matmuls -- no im2col scatter.
            acc_ref[0:mt] = jnp.dot(
                x_ref[t0 + offs[0]:t0 + offs[0] + mt, :], w_ref[0],
                preferred_element_type=jnp.float32)
            for r in range(1, 4):
                acc_ref[0:mt] += jnp.dot(
                    x_ref[t0 + offs[r]:t0 + offs[r] + mt, :], w_ref[r],
                    preferred_element_type=jnp.float32)
            # max over the 4 pool-position groups (aligned lane slabs),
            # then bias (shared by all positions) + ReLU, lane-dense store.
            a = acc_ref[0:mt]
            m01 = jnp.maximum(a[:, 0:cg], a[:, cg:2 * cg])
            m23 = jnp.maximum(a[:, 2 * cg:3 * cg], a[:, 3 * cg:4 * cg])
            y = jnp.maximum(jnp.maximum(m01, m23) + b_ref[...], 0.0)
            o_ref[t0:t0 + mt, :] = y.astype(o_ref.dtype)
            t0 += mt

    return kernel


def _mlp_kernel(x_ref, w1_ref, b1_ref, w2_ref, b2_ref, w3_ref, b3_ref,
                o_ref, acc_ref):
    """Fused lin1+relu -> lin2+relu -> lin3; lin1 K-tiled over grid axis 1."""
    k = pl.program_id(1)

    @pl.when(k == 0)
    def _():
        acc_ref[...] = jnp.zeros_like(acc_ref)

    acc_ref[...] += jnp.dot(x_ref[...], w1_ref[...],
                            preferred_element_type=jnp.float32)

    @pl.when(k == pl.num_programs(1) - 1)
    def _():
        h1 = jnp.maximum(acc_ref[...] + b1_ref[...], 0.0)
        h2 = jnp.dot(h1.astype(w2_ref.dtype), w2_ref[...],
                     preferred_element_type=jnp.float32) + b2_ref[...]
        h2 = jnp.maximum(h2, 0.0)
        y = jnp.dot(h2.astype(w3_ref.dtype), w3_ref[...],
                    preferred_element_type=jnp.float32) + b3_ref[...]
        o_ref[...] = y.astype(o_ref.dtype)


# --------------------------- geometry / layout glue --------------------------

def _conv_geom(h, w):
    hp, wp = (h - 2) // 2, (w - 2) // 2           # pooled output size
    a, q = hp + 1, wp + 1                         # quad-pixel grid size
    m_slack = _round_up(q + 1, 8)                 # read-ahead pad (offset q+1)
    mimg = _round_up(a * q, 8) + m_slack          # flat rows per image
    return dict(hp=hp, wp=wp, a=a, q=q, m_slack=m_slack, mimg=mimg)


def _quad_flatten(x_nhwc, g):
    """(N,H,W,Cp) -> (N*Mimg, 4*Cp): fold 2x2 spatial blocks into channels."""
    n, _, _, cp = x_nhwc.shape
    a, q, mimg = g["a"], g["q"], g["mimg"]
    xs = x_nhwc[:, :2 * a, :2 * q, :]
    x6 = xs.reshape(n, a, 2, q, 2, cp)
    xq = jnp.transpose(x6, (0, 1, 3, 2, 4, 5)).reshape(n, a * q, 4 * cp)
    xq = jnp.pad(xq, ((0, 0), (0, mimg - a * q), (0, 0)))
    return xq.reshape(n * mimg, 4 * cp)


def _unflatten_pooled(out_flat, n, g, cg):
    """(N*Mimg, cg) -> (N, hp, wp, cg): drop garbage / padding rows."""
    hp, wp, q, mimg = g["hp"], g["wp"], g["q"], g["mimg"]
    o = out_flat.reshape(n, mimg, cg)[:, :hp * q, :]
    return o.reshape(n, hp, q, cg)[:, :, :wp, :]


# ------------------------------ kernel wrappers ------------------------------

def conv_relu_pool(xflat, w_quad, bias, g, cg, bblk, mt=256):
    fourcp = xflat.shape[1]
    mimg = g["mimg"]
    n_img = xflat.shape[0] // mimg
    n_blocks = n_img // bblk
    m_total = bblk * mimg - g["m_slack"]          # rows computed per step
    tiles, rem = [], m_total
    while rem > 0:
        tiles.append(min(mt, rem))
        rem -= tiles[-1]
    ntot = 4 * cg
    return pl.pallas_call(
        _make_conv_kernel(g["q"], cg, tuple(tiles)),
        out_shape=jax.ShapeDtypeStruct((n_img * mimg, cg), jnp.bfloat16),
        grid=(n_blocks,),
        in_specs=[
            pl.BlockSpec((bblk * mimg, fourcp), lambda i: (i, 0)),
            pl.BlockSpec(w_quad.shape, lambda i: (0, 0, 0)),
            pl.BlockSpec(bias.shape, lambda i: (0, 0)),
        ],
        out_specs=pl.BlockSpec((bblk * mimg, cg), lambda i: (i, 0)),
        scratch_shapes=[pltpu.VMEM((min(mt, m_total), ntot), jnp.float32)],
        compiler_params=pltpu.CompilerParams(
            dimension_semantics=("parallel",)),
    )(xflat, w_quad, bias)


def mlp_forward(feat, kp):
    """feat (Bpad, K1pad) bf16 -> fused lin1/relu/lin2/relu/lin3 -> (Bpad, 128)."""
    bpad, k1pad = feat.shape
    tk = kp["tk"]
    gk = k1pad // tk
    n1p = kp["wl1"].shape[1]
    n2p = kp["wl2"].shape[1]
    n3p = kp["wl3"].shape[1]
    bb = bpad // 2                                # 2 batch blocks (v7x megacore)
    if gk >= 3:
        # deepen the dominant-weight pipeline when there are enough K steps
        w1_spec = pl.BlockSpec((tk, n1p), lambda b, k: (k, 0),
                               pipeline_mode=pl.Buffered(3))
    else:
        w1_spec = pl.BlockSpec((tk, n1p), lambda b, k: (k, 0))
    return pl.pallas_call(
        _mlp_kernel,
        out_shape=jax.ShapeDtypeStruct((bpad, n3p), jnp.float32),
        grid=(bpad // bb, gk),
        in_specs=[
            pl.BlockSpec((bb, tk), lambda b, k: (b, k)),
            w1_spec,
            pl.BlockSpec((1, n1p), lambda b, k: (0, 0)),
            pl.BlockSpec((n1p, n2p), lambda b, k: (0, 0)),
            pl.BlockSpec((1, n2p), lambda b, k: (0, 0)),
            pl.BlockSpec((n2p, n3p), lambda b, k: (0, 0)),
            pl.BlockSpec((1, n3p), lambda b, k: (0, 0)),
        ],
        out_specs=pl.BlockSpec((bb, n3p), lambda b, k: (b, 0)),
        scratch_shapes=[pltpu.VMEM((bb, n1p), jnp.float32)],
        compiler_params=pltpu.CompilerParams(
            dimension_semantics=("parallel", "arbitrary")),
    )(feat, kp["wl1"], kp["bl1"], kp["wl2"], kp["bl2"], kp["wl3"], kp["bl3"])


# ------------------------------ full forward --------------------------------

def conv_forward(kp, x_nchw):
    g1, g2 = kp["g1"], kp["g2"]
    n = x_nchw.shape[0]

    # stage 1: NCHW f32 -> NHWC bf16, Cin 3 -> 8, quad fold + flatten.
    x = jnp.transpose(x_nchw, (0, 2, 3, 1)).astype(jnp.bfloat16)
    x = jnp.pad(x, ((0, 0), (0, 0), (0, 0), (0, kp["cin1_pad"] - x.shape[3])))
    o1 = conv_relu_pool(_quad_flatten(x, g1), kp["w1"], kp["b1"],
                        g1, cg=kp["cg1"], bblk=1)
    x1 = _unflatten_pooled(o1, n, g1, kp["cg1"])        # (n, hp1, wp1, 128)

    # stage 2: channels already lane-dense-padded to 128 by stage-1 output.
    bblk2 = 4 if n % 4 == 0 else (2 if n % 2 == 0 else 1)
    o2 = conv_relu_pool(_quad_flatten(x1, g2), kp["w2"], kp["b2"],
                        g2, cg=kp["cg2"], bblk=bblk2)
    x2 = _unflatten_pooled(o2, n, g2, kp["cg2"])        # (n, hp2, wp2, 32)

    # NHWC(+pad) flatten; wl1 rows pre-permuted + zero padded to match; pad
    # K to the lin1 K-tiling and batch to the MLP batch blocking.
    feat = x2.reshape(n, -1)
    bpad = max(16, _round_up(n, 16))
    feat = jnp.pad(feat, ((0, bpad - n), (0, kp["k1pad"] - feat.shape[1])))
    y = mlp_forward(feat, kp)
    return y[:n, :104]


# --------------------------- parameter creation -----------------------------

def init_raw_params(key, img_size, layer1_neurons, layer2_neurons):
    """Deterministic PyTorch-default-like init, in PyTorch layouts."""
    img_sc = int((img_size - 2) / 4 - 1)
    lin_in = img_sc * img_sc * 20
    ks = jax.random.split(key, 10)

    def u(k, shape, fan_in):
        bound = 1.0 / float(fan_in) ** 0.5
        return jax.random.uniform(k, shape, jnp.float32, -bound, bound)

    raw = dict(
        w1=u(ks[0], (100, 3, 3, 3), 3 * 9),      b1=u(ks[1], (100,), 3 * 9),
        w2=u(ks[2], (20, 100, 3, 3), 100 * 9),   b2=u(ks[3], (20,), 100 * 9),
        wl1=u(ks[4], (layer1_neurons, lin_in), lin_in),
        bl1=u(ks[5], (layer1_neurons,), lin_in),
        wl2=u(ks[6], (layer2_neurons, layer1_neurons), layer1_neurons),
        bl2=u(ks[7], (layer2_neurons,), layer1_neurons),
        wl3=u(ks[8], (104, layer2_neurons), layer2_neurons),
        bl3=u(ks[9], (104,), layer2_neurons),
    )
    return raw, img_sc, lin_in


def _build_quad_pool_weight(w_hwio, cin_p, cg):
    """(3,3,Cin,Cout) conv weight -> (4, 4*cin_p, 4*cg) quad/pool weights.

    Slab ai*2+qi, contracted against quad-pixel (ph+ai, pw+qi) with channel
    order (r, s, c), produces the conv output at pool position (j, k) in the
    N-group j*2+k.  Taps outside the 3x3 receptive field and all padded
    channels are zero.
    """
    kh, kw, cin, cout = w_hwio.shape
    wq = jnp.zeros((2, 2, 2, 2, cin_p, 2, 2, cg), w_hwio.dtype)
    for ai in range(2):
        for qi in range(2):
            for r in range(2):
                for s in range(2):
                    for j in range(2):
                        for k in range(2):
                            dy = 2 * ai + r - j
                            dx = 2 * qi + s - k
                            if 0 <= dy < kh and 0 <= dx < kw:
                                wq = wq.at[ai, qi, r, s, :cin, j, k, :cout].set(
                                    w_hwio[dy, dx])
    return wq.reshape(4, 4 * cin_p, 4 * cg)


def _pad_bias(b, np_):
    return jnp.pad(b.astype(jnp.float32), (0, np_ - b.shape[0]))[None, :]


def prepare_params(raw, img_size, img_sc, lin_in):
    g1 = _conv_geom(img_size, img_size)
    g2 = _conv_geom(g1["hp"], g1["wp"])
    assert g2["hp"] == img_sc and g2["wp"] == img_sc
    assert lin_in == g2["hp"] * g2["wp"] * 20

    cin1_pad, cg1, cg2 = 8, 128, 32
    n1, n2 = raw["wl1"].shape[0], raw["wl2"].shape[0]
    n1p, n2p, n3p = _round_up(n1, 128), _round_up(n2, 128), 128

    w1_hwio = jnp.transpose(raw["w1"], (2, 3, 1, 0)).astype(jnp.bfloat16)
    w2_hwio = jnp.transpose(raw["w2"], (2, 3, 1, 0)).astype(jnp.bfloat16)

    # lin1 weight: (out,in) -> (in,out); rows permuted from PyTorch NCHW-flat
    # order to the kernel's NHWC(+channel-pad) flatten order.
    hp2, wp2 = g2["hp"], g2["wp"]
    wl1_t = raw["wl1"].T.reshape(20, hp2, wp2, n1)
    wl1_hwc = jnp.transpose(wl1_t, (1, 2, 0, 3))
    wl1_hwc = jnp.pad(wl1_hwc, ((0, 0), (0, 0), (0, cg2 - 20), (0, 0)))
    wl1_hwc = wl1_hwc.reshape(hp2 * wp2 * cg2, n1)

    # K tiling for the dominant first linear weight, capped so 3 buffered
    # (tk, n1p) bf16 tiles stay well inside the scoped-VMEM budget (v7x-safe).
    k1 = hp2 * wp2 * cg2
    k1p = _round_up(k1, 128)
    max_tk_vmem = max(128, ((12 * 1024 * 1024) // (3 * 2 * n1p)) // 128 * 128)
    tk_target = min(2048, max_tk_vmem)
    gk = max(1, -(-k1p // tk_target))
    tk = _round_up(-(-k1p // gk), 128)
    k1pad = tk * gk

    wl1_pad = jnp.zeros((k1pad, n1p), jnp.float32).at[:k1, :n1].set(wl1_hwc)
    wl2_pad = jnp.zeros((n1p, n2p), jnp.float32).at[:n1, :n2].set(raw["wl2"].T)
    wl3_pad = jnp.zeros((n2p, n3p), jnp.float32).at[:n2, :104].set(raw["wl3"].T)

    kparams = dict(
        g1=g1, g2=g2, cin1_pad=cin1_pad, cg1=cg1, cg2=cg2, tk=tk, k1pad=k1pad,
        w1=_build_quad_pool_weight(w1_hwio, cin1_pad, cg1),
        b1=_pad_bias(raw["b1"], cg1),
        w2=_build_quad_pool_weight(w2_hwio, 128, cg2),
        b2=_pad_bias(raw["b2"], cg2),
        wl1=wl1_pad.astype(jnp.bfloat16), bl1=_pad_bias(raw["bl1"], n1p),
        wl2=wl2_pad.astype(jnp.bfloat16), bl2=_pad_bias(raw["bl2"], n2p),
        wl3=wl3_pad.astype(jnp.bfloat16), bl3=_pad_bias(raw["bl3"], n3p),
    )
    rparams = dict(
        w1=w1_hwio, b1=raw["b1"], w2=w2_hwio, b2=raw["b2"],
        wl1=raw["wl1"].T.astype(jnp.bfloat16), bl1=raw["bl1"],
        wl2=raw["wl2"].T.astype(jnp.bfloat16), bl2=raw["bl2"],
        wl3=raw["wl3"].T.astype(jnp.bfloat16), bl3=raw["bl3"],
    )
    return kparams, rparams


# ------------------------- plain-JAX reference ------------------------------

def reference_forward(rp, x_nchw):
    x = jnp.transpose(x_nchw, (0, 2, 3, 1)).astype(jnp.bfloat16)

    def stage(x, w_hwio, b):
        y = lax.conv_general_dilated(
            x, w_hwio, (1, 1), "VALID",
            dimension_numbers=("NHWC", "HWIO", "NHWC"),
            preferred_element_type=jnp.float32)
        y = jnp.maximum(y + b, 0.0)
        y = lax.reduce_window(y, -jnp.inf, lax.max,
                              (1, 2, 2, 1), (1, 2, 2, 1), "VALID")
        return y.astype(jnp.bfloat16)

    x = stage(x, rp["w1"], rp["b1"])
    x = stage(x, rp["w2"], rp["b2"])
    n = x.shape[0]
    x = jnp.transpose(x, (0, 3, 1, 2)).reshape(n, -1)     # PyTorch NCHW flatten

    def lin(x, w, b, relu):
        y = jnp.dot(x.astype(jnp.bfloat16), w,
                    preferred_element_type=jnp.float32) + b
        return jnp.maximum(y, 0.0) if relu else y

    x = lin(x, rp["wl1"], rp["bl1"], True)
    x = lin(x, rp["wl2"], rp["bl2"], True)
    x = lin(x, rp["wl3"], rp["bl3"], False)
    return x


# --------------------------------- main --------------------------------------

if __name__ == "__main__":
    # Small stand-in for the module's img_size = 100 (same derived-shape formula).
    img_size = 20
    layer1_neurons, layer2_neurons = 64, 32
    batch = 2

    key = jax.random.PRNGKey(0)
    pkey, xkey = jax.random.split(key)
    raw, img_sc, lin_in = init_raw_params(pkey, img_size,
                                          layer1_neurons, layer2_neurons)
    kparams, rparams = prepare_params(raw, img_size, img_sc, lin_in)

    x = jax.random.normal(xkey, (batch, 3, img_size, img_size), jnp.float32)

    fwd = jax.jit(functools.partial(conv_forward, kparams))
    out = jax.block_until_ready(fwd(x))
    assert out.shape == (batch, 104), out.shape

    ref = jax.block_until_ready(
        jax.jit(functools.partial(reference_forward, rparams))(x))
    max_err = float(jnp.max(jnp.abs(out - ref)))
    assert jnp.allclose(out, ref, atol=5e-3, rtol=5e-3), max_err

    print("KERNEL_OK")
</pallas_src>

<mosaic_0001>
module attributes {stable_mosaic.version = 11 : i64} {
  func.func @kernel(%arg0: i32, %arg1: memref<120x32xbf16, #tpu.memory_space<vmem>>, %arg2: memref<4x32x512xbf16, #tpu.memory_space<vmem>>, %arg3: memref<1x128xf32, #tpu.memory_space<vmem>>, %arg4: memref<120x128xbf16, #tpu.memory_space<vmem>>, %arg5: memref<104x512xf32, #tpu.memory_space<vmem>>) attributes {dimension_semantics = [#tpu.dimension_semantics<parallel>], iteration_bounds = array<i64: 2>, scalar_prefetch = 0 : i64, scratch_operands = 1 : i64, tpu.core_type = #tpu.core_type<tc>, window_params = [{transform_indices = @transform_0, window_bounds = array<i64: 120, 32>}, {pipeline_mode = #tpu.pipeline_mode<synchronous>, transform_indices = @transform_1, window_bounds = array<i64: 4, 32, 512>}, {pipeline_mode = #tpu.pipeline_mode<synchronous>, transform_indices = @transform_2, window_bounds = array<i64: 1, 128>}, {transform_indices = @transform_3, window_bounds = array<i64: 120, 128>}]} {
    %c0 = arith.constant 0 : index
    %c0_0 = arith.constant 0 : index
    %0 = vector.load %arg1[%c0, %c0_0] : memref<120x32xbf16, #tpu.memory_space<vmem>>, vector<104x32xbf16>
    %c0_1 = arith.constant 0 : index
    %c0_2 = arith.constant 0 : index
    %c0_3 = arith.constant 0 : index
    %1 = vector.load %arg2[%c0_1, %c0_2, %c0_3] : memref<4x32x512xbf16, #tpu.memory_space<vmem>>, vector<1x32x512xbf16>
    %2 = vector.shape_cast %1 : vector<1x32x512xbf16> to vector<32x512xbf16>
    %cst = arith.constant dense<0.000000e+00> : vector<104x512xf32>
    %3 = tpu.matmul %0, %2, %cst {dimension_numbers = #tpu.dot_dimension_numbers<[1], [0], [0], [1], [0, 0, 1, 1], [], []>} : vector<104x32xbf16>, vector<32x512xbf16>, vector<104x512xf32> -> vector<104x512xf32>
    %c0_4 = arith.constant 0 : index
    %c0_5 = arith.constant 0 : index
    %4 = vector.load %arg5[%c0_4, %c0_5] : memref<104x512xf32, #tpu.memory_space<vmem>>, vector<104x512xf32>
    tpu.vector_store %arg5[%c0_4, %c0_5], %3 {strides = array<i32>} : memref<104x512xf32, #tpu.memory_space<vmem>>, vector<104x512xf32>,
    %c0_6 = arith.constant 0 : index
    %c0_7 = arith.constant 0 : index
    %5 = vector.load %arg5[%c0_6, %c0_7] : memref<104x512xf32, #tpu.memory_space<vmem>>, vector<104x512xf32>
    %c1 = arith.constant 1 : index
    %c0_8 = arith.constant 0 : index
    %6 = vector.load %arg1[%c1, %c0_8] : memref<120x32xbf16, #tpu.memory_space<vmem>>, vector<104x32xbf16>
    %c1_9 = arith.constant 1 : index
    %c0_10 = arith.constant 0 : index
    %c0_11 = arith.constant 0 : index
    %7 = vector.load %arg2[%c1_9, %c0_10, %c0_11] : memref<4x32x512xbf16, #tpu.memory_space<vmem>>, vector<1x32x512xbf16>
    %8 = vector.shape_cast %7 : vector<1x32x512xbf16> to vector<32x512xbf16>
    %cst_12 = arith.constant dense<0.000000e+00> : vector<104x512xf32>
    %9 = tpu.matmul %6, %8, %cst_12 {dimension_numbers = #tpu.dot_dimension_numbers<[1], [0], [0], [1], [0, 0, 1, 1], [], []>} : vector<104x32xbf16>, vector<32x512xbf16>, vector<104x512xf32> -> vector<104x512xf32>
    %10 = arith.addf %5, %9 : vector<104x512xf32>
    %c0_13 = arith.constant 0 : index
    %c0_14 = arith.constant 0 : index
    %11 = vector.load %arg5[%c0_13, %c0_14] : memref<104x512xf32, #tpu.memory_space<vmem>>, vector<104x512xf32>
    tpu.vector_store %arg5[%c0_13, %c0_14], %10 {strides = array<i32>} : memref<104x512xf32, #tpu.memory_space<vmem>>, vector<104x512xf32>,
    %c0_15 = arith.constant 0 : index
    %c0_16 = arith.constant 0 : index
    %12 = vector.load %arg5[%c0_15, %c0_16] : memref<104x512xf32, #tpu.memory_space<vmem>>, vector<104x512xf32>
    %c10 = arith.constant 10 : index
    %c0_17 = arith.constant 0 : index
    %13 = vector.load %arg1[%c10, %c0_17] : memref<120x32xbf16, #tpu.memory_space<vmem>>, vector<104x32xbf16>
    %c2 = arith.constant 2 : index
    %c0_18 = arith.constant 0 : index
    %c0_19 = arith.constant 0 : index
    %14 = vector.load %arg2[%c2, %c0_18, %c0_19] : memref<4x32x512xbf16, #tpu.memory_space<vmem>>, vector<1x32x512xbf16>
    %15 = vector.shape_cast %14 : vector<1x32x512xbf16> to vector<32x512xbf16>
    %cst_20 = arith.constant dense<0.000000e+00> : vector<104x512xf32>
    %16 = tpu.matmul %13, %15, %cst_20 {dimension_numbers = #tpu.dot_dimension_numbers<[1], [0], [0], [1], [0, 0, 1, 1], [], []>} : vector<104x32xbf16>, vector<32x512xbf16>, vector<104x512xf32> -> vector<104x512xf32>
    %17 = arith.addf %12, %16 : vector<104x512xf32>
    %c0_21 = arith.constant 0 : index
    %c0_22 = arith.constant 0 : index
    %18 = vector.load %arg5[%c0_21, %c0_22] : memref<104x512xf32, #tpu.memory_space<vmem>>, vector<104x512xf32>
    tpu.vector_store %arg5[%c0_21, %c0_22], %17 {strides = array<i32>} : memref<104x512xf32, #tpu.memory_space<vmem>>, vector<104x512xf32>,
    %c0_23 = arith.constant 0 : index
    %c0_24 = arith.constant 0 : index
    %19 = vector.load %arg5[%c0_23, %c0_24] : memref<104x512xf32, #tpu.memory_space<vmem>>, vector<104x512xf32>
    %c11 = arith.constant 11 : index
    %c0_25 = arith.constant 0 : index
    %20 = vector.load %arg1[%c11, %c0_25] : memref<120x32xbf16, #tpu.memory_space<vmem>>, vector<104x32xbf16>
    %c3 = arith.constant 3 : index
    %c0_26 = arith.constant 0 : index
    %c0_27 = arith.constant 0 : index
    %21 = vector.load %arg2[%c3, %c0_26, %c0_27] : memref<4x32x512xbf16, #tpu.memory_space<vmem>>, vector<1x32x512xbf16>
    %22 = vector.shape_cast %21 : vector<1x32x512xbf16> to vector<32x512xbf16>
    %cst_28 = arith.constant dense<0.000000e+00> : vector<104x512xf32>
    %23 = tpu.matmul %20, %22, %cst_28 {dimension_numbers = #tpu.dot_dimension_numbers<[1], [0], [0], [1], [0, 0, 1, 1], [], []>} : vector<104x32xbf16>, vector<32x512xbf16>, vector<104x512xf32> -> vector<104x512xf32>
    %24 = arith.addf %19, %23 : vector<104x512xf32>
    %c0_29 = arith.constant 0 : index
    %c0_30 = arith.constant 0 : index
    %25 = vector.load %arg5[%c0_29, %c0_30] : memref<104x512xf32, #tpu.memory_space<vmem>>, vector<104x512xf32>
    tpu.vector_store %arg5[%c0_29, %c0_30], %24 {strides = array<i32>} : memref<104x512xf32, #tpu.memory_space<vmem>>, vector<104x512xf32>,
    %c0_31 = arith.constant 0 : index
    %c0_32 = arith.constant 0 : index
    %26 = vector.load %arg5[%c0_31, %c0_32] : memref<104x512xf32, #tpu.memory_space<vmem>>, vector<104x512xf32>
    %27 = vector.extract_strided_slice %26 {offsets = [0, 0], sizes = [104, 128], strides = [1, 1]} : vector<104x512xf32> to vector<104x128xf32>
    %28 = vector.extract_strided_slice %26 {offsets = [0, 128], sizes = [104, 128], strides = [1, 1]} : vector<104x512xf32> to vector<104x128xf32>
    %29 = arith.maximumf %27, %28 : vector<104x128xf32>
    %30 = vector.extract_strided_slice %26 {offsets = [0, 256], sizes = [104, 128], strides = [1, 1]} : vector<104x512xf32> to vector<104x128xf32>
    %31 = vector.extract_strided_slice %26 {offsets = [0, 384], sizes = [104, 128], strides = [1, 1]} : vector<104x512xf32> to vector<104x128xf32>
    %32 = arith.maximumf %30, %31 : vector<104x128xf32>
    %33 = arith.maximumf %29, %32 : vector<104x128xf32>
    %c0_33 = arith.constant 0 : index
    %c0_34 = arith.constant 0 : index
    %34 = vector.load %arg3[%c0_33, %c0_34] : memref<1x128xf32, #tpu.memory_space<vmem>>, vector<1x128xf32>
    %35 = vector.broadcast %34 : vector<1x128xf32> to vector<104x128xf32>
    %36 = arith.addf %33, %35 : vector<104x128xf32>
    %cst_35 = arith.constant 0.000000e+00 : f32
    %37 = vector.broadcast %cst_35 : f32 to vector<104x128xf32>
    %38 = arith.maximumf %36, %37 : vector<104x128xf32>
    %39 = arith.truncf %38 : vector<104x128xf32> to vector<104x128xbf16>
    %c0_36 = arith.constant 0 : index
    %c0_37 = arith.constant 0 : index
    %40 = vector.load %arg4[%c0_36, %c0_37] : memref<120x128xbf16, #tpu.memory_space<vmem>>, vector<104x128xbf16>
    tpu.vector_store %arg4[%c0_36, %c0_37], %39 {strides = array<i32>} : memref<120x128xbf16, #tpu.memory_space<vmem>>, vector<104x128xbf16>,
    return
  }
  func.func @transform_0(%arg0: i32) -> (i32, i32) {
    %c0_i32 = arith.constant 0 : i32
    %c0_i32_0 = arith.constant 0 : i32
    return %arg0, %c0_i32 : i32, i32
  }
  func.func @transform_1(%arg0: i32) -> (i32, i32, i32) {
    %c0_i32 = arith.constant 0 : i32
    %c0_i32_0 = arith.constant 0 : i32
    %c0_i32_1 = arith.constant 0 : i32
    %c0_i32_2 = arith.constant 0 : i32
    return %c0_i32, %c0_i32_0, %c0_i32_1 : i32, i32, i32
  }
  func.func @transform_2(%arg0: i32) -> (i32, i32) {
    %c0_i32 = arith.constant 0 : i32
    %c0_i32_0 = arith.constant 0 : i32
    %c0_i32_1 = arith.constant 0 : i32
    return %c0_i32, %c0_i32_0 : i32, i32
  }
  func.func @transform_3(%arg0: i32) -> (i32, i32) {
    %c0_i32 = arith.constant 0 : i32
    %c0_i32_0 = arith.constant 0 : i32
    return %arg0, %c0_i32 : i32, i32
  }
}

module attributes {stable_mosaic.version = 11 : i64} {
  func.func @kernel(%arg0: i32, %arg1: memref<48x512xbf16, #tpu.memory_space<vmem>>, %arg2: memref<4x512x128xbf16, #tpu.memory_space<vmem>>, %arg3: memref<1x32xf32, #tpu.memory_space<vmem>>, %arg4: memref<48x32xbf16, #tpu.memory_space<vmem>>, %arg5: memref<40x128xf32, #tpu.memory_space<vmem>>) attributes {dimension_semantics = [#tpu.dimension_semantics<parallel>], iteration_bounds = array<i64: 1>, scalar_prefetch = 0 : i64, scratch_operands = 1 : i64, tpu.core_type = #tpu.core_type<tc>, window_params = [{transform_indices = @transform_0, window_bounds = array<i64: 48, 512>}, {pipeline_mode = #tpu.pipeline_mode<synchronous>, transform_indices = @transform_1, window_bounds = array<i64: 4, 512, 128>}, {pipeline_mode = #tpu.pipeline_mode<synchronous>, transform_indices = @transform_2, window_bounds = array<i64: 1, 32>}, {transform_indices = @transform_3, window_bounds = array<i64: 48, 32>}]} {
    %c0 = arith.constant 0 : index
    %c0_0 = arith.constant 0 : index
    %0 = vector.load %arg1[%c0, %c0_0] : memref<48x512xbf16, #tpu.memory_space<vmem>>, vector<40x512xbf16>
    %c0_1 = arith.constant 0 : index
    %c0_2 = arith.constant 0 : index
    %c0_3 = arith.constant 0 : index
    %1 = vector.load %arg2[%c0_1, %c0_2, %c0_3] : memref<4x512x128xbf16, #tpu.memory_space<vmem>>, vector<1x512x128xbf16>
    %2 = vector.shape_cast %1 : vector<1x512x128xbf16> to vector<512x128xbf16>
    %cst = arith.constant dense<0.000000e+00> : vector<40x128xf32>
    %3 = tpu.matmul %0, %2, %cst {dimension_numbers = #tpu.dot_dimension_numbers<[1], [0], [0], [1], [0, 0, 1, 1], [], []>} : vector<40x512xbf16>, vector<512x128xbf16>, vector<40x128xf32> -> vector<40x128xf32>
    %c0_4 = arith.constant 0 : index
    %c0_5 = arith.constant 0 : index
    %4 = vector.load %arg5[%c0_4, %c0_5] : memref<40x128xf32, #tpu.memory_space<vmem>>, vector<40x128xf32>
    tpu.vector_store %arg5[%c0_4, %c0_5], %3 {strides = array<i32>} : memref<40x128xf32, #tpu.memory_space<vmem>>, vector<40x128xf32>,
    %c0_6 = arith.constant 0 : index
    %c0_7 = arith.constant 0 : index
    %5 = vector.load %arg5[%c0_6, %c0_7] : memref<40x128xf32, #tpu.memory_space<vmem>>, vector<40x128xf32>
    %c1 = arith.constant 1 : index
    %c0_8 = arith.constant 0 : index
    %6 = vector.load %arg1[%c1, %c0_8] : memref<48x512xbf16, #tpu.memory_space<vmem>>, vector<40x512xbf16>
    %c1_9 = arith.constant 1 : index
    %c0_10 = arith.constant 0 : index
    %c0_11 = arith.constant 0 : index
    %7 = vector.load %arg2[%c1_9, %c0_10, %c0_11] : memref<4x512x128xbf16, #tpu.memory_space<vmem>>, vector<1x512x128xbf16>
    %8 = vector.shape_cast %7 : vector<1x512x128xbf16> to vector<512x128xbf16>
    %cst_12 = arith.constant dense<0.000000e+00> : vector<40x128xf32>
    %9 = tpu.matmul %6, %8, %cst_12 {dimension_numbers = #tpu.dot_dimension_numbers<[1], [0], [0], [1], [0, 0, 1, 1], [], []>} : vector<40x512xbf16>, vector<512x128xbf16>, vector<40x128xf32> -> vector<40x128xf32>
    %10 = arith.addf %5, %9 : vector<40x128xf32>
    %c0_13 = arith.constant 0 : index
    %c0_14 = arith.constant 0 : index
    %11 = vector.load %arg5[%c0_13, %c0_14] : memref<40x128xf32, #tpu.memory_space<vmem>>, vector<40x128xf32>
    tpu.vector_store %arg5[%c0_13, %c0_14], %10 {strides = array<i32>} : memref<40x128xf32, #tpu.memory_space<vmem>>, vector<40x128xf32>,
    %c0_15 = arith.constant 0 : index
    %c0_16 = arith.constant 0 : index
    %12 = vector.load %arg5[%c0_15, %c0_16] : memref<40x128xf32, #tpu.memory_space<vmem>>, vector<40x128xf32>
    %c4 = arith.constant 4 : index
    %c0_17 = arith.constant 0 : index
    %13 = vector.load %arg1[%c4, %c0_17] : memref<48x512xbf16, #tpu.memory_space<vmem>>, vector<40x512xbf16>
    %c2 = arith.constant 2 : index
    %c0_18 = arith.constant 0 : index
    %c0_19 = arith.constant 0 : index
    %14 = vector.load %arg2[%c2, %c0_18, %c0_19] : memref<4x512x128xbf16, #tpu.memory_space<vmem>>, vector<1x512x128xbf16>
    %15 = vector.shape_cast %14 : vector<1x512x128xbf16> to vector<512x128xbf16>
    %cst_20 = arith.constant dense<0.000000e+00> : vector<40x128xf32>
    %16 = tpu.matmul %13, %15, %cst_20 {dimension_numbers = #tpu.dot_dimension_numbers<[1], [0], [0], [1], [0, 0, 1, 1], [], []>} : vector<40x512xbf16>, vector<512x128xbf16>, vector<40x128xf32> -> vector<40x128xf32>
    %17 = arith.addf %12, %16 : vector<40x128xf32>
    %c0_21 = arith.constant 0 : index
    %c0_22 = arith.constant 0 : index
    %18 = vector.load %arg5[%c0_21, %c0_22] : memref<40x128xf32, #tpu.memory_space<vmem>>, vector<40x128xf32>
    tpu.vector_store %arg5[%c0_21, %c0_22], %17 {strides = array<i32>} : memref<40x128xf32, #tpu.memory_space<vmem>>, vector<40x128xf32>,
    %c0_23 = arith.constant 0 : index
    %c0_24 = arith.constant 0 : index
    %19 = vector.load %arg5[%c0_23, %c0_24] : memref<40x128xf32, #tpu.memory_space<vmem>>, vector<40x128xf32>
    %c5 = arith.constant 5 : index
    %c0_25 = arith.constant 0 : index
    %20 = vector.load %arg1[%c5, %c0_25] : memref<48x512xbf16, #tpu.memory_space<vmem>>, vector<40x512xbf16>
    %c3 = arith.constant 3 : index
    %c0_26 = arith.constant 0 : index
    %c0_27 = arith.constant 0 : index
    %21 = vector.load %arg2[%c3, %c0_26, %c0_27] : memref<4x512x128xbf16, #tpu.memory_space<vmem>>, vector<1x512x128xbf16>
    %22 = vector.shape_cast %21 : vector<1x512x128xbf16> to vector<512x128xbf16>
    %cst_28 = arith.constant dense<0.000000e+00> : vector<40x128xf32>
    %23 = tpu.matmul %20, %22, %cst_28 {dimension_numbers = #tpu.dot_dimension_numbers<[1], [0], [0], [1], [0, 0, 1, 1], [], []>} : vector<40x512xbf16>, vector<512x128xbf16>, vector<40x128xf32> -> vector<40x128xf32>
    %24 = arith.addf %19, %23 : vector<40x128xf32>
    %c0_29 = arith.constant 0 : index
    %c0_30 = arith.constant 0 : index
    %25 = vector.load %arg5[%c0_29, %c0_30] : memref<40x128xf32, #tpu.memory_space<vmem>>, vector<40x128xf32>
    tpu.vector_store %arg5[%c0_29, %c0_30], %24 {strides = array<i32>} : memref<40x128xf32, #tpu.memory_space<vmem>>, vector<40x128xf32>,
    %c0_31 = arith.constant 0 : index
    %c0_32 = arith.constant 0 : index
    %26 = vector.load %arg5[%c0_31, %c0_32] : memref<40x128xf32, #tpu.memory_space<vmem>>, vector<40x128xf32>
    %27 = vector.extract_strided_slice %26 {offsets = [0, 0], sizes = [40, 32], strides = [1, 1]} : vector<40x128xf32> to vector<40x32xf32>
    %28 = vector.extract_strided_slice %26 {offsets = [0, 32], sizes = [40, 32], strides = [1, 1]} : vector<40x128xf32> to vector<40x32xf32>
    %29 = arith.maximumf %27, %28 : vector<40x32xf32>
    %30 = vector.extract_strided_slice %26 {offsets = [0, 64], sizes = [40, 32], strides = [1, 1]} : vector<40x128xf32> to vector<40x32xf32>
    %31 = vector.extract_strided_slice %26 {offsets = [0, 96], sizes = [40, 32], strides = [1, 1]} : vector<40x128xf32> to vector<40x32xf32>
    %32 = arith.maximumf %30, %31 : vector<40x32xf32>
    %33 = arith.maximumf %29, %32 : vector<40x32xf32>
    %c0_33 = arith.constant 0 : index
    %c0_34 = arith.constant 0 : index
    %34 = vector.load %arg3[%c0_33, %c0_34] : memref<1x32xf32, #tpu.memory_space<vmem>>, vector<1x32xf32>
    %35 = vector.broadcast %34 : vector<1x32xf32> to vector<40x32xf32>
    %36 = arith.addf %33, %35 : vector<40x32xf32>
    %cst_35 = arith.constant 0.000000e+00 : f32
    %37 = vector.broadcast %cst_35 : f32 to vector<40x32xf32>
    %38 = arith.maximumf %36, %37 : vector<40x32xf32>
    %39 = arith.truncf %38 : vector<40x32xf32> to vector<40x32xbf16>
    %c0_36 = arith.constant 0 : index
    %c0_37 = arith.constant 0 : index
    %40 = vector.load %arg4[%c0_36, %c0_37] : memref<48x32xbf16, #tpu.memory_space<vmem>>, vector<40x32xbf16>
    tpu.vector_store %arg4[%c0_36, %c0_37], %39 {strides = array<i32>} : memref<48x32xbf16, #tpu.memory_space<vmem>>, vector<40x32xbf16>,
    return
  }
  func.func @transform_0(%arg0: i32) -> (i32, i32) {
    %c0_i32 = arith.constant 0 : i32
    %c0_i32_0 = arith.constant 0 : i32
    return %arg0, %c0_i32 : i32, i32
  }
  func.func @transform_1(%arg0: i32) -> (i32, i32, i32) {
    %c0_i32 = arith.constant 0 : i32
    %c0_i32_0 = arith.constant 0 : i32
    %c0_i32_1 = arith.constant 0 : i32
    %c0_i32_2 = arith.constant 0 : i32
    return %c0_i32, %c0_i32_0, %c0_i32_1 : i32, i32, i32
  }
  func.func @transform_2(%arg0: i32) -> (i32, i32) {
    %c0_i32 = arith.constant 0 : i32
    %c0_i32_0 = arith.constant 0 : i32
    %c0_i32_1 = arith.constant 0 : i32
    return %c0_i32, %c0_i32_0 : i32, i32
  }
  func.func @transform_3(%arg0: i32) -> (i32, i32) {
    %c0_i32 = arith.constant 0 : i32
    %c0_i32_0 = arith.constant 0 : i32
    return %arg0, %c0_i32 : i32, i32
  }
}

module attributes {stable_mosaic.version = 11 : i64} {
  func.func @_mlp_kernel(%arg0: i32, %arg1: i32, %arg2: memref<8x384xbf16, #tpu.memory_space<vmem>>, %arg3: memref<384x128xbf16, #tpu.memory_space<vmem>>, %arg4: memref<1x128xf32, #tpu.memory_space<vmem>>, %arg5: memref<128x128xbf16, #tpu.memory_space<vmem>>, %arg6: memref<1x128xf32, #tpu.memory_space<vmem>>, %arg7: memref<128x128xbf16, #tpu.memory_space<vmem>>, %arg8: memref<1x128xf32, #tpu.memory_space<vmem>>, %arg9: memref<8x128xf32, #tpu.memory_space<vmem>>, %arg10: memref<8x128xf32, #tpu.memory_space<vmem>>) attributes {dimension_semantics = [#tpu.dimension_semantics<parallel>, #tpu.dimension_semantics<arbitrary>], iteration_bounds = array<i64: 2, 1>, scalar_prefetch = 0 : i64, scratch_operands = 1 : i64, tpu.core_type = #tpu.core_type<tc>, window_params = [{transform_indices = @transform_0, window_bounds = array<i64: 8, 384>}, {transform_indices = @transform_1, window_bounds = array<i64: 384, 128>}, {pipeline_mode = #tpu.pipeline_mode<synchronous>, transform_indices = @transform_2, window_bounds = array<i64: 1, 128>}, {pipeline_mode = #tpu.pipeline_mode<synchronous>, transform_indices = @transform_3, window_bounds = array<i64: 128, 128>}, {pipeline_mode = #tpu.pipeline_mode<synchronous>, transform_indices = @transform_4, window_bounds = array<i64: 1, 128>}, {pipeline_mode = #tpu.pipeline_mode<synchronous>, transform_indices = @transform_5, window_bounds = array<i64: 128, 128>}, {pipeline_mode = #tpu.pipeline_mode<synchronous>, transform_indices = @transform_6, window_bounds = array<i64: 1, 128>}, {transform_indices = @transform_7, window_bounds = array<i64: 8, 128>}]} {
    %c0_i32 = arith.constant 0 : i32
    %0 = arith.cmpi eq, %arg1, %c0_i32 : i32
    %1 = arith.extui %0 : i1 to i32
    %c0_i32_0 = arith.constant 0 : i32
    %2 = arith.cmpi ne, %1, %c0_i32_0 : i32
    scf.if %2 {
      %cst_10 = arith.constant 0.000000e+00 : f32
      %12 = vector.broadcast %cst_10 : f32 to vector<8x128xf32>
      %c0_11 = arith.constant 0 : index
      %c0_12 = arith.constant 0 : index
      %13 = vector.load %arg10[%c0_11, %c0_12] : memref<8x128xf32, #tpu.memory_space<vmem>>, vector<8x128xf32>
      tpu.vector_store %arg10[%c0_11, %c0_12], %12 {strides = array<i32>} : memref<8x128xf32, #tpu.memory_space<vmem>>, vector<8x128xf32>,
    } else {
    }
    %c0 = arith.constant 0 : index
    %c0_1 = arith.constant 0 : index
    %3 = vector.load %arg10[%c0, %c0_1] : memref<8x128xf32, #tpu.memory_space<vmem>>, vector<8x128xf32>
    %c0_2 = arith.constant 0 : index
    %c0_3 = arith.constant 0 : index
    %4 = vector.load %arg2[%c0_2, %c0_3] : memref<8x384xbf16, #tpu.memory_space<vmem>>, vector<8x384xbf16>
    %c0_4 = arith.constant 0 : index
    %c0_5 = arith.constant 0 : index
    %5 = vector.load %arg3[%c0_4, %c0_5] : memref<384x128xbf16, #tpu.memory_space<vmem>>, vector<384x128xbf16>
    %cst = arith.constant dense<0.000000e+00> : vector<8x128xf32>
    %6 = tpu.matmul %4, %5, %cst {dimension_numbers = #tpu.dot_dimension_numbers<[1], [0], [0], [1], [0, 0, 1, 1], [], []>} : vector<8x384xbf16>, vector<384x128xbf16>, vector<8x128xf32> -> vector<8x128xf32>
    %7 = arith.addf %3, %6 : vector<8x128xf32>
    %c0_6 = arith.constant 0 : index
    %c0_7 = arith.constant 0 : index
    %8 = vector.load %arg10[%c0_6, %c0_7] : memref<8x128xf32, #tpu.memory_space<vmem>>, vector<8x128xf32>
    tpu.vector_store %arg10[%c0_6, %c0_7], %7 {strides = array<i32>} : memref<8x128xf32, #tpu.memory_space<vmem>>, vector<8x128xf32>,
    %c0_i32_8 = arith.constant 0 : i32
    %9 = arith.cmpi eq, %arg1, %c0_i32_8 : i32
    %10 = arith.extui %9 : i1 to i32
    %c0_i32_9 = arith.constant 0 : i32
    %11 = arith.cmpi ne, %10, %c0_i32_9 : i32
    scf.if %11 {
      %c0_10 = arith.constant 0 : index
      %c0_11 = arith.constant 0 : index
      %12 = vector.load %arg10[%c0_10, %c0_11] : memref<8x128xf32, #tpu.memory_space<vmem>>, vector<8x128xf32>
      %c0_12 = arith.constant 0 : index
      %c0_13 = arith.constant 0 : index
      %13 = vector.load %arg4[%c0_12, %c0_13] : memref<1x128xf32, #tpu.memory_space<vmem>>, vector<1x128xf32>
      %14 = vector.broadcast %13 : vector<1x128xf32> to vector<8x128xf32>
      %15 = arith.addf %12, %14 : vector<8x128xf32>
      %cst_14 = arith.constant 0.000000e+00 : f32
      %16 = vector.broadcast %cst_14 : f32 to vector<8x128xf32>
      %17 = arith.maximumf %15, %16 : vector<8x128xf32>
      %18 = arith.truncf %17 : vector<8x128xf32> to vector<8x128xbf16>
      %c0_15 = arith.constant 0 : index
      %c0_16 = arith.constant 0 : index
      %19 = vector.load %arg5[%c0_15, %c0_16] : memref<128x128xbf16, #tpu.memory_space<vmem>>, vector<128x128xbf16>
      %cst_17 = arith.constant dense<0.000000e+00> : vector<8x128xf32>
      %20 = tpu.matmul %18, %19, %cst_17 {dimension_numbers = #tpu.dot_dimension_numbers<[1], [0], [0], [1], [0, 0, 1, 1], [], []>} : vector<8x128xbf16>, vector<128x128xbf16>, vector<8x128xf32> -> vector<8x128xf32>
      %c0_18 = arith.constant 0 : index
      %c0_19 = arith.constant 0 : index
      %21 = vector.load %arg6[%c0_18, %c0_19] : memref<1x128xf32, #tpu.memory_space<vmem>>, vector<1x128xf32>
      %22 = vector.broadcast %21 : vector<1x128xf32> to vector<8x128xf32>
      %23 = arith.addf %20, %22 : vector<8x128xf32>
      %cst_20 = arith.constant 0.000000e+00 : f32
      %24 = vector.broadcast %cst_20 : f32 to vector<8x128xf32>
      %25 = arith.maximumf %23, %24 : vector<8x128xf32>
      %26 = arith.truncf %25 : vector<8x128xf32> to vector<8x128xbf16>
      %c0_21 = arith.constant 0 : index
      %c0_22 = arith.constant 0 : index
      %27 = vector.load %arg7[%c0_21, %c0_22] : memref<128x128xbf16, #tpu.memory_space<vmem>>, vector<128x128xbf16>
      %cst_23 = arith.constant dense<0.000000e+00> : vector<8x128xf32>
      %28 = tpu.matmul %26, %27, %cst_23 {dimension_numbers = #tpu.dot_dimension_numbers<[1], [0], [0], [1], [0, 0, 1, 1], [], []>} : vector<8x128xbf16>, vector<128x128xbf16>, vector<8x128xf32> -> vector<8x128xf32>
      %c0_24 = arith.constant 0 : index
      %c0_25 = arith.constant 0 : index
      %29 = vector.load %arg8[%c0_24, %c0_25] : memref<1x128xf32, #tpu.memory_space<vmem>>, vector<1x128xf32>
      %30 = vector.broadcast %29 : vector<1x128xf32> to vector<8x128xf32>
      %31 = arith.addf %28, %30 : vector<8x128xf32>
      %c0_26 = arith.constant 0 : index
      %c0_27 = arith.constant 0 : index
      %32 = vector.load %arg9[%c0_26, %c0_27] : memref<8x128xf32, #tpu.memory_space<vmem>>, vector<8x128xf32>
      tpu.vector_store %arg9[%c0_26, %c0_27], %31 {strides = array<i32>} : memref<8x128xf32, #tpu.memory_space<vmem>>, vector<8x128xf32>,
    } else {
    }
    return
  }
  func.func @transform_0(%arg0: i32, %arg1: i32) -> (i32, i32) {
    %c0_i32 = arith.constant 0 : i32
    return %arg0, %arg1 : i32, i32
  }
  func.func @transform_1(%arg0: i32, %arg1: i32) -> (i32, i32) {
    %c0_i32 = arith.constant 0 : i32
    %c0_i32_0 = arith.constant 0 : i32
    return %arg1, %c0_i32 : i32, i32
  }
  func.func @transform_2(%arg0: i32, %arg1: i32) -> (i32, i32) {
    %c0_i32 = arith.constant 0 : i32
    %c0_i32_0 = arith.constant 0 : i32
    %c0_i32_1 = arith.constant 0 : i32
    return %c0_i32, %c0_i32_0 : i32, i32
  }
  func.func @transform_3(%arg0: i32, %arg1: i32) -> (i32, i32) {
    %c0_i32 = arith.constant 0 : i32
    %c0_i32_0 = arith.constant 0 : i32
    %c0_i32_1 = arith.constant 0 : i32
    return %c0_i32, %c0_i32_0 : i32, i32
  }
  func.func @transform_4(%arg0: i32, %arg1: i32) -> (i32, i32) {
    %c0_i32 = arith.constant 0 : i32
    %c0_i32_0 = arith.constant 0 : i32
    %c0_i32_1 = arith.constant 0 : i32
    return %c0_i32, %c0_i32_0 : i32, i32
  }
  func.func @transform_5(%arg0: i32, %arg1: i32) -> (i32, i32) {
    %c0_i32 = arith.constant 0 : i32
    %c0_i32_0 = arith.constant 0 : i32
    %c0_i32_1 = arith.constant 0 : i32
    return %c0_i32, %c0_i32_0 : i32, i32
  }
  func.func @transform_6(%arg0: i32, %arg1: i32) -> (i32, i32) {
    %c0_i32 = arith.constant 0 : i32
    %c0_i32_0 = arith.constant 0 : i32
    %c0_i32_1 = arith.constant 0 : i32
    return %c0_i32, %c0_i32_0 : i32, i32
  }
  func.func @transform_7(%arg0: i32, %arg1: i32) -> (i32, i32) {
    %c0_i32 = arith.constant 0 : i32
    %c0_i32_0 = arith.constant 0 : i32
    return %arg0, %c0_i32 : i32, i32
  }
}

</mosaic_0001>

<bundles_post_ra>
// kernel: conv_forward.3
= control target key start
LH: loop header
LB: loop body
LE: loop exit
PB: predicated region body
PF: predicated region fallthrough
CT: control target
= control target key end

     0   :  { %s2680_s12 = smov 0   ;;  %s3443_s0 = inlined_call_operand.vmem [shape: bf16[240,32], index: 0, kind: input, shape index: {}]   ;;  %s3444_s1 = inlined_call_operand.vmem [shape: bf16[4,32,512], index: 1, kind: input, shape index: {}]   ;;  %s3445_s2 = inlined_call_operand.vmem [shape: f32[1,128], index: 2, kind: input, shape index: {}]   ;;  %s3446_s3 = inlined_call_operand.vmem [shape: bf16[240,128], index: 3, kind: output, shape index: {}]  }
   0x1 LB: > { %s2355_s13 = sadd.s32 4294967295, %s2657_s12   ;;  %p2359_p0 = scmp.ge.s32.totalorder %s2657_s12, 1  ;;  %s2657_s12 = sphi %s2680_s12, %s13_s12  }
   0x2   : > { %p138_p1 = scmp.lt.s32.totalorder %s2657_s12, 3 }
   0x4   : > { %p139_p2 = pnand %p2359_p0, %p138_p1 }
   0x6   : > { %142 = sbr.rel (%p139_p2) target bundleno = 445 (0x1bd), region = 32 }
   0xb   : > { %v2575_v0 = vld [vmem:[%s3444_s1 + $0x24] ss:$16 sps:$4 sm:$0xff]   ;;  %s162_s16 = smul.u32 15, %s2355_s13  ;;  %v2577_v1 = vld [vmem:[%s3444_s1 + $0x2c] ss:$16 sps:$4 sm:$0xff]   ;;  %v2659_v2 = vmov 0  }
   0xc   : > { %323 = vmatprep.mubr.bf16.mxu0 %v2659_v2  ;;  %424 = vmatprep.mubr.bf16.mxu1 %v2659_v2  ;;  %v2579_v3 = vld [vmem:[%s3444_s1 + $0x20] ss:$16 sps:$4 sm:$0xff]   ;;  %v2580_v4 = vld [vmem:[%s3444_s1 + $0x28] ss:$16 sps:$4 sm:$0xff]   ;;  %v2581_v5 = vld [vmem:[%s3444_s1 + $0x4] ss:$16 sps:$4 sm:$0xff]  }
   0xd   : > { %303 = vmatprep.subr.bf16.mxu0 %v2575_v0  ;;  %p163_p3 = scmp.lt.s32.totalorder %s162_s16, 29  ;;  %404 = vmatprep.subr.bf16.mxu1 %v2577_v1  ;;  %v2583_v6 = vld [vmem:[%s3444_s1 + $0xc] ss:$16 sps:$4 sm:$0xff]   ;;  %v2585_v7 = vld [vmem:[%s3444_s1] ss:$16 sps:$4 sm:$0xff]   ;;  %vm269_vm0 = vcmask 261120  }
   0xe   : > { %304 = vmatpush1.bf16.msra.mxu0 %v2579_v3  ;;  %405 = vmatpush1.bf16.msra.mxu1 %v2580_v4  ;;  %v2586_v8 = vld [vmem:[%s3444_s1 + $0x8] ss:$16 sps:$4 sm:$0xff]   ;;  %v2588_v9 = vld [vmem:[%s3444_s1 + $0x60] ss:$16 sps:$4 sm:$0xff]   ;;  %v2590_v10 = vld [vmem:[%s3444_s1 + $0x64] ss:$16 sps:$4 sm:$0xff]  }
   0xf   : > { %s3560_s16 = smov (!%p163_p3, %s162_s16), 29  ;;  %305 = vmatprep.subr.bf16.mxu0 %v2581_v5  ;;  %406 = vmatprep.subr.bf16.mxu1 %v2583_v6  ;;  %v2591_v11 = vld [vmem:[%s3444_s1 + $0x68] ss:$16 sps:$4 sm:$0xff]   ;;  %v2593_v12 = vld [vmem:[%s3444_s1 + $0x6c] ss:$16 sps:$4 sm:$0xff]   ;;  %vm1188_vm2 = vcmask 1046528  }
  0x10   : > { %s2360_s4 = sshll.u32 %s3560_s16, 2  ;;  %v2597_v14 = vld [vmem:[%s3444_s1 + $0x40] ss:$16 sps:$4 sm:$0xff]   ;;  %v2599_v15 = vld [vmem:[%s3444_s1 + $0x44] ss:$16 sps:$4 sm:$0xff]  }
  0x11   : > { %s2728_s11 = scalar_lea.vmem %s3443_s0, %s2360_s4  ;;  %v2600_v16 = vld [vmem:[%s3444_s1 + $0x48] ss:$16 sps:$4 sm:$0xff]   ;;  %v2602_v17 = vld [vmem:[%s3444_s1 + $0x4c] ss:$16 sps:$4 sm:$0xff]   ;;  %v2610_v19 = vld [vmem:[%s3444_s1 + $0xa4] ss:$16 sps:$4 sm:$0xff]   ;;  %s3354_s14 = scalar_lea.vmem %s3446_s3, %s2360_s4 }
  0x12   : > { %306 = vmatpush1.bf16.msra.mxu0 %v2585_v7  ;;  %407 = vmatpush1.bf16.msra.mxu1 %v2586_v8  ;;  %v2587_v13 = vld [vmem:[%s2728_s11] sm:$0xff]   ;;  %v2594_v18 = vld [vmem:[%s2728_s11 + $0x8] sm:$0xff]   ;;  %v2595_v21 = vld [vmem:[%s2728_s11 + $0x10] sm:$0xff]   ;;  %vm655_vm1 = vsmask.f32 7424 }
  0x13   : > { %784 = vmatprep.subr.bf16.mxu0 %v2590_v10  ;;  %885 = vmatprep.subr.bf16.mxu1 %v2593_v12  ;;  %v2613_v20 = vld [vmem:[%s3444_s1 + $0xac] ss:$16 sps:$4 sm:$0xff]   ;;  %v2603_v23 = vld [vmem:[%s2728_s11 + $0x20] sm:$0xff]   ;;  %v2605_v28 = vld [vmem:[%s2728_s11 + $0x30] ss:$0 sps:$4 sm:$0xff]  }
  0x14   : > { %v2596_v22 = vld [vmem:[%s2728_s11 + $0x18] sm:$0xff]   ;;  %v2604_v24 = vld [vmem:[%s2728_s11 + $0x28] sm:$0xff]   ;;  %v2606_v25 = vld [vmem:[%s2728_s11] sm:$0xff]   ;;  %vm1679_vm3 = vsmask.f32 6400 }
  0x15   : > { %2377 = vmatmul.mubr.msk.bf16.vlgmr.msra.gmra.mxu0 %vm269_vm0, %v2587_v13  ;;  %2384 = vmatmul.mubr.msk.bf16.vlgmr.msra.gmra.mxu1 %vm269_vm0, %v2587_v13  ;;  %v2607_v26 = vld [vmem:[%s2728_s11 + $0x8] sm:$0xff]   ;;  %v659_v27 = vshll.u32 %v2606_v25, 16  ;;  %v657_v29 = vshrl.u32 %v2606_v25, 16  ;;  %v2614_v34 = vld [vmem:[%s2728_s11 + $0x10] sm:$0xff]   ;;  %v2615_v44 = vld [vmem:[%s2728_s11 + $0x18] sm:$0xff]  }
  0x16   : > { %785 = vmatpush1.bf16.msra.mxu0 %v2588_v9  ;;  %886 = vmatpush1.bf16.msra.mxu1 %v2591_v11  ;;  %v664_v31 = vshll.u32 %v2607_v26, 16  ;;  %v2608_v36 = vld [vmem:[%s3444_s1 + $0xa0] ss:$16 sps:$4 sm:$0xff]   ;;  %v2611_v37 = vld [vmem:[%s3444_s1 + $0xa8] ss:$16 sps:$4 sm:$0xff]   ;;  %v668_v38 = vshrl.u32 %v2607_v26, 16 }
  0x17   : > { %333 = vmatprep.mubr.bf16.mxu0 %v2659_v2  ;;  %434 = vmatprep.mubr.bf16.mxu1 %v2659_v2  ;;  %v661_v30 = vrot.slane %v659_v27, 1  ;;  %v672_v39 = vshll.u32 %v2614_v34, 16  ;;  %v2619_v40 = vld [vmem:[%s3444_s1 + $0x84] ss:$16 sps:$4 sm:$0xff]   ;;  %v2622_v41 = vld [vmem:[%s3444_s1 + $0x8c] ss:$16 sps:$4 sm:$0xff]  }
  0x18   : > { %786 = vmatprep.subr.bf16.mxu0 %v2599_v15  ;;  %887 = vmatprep.subr.bf16.mxu1 %v2602_v17  ;;  %v666_v33 = vrot.slane %v664_v31, 1  ;;  %v2617_v45 = vld [vmem:[%s3444_s1 + $0x80] ss:$16 sps:$4 sm:$0xff]   ;;  %v2620_v46 = vld [vmem:[%s3444_s1 + $0x88] ss:$16 sps:$4 sm:$0xff]   ;;  %v676_v50 = vshrl.u32 %v2614_v34, 16 }
  0x19   : > { %v662_v32 = vor.u32 %v661_v30, %v657_v29  ;;  %v674_v43 = vrot.slane %v672_v39, 1  ;;  %v2629_v47 = vld [vmem:[%s3444_s1 + $0xe4] ss:$16 sps:$4 sm:$0xff]   ;;  %v2632_v48 = vld [vmem:[%s3444_s1 + $0xec] ss:$16 sps:$4 sm:$0xff]   ;;  %v680_v51 = vshll.u32 %v2615_v44, 16 }
  0x1a   : > { %787 = vmatpush1.bf16.msra.mxu0 %v2597_v14  ;;  %888 = vmatpush1.bf16.msra.mxu1 %v2600_v16  ;;  %v670_v42 = vor.u32 %v668_v38, %v666_v33  ;;  %v2616_v54 = vld [vmem:[%s2728_s11 + $0x20] sm:$0xff]   ;;  %v684_v56 = vshrl.u32 %v2615_v44, 16  ;;  %v2623_v60 = vld [vmem:[%s2728_s11 + $0x28] sm:$0xff]   ;;  %v2624_v3 = vld [vmem:[%s2728_s11 + $0x30] sm:$0x1f]  }
  0x1b   : > { %1275 = vmatprep.subr.bf16.mxu0 %v2610_v19  ;;  %1376 = vmatprep.subr.bf16.mxu1 %v2613_v20  ;;  %v667_v35 = vsel %vm655_vm1, %v662_v32, %v666_v33  ;;  %v678_v52 = vor.u32 %v676_v50, %v674_v43  ;;  %v682_v53 = vrot.slane %v680_v51, 1  ;;  %v688_v57 = vshll.u32 %v2616_v54, 16  ;;  %v2625_v12 = vld [vmem:[%s2728_s11 + $0x4] sm:$0xfe]   ;;  %v2626_v13 = vld [vmem:[%s2728_s11 + $0xc] sm:$0xff]   ;;  %v2633_v19 = vld [vmem:[%s2728_s11 + $0x14] sm:$0xff]  }
  0x1c   : > { %v675_v49 = vsel %vm655_vm1, %v670_v42, %v674_v43  ;;  %v692_v62 = vshrl.u32 %v2616_v54, 16  ;;  %v696_v63 = vshll.u32 %v2623_v60, 16  ;;  %v700_v5 = vshrl.u32 %v2623_v60, 16  ;;  %v2627_v17 = vld [vmem:[%s3444_s1 + $0xe0] ss:$16 sps:$4 sm:$0xff]   ;;  %v2635_v29 = vld [vmem:[%s2728_s11 + $0x24] sm:$0xff]  }
  0x1d   : > { %2378 = vmatmul.mubr.msk.bf16.gmra.mxu0 %vm269_vm0, %v2594_v18  ;;  %2385 = vmatmul.mubr.msk.bf16.gmra.mxu1 %vm269_vm0, %v2594_v18  ;;  %v683_v55 = vsel %vm655_vm1, %v678_v52, %v682_v53  ;;  %v686_v58 = vor.u32 %v684_v56, %v682_v53  ;;  %v690_v59 = vrot.slane %v688_v57, 1  ;;  %v704_v6 = vshll.u32 %v2624_v3, 16  ;;  %v2630_v18 = vld [vmem:[%s3444_s1 + $0xe8] ss:$16 sps:$4 sm:$0xff]   ;;  %v2638_v20 = vld [vmem:[%s3444_s1 + $0xc4] ss:$16 sps:$4 sm:$0xff]  }
  0x1e   : > { %343 = vmatprep.mubr.bf16.mxu0 %v2659_v2  ;;  %444 = vmatprep.mubr.bf16.mxu1 %v2659_v2  ;;  %v698_v1 = vrot.slane %v696_v63, 1  ;;  %v708_v10 = vshrl.u32 %v2624_v3, 16  ;;  %v1189_v14 = vrot.slane %v2625_v12, 1  ;;  %v1190_v15 = vrot.slane %v2626_v13, 1  ;;  %v2634_v26 = vld [vmem:[%s2728_s11 + $0x1c] sm:$0xff]   ;;  %v2642_v32 = vld [vmem:[%s2728_s11 + $0x2c] sm:$0xff]  }
  0x1f   : > { %v691_v61 = vsel %vm655_vm1, %v686_v58, %v690_v59  ;;  %v694_v0 = vor.u32 %v692_v62, %v690_v59  ;;  %v706_v8 = vrot.slane %v704_v6, 1  ;;  %v1194_v27 = vrot.slane %v2634_v26, 1  ;;  %v2644_v38 = vld [vmem:[%s2728_s11 + $0x4] sm:$0xfe]   ;;  %v2645_v39 = vld [vmem:[%s2728_s11 + $0xc] sm:$0xff]   ;;  %v2647_v56 = vld [vmem:[%s2728_s11 + $0x1c] sm:$0xff]  }
  0x20   : > { %v702_v7 = vor.u32 %v700_v5, %v698_v1  ;;  %v1191_v16 = vsel %vm1188_vm2, %v1189_v14, %v1190_v15  ;;  %v1196_v30 = vrot.slane %v2635_v29, 1  ;;  %v1198_v33 = vrot.slane %v2642_v32, 1  ;;  %v2648_v63 = vld [vmem:[%s2728_s11 + $0x24] sm:$0xff]   ;;  %v2650_v14 = vld [vmem:[%s2728_s11 + $0x34] sm:$0x3f]  }
  0x21   : > { %v699_v4 = vsel %vm655_vm1, %v694_v0, %v698_v1  ;;  %v710_v11 = vor.u32 %v708_v10, %v706_v8  ;;  %v1689_v42 = vshrl.u32 %v2645_v39, 16  ;;  %v1692_v43 = vshll.u32 %v2645_v39, 16 }
  0x22   : > { %v707_v9 = vsel %vm655_vm1, %v702_v7, %v706_v8  ;;  %v1197_v31 = vsel %vm1188_vm2, %v1194_v27, %v1196_v30  ;;  %v1199_v34 = vsel %vm1188_vm2, %v1196_v30, %v1198_v33  ;;  %v1707_v58 = vshrl.u32 %v2647_v56, 16  ;;  %v2649_v7 = vld [vmem:[%s2728_s11 + $0x2c] sm:$0xff]  }
  0x23   : > { %v1710_v59 = vshll.u32 %v2647_v56, 16  ;;  %v1716_v1 = vshrl.u32 %v2648_v63, 16  ;;  %v1719_v3 = vshll.u32 %v2648_v63, 16  ;;  %v1728_v10 = vshll.u32 %v2649_v7, 16 }
  0x25   : > { %2379 = vmatmul.mubr.msk.bf16.gmra.mxu0 %vm269_vm0, %v2595_v21  ;;  %2386 = vmatmul.mubr.msk.bf16.gmra.mxu1 %vm269_vm0, %v2595_v21  ;;  %v2641_v21 = vld [vmem:[%s3444_s1 + $0xcc] ss:$16 sps:$4 sm:$0xff]   ;;  %v1712_v62 = vrot.slane %v1710_v59, 2  ;;  %v1718_v5 = vrot.slane %v1716_v1, 1  ;;  %v1721_v6 = vrot.slane %v1719_v3, 2  ;;  %v1730_v13 = vrot.slane %v1728_v10, 2 }
  0x26   : > { %353 = vmatprep.mubr.bf16.mxu0 %v2659_v2  ;;  %454 = vmatprep.mubr.bf16.mxu1 %v2659_v2 }
  0x27   : > { %v1722_v8 = vor.u32 %v1721_v6, %v1718_v5 }
  0x2d   : > { %2380 = vmatmul.mubr.msk.bf16.gmra.mxu0 %vm269_vm0, %v2596_v22  ;;  %2387 = vmatmul.mubr.msk.bf16.gmra.mxu1 %vm269_vm0, %v2596_v22  ;;  %v1192_v22 = vrot.slane %v2633_v19, 1  ;;  %v1737_v19 = vshll.u32 %v2650_v14, 16 }
  0x2e   : > { %363 = vmatprep.mubr.bf16.mxu0 %v2659_v2  ;;  %464 = vmatprep.mubr.bf16.mxu1 %v2659_v2 }
  0x2f   : > { %v1193_v25 = vsel %vm1188_vm2, %v1190_v15, %v1192_v22  ;;  %v1739_v26 = vrot.slane %v1737_v19, 2 }
  0x35   : > { %2381 = vmatmul.mubr.msk.bf16.gmra.mxu0 %vm269_vm0, %v2603_v23  ;;  %2388 = vmatmul.mubr.msk.bf16.gmra.mxu1 %vm269_vm0, %v2603_v23  ;;  %v2636_v23 = vld [vmem:[%s3444_s1 + $0xc0] ss:$16 sps:$4 sm:$0xff]  }
  0x36   : > { %373 = vmatprep.mubr.bf16.mxu0 %v2659_v2  ;;  %474 = vmatprep.mubr.bf16.mxu1 %v2659_v2 }
  0x3d   : > { %2382 = vmatmul.mubr.msk.bf16.gmra.mxu0 %vm269_vm0, %v2604_v24  ;;  %2389 = vmatmul.mubr.msk.bf16.gmra.mxu1 %vm269_vm0, %v2604_v24  ;;  %v2639_v24 = vld [vmem:[%s3444_s1 + $0xc8] ss:$16 sps:$4 sm:$0xff]  }
  0x3e   : > { %383 = vmatprep.mubr.bf16.mxu0 %v2659_v2  ;;  %484 = vmatprep.mubr.bf16.mxu1 %v2659_v2 }
  0x45   : > { %2383 = vmatmul.mubr.msk.bf16.gmra.mxu0 %vm269_vm0, %v2605_v28  ;;  %2390 = vmatmul.mubr.msk.bf16.gmra.mxu1 %vm269_vm0, %v2605_v28  ;;  %v1195_v28 = vsel %vm1188_vm2, %v1192_v22, %v1194_v27 }
  0x46   : > { %804 = vmatprep.mubr.bf16.mxu0 %v2659_v2  ;;  %905 = vmatprep.mubr.bf16.mxu1 %v2659_v2 }
  0x4d   : > { %2414 = vmatmul.mubr.msk.bf16.vlgmr.msra.gmra.mxu0 %vm269_vm0, %v667_v35  ;;  %2421 = vmatmul.mubr.msk.bf16.vlgmr.msra.gmra.mxu1 %vm269_vm0, %v667_v35  ;;  %v2643_v35 = vld [vmem:[%s2728_s11 + $0x34] sm:$0x1f]  }
  0x4e   : > { %1276 = vmatpush1.bf16.msra.mxu0 %v2608_v36  ;;  %1377 = vmatpush1.bf16.msra.mxu1 %v2611_v37  ;;  %v1200_v36 = vrot.slane %v2643_v35, 1 }
  0x4f   : > { %814 = vmatprep.mubr.bf16.mxu0 %v2659_v2  ;;  %915 = vmatprep.mubr.bf16.mxu1 %v2659_v2 }
  0x50   : > { %1277 = vmatprep.subr.bf16.mxu0 %v2619_v40  ;;  %1378 = vmatprep.subr.bf16.mxu1 %v2622_v41  ;;  %v1201_v37 = vsel %vm1188_vm2, %v1198_v33, %v1200_v36  ;;  %v1681_v40 = vshrl.u32 %v2644_v38, 16  ;;  %v1684_v41 = vshll.u32 %v2644_v38, 16 }
  0x52   : > { %1278 = vmatpush1.bf16.msra.mxu0 %v2617_v45  ;;  %1379 = vmatpush1.bf16.msra.mxu1 %v2620_v46  ;;  %v1683_v44 = vrot.slane %v1681_v40, 1  ;;  %v1686_v45 = vrot.slane %v1684_v41, 2  ;;  %v1691_v46 = vrot.slane %v1689_v42, 1 }
  0x53   : > { %1815 = vmatprep.subr.bf16.mxu0 %v2629_v47  ;;  %1916 = vmatprep.subr.bf16.mxu1 %v2632_v48  ;;  %v1694_v47 = vrot.slane %v1692_v43, 2  ;;  %v2646_v48 = vld [vmem:[%s2728_s11 + $0x14] sm:$0xff]  }
  0x54   : > { %v1698_v51 = vshrl.u32 %v2646_v48, 16  ;;  %v1701_v52 = vshll.u32 %v2646_v48, 16 }
  0x55   : > { %2415 = vmatmul.mubr.msk.bf16.gmra.mxu0 %vm269_vm0, %v675_v49  ;;  %2422 = vmatmul.mubr.msk.bf16.gmra.mxu1 %vm269_vm0, %v675_v49  ;;  %v1687_v49 = vor.u32 %v1686_v45, %v1683_v44  ;;  %v1695_v50 = vor.u32 %v1694_v47, %v1691_v46 }
  0x56   : > { %824 = vmatprep.mubr.bf16.mxu0 %v2659_v2  ;;  %925 = vmatprep.mubr.bf16.mxu1 %v2659_v2  ;;  %v1700_v54 = vrot.slane %v1698_v51, 1 }
  0x57   : > { %v1696_v53 = vsel %vm1679_vm3, %v1687_v49, %v1695_v50 }
  0x5d   : > { %2416 = vmatmul.mubr.msk.bf16.gmra.mxu0 %vm269_vm0, %v683_v55  ;;  %2423 = vmatmul.mubr.msk.bf16.gmra.mxu1 %vm269_vm0, %v683_v55  ;;  %v1703_v55 = vrot.slane %v1701_v52, 2 }
  0x5e   : > { %834 = vmatprep.mubr.bf16.mxu0 %v2659_v2  ;;  %935 = vmatprep.mubr.bf16.mxu1 %v2659_v2 }
  0x5f   : > { %v1704_v57 = vor.u32 %v1703_v55, %v1700_v54 }
  0x61   : > { %v1705_v60 = vsel %vm1679_vm3, %v1695_v50, %v1704_v57 }
  0x65   : > { %2417 = vmatmul.mubr.msk.bf16.gmra.mxu0 %vm269_vm0, %v691_v61  ;;  %2424 = vmatmul.mubr.msk.bf16.gmra.mxu1 %vm269_vm0, %v691_v61  ;;  %v1709_v61 = vrot.slane %v1707_v58, 1 }
  0x66   : > { %844 = vmatprep.mubr.bf16.mxu0 %v2659_v2  ;;  %945 = vmatprep.mubr.bf16.mxu1 %v2659_v2 }
  0x67   : > { %v1713_v0 = vor.u32 %v1712_v62, %v1709_v61 }
  0x6d   : > { %2418 = vmatmul.mubr.msk.bf16.gmra.mxu0 %vm269_vm0, %v699_v4  ;;  %2425 = vmatmul.mubr.msk.bf16.gmra.mxu1 %vm269_vm0, %v699_v4  ;;  %v1714_v4 = vsel %vm1679_vm3, %v1704_v57, %v1713_v0 }
  0x6e   : > { %854 = vmatprep.mubr.bf16.mxu0 %v2659_v2  ;;  %955 = vmatprep.mubr.bf16.mxu1 %v2659_v2 }
  0x75   : > { %2419 = vmatmul.mubr.msk.bf16.gmra.mxu0 %vm269_vm0, %v707_v9  ;;  %2426 = vmatmul.mubr.msk.bf16.gmra.mxu1 %vm269_vm0, %v707_v9  ;;  %v1725_v9 = vshrl.u32 %v2649_v7, 16 }
  0x76   : > { %864 = vmatprep.mubr.bf16.mxu0 %v2659_v2  ;;  %965 = vmatprep.mubr.bf16.mxu1 %v2659_v2 }
  0x77   : > { %v1727_v12 = vrot.slane %v1725_v9, 1 }
  0x7d   : > { %2420 = vmatmul.mubr.msk.bf16.gmra.mxu0 %vm269_vm0, %v710_v11  ;;  %2427 = vmatmul.mubr.msk.bf16.gmra.mxu1 %vm269_vm0, %v710_v11  ;;  %v1723_v11 = vsel %vm1679_vm3, %v1713_v0, %v1722_v8 }
  0x7e   : > { %1295 = vmatprep.mubr.bf16.mxu0 %v2659_v2  ;;  %1396 = vmatprep.mubr.bf16.mxu1 %v2659_v2 }
  0x85   : > { %2451 = vmatmul.mubr.msk.bf16.vlgmr.msra.gmra.mxu0 %vm269_vm0, %v1191_v16  ;;  %2458 = vmatmul.mubr.msk.bf16.vlgmr.msra.gmra.mxu1 %vm269_vm0, %v1191_v16 }
  0x86   : > { %1816 = vmatpush1.bf16.msra.mxu0 %v2627_v17  ;;  %1917 = vmatpush1.bf16.msra.mxu1 %v2630_v18  ;;  %v1731_v17 = vor.u32 %v1730_v13, %v1727_v12  ;;  %v1734_v18 = vshrl.u32 %v2650_v14, 16 }
  0x87   : > { %1305 = vmatprep.mubr.bf16.mxu0 %v2659_v2  ;;  %1406 = vmatprep.mubr.bf16.mxu1 %v2659_v2 }
  0x88   : > { %1817 = vmatprep.subr.bf16.mxu0 %v2638_v20  ;;  %1918 = vmatprep.subr.bf16.mxu1 %v2641_v21 }
  0x8a   : > { %1818 = vmatpush1.bf16.msra.mxu0 %v2636_v23  ;;  %1919 = vmatpush1.bf16.msra.mxu1 %v2639_v24  ;;  %v1732_v24 = vsel %vm1679_vm3, %v1722_v8, %v1731_v17 }
  0x8d   : > { %2452 = vmatmul.mubr.msk.bf16.gmra.mxu0 %vm269_vm0, %v1193_v25  ;;  %2459 = vmatmul.mubr.msk.bf16.gmra.mxu1 %vm269_vm0, %v1193_v25  ;;  %v1736_v25 = vrot.slane %v1734_v18, 1 }
  0x8e   : > { %1315 = vmatprep.mubr.bf16.mxu0 %v2659_v2  ;;  %1416 = vmatprep.mubr.bf16.mxu1 %v2659_v2 }
  0x95   : > { %2453 = vmatmul.mubr.msk.bf16.gmra.mxu0 %vm269_vm0, %v1195_v28  ;;  %2460 = vmatmul.mubr.msk.bf16.gmra.mxu1 %vm269_vm0, %v1195_v28 }
  0x96   : > { %1325 = vmatprep.mubr.bf16.mxu0 %v2659_v2  ;;  %1426 = vmatprep.mubr.bf16.mxu1 %v2659_v2 }
  0x9d   : > { %2454 = vmatmul.mubr.msk.bf16.gmra.mxu0 %vm269_vm0, %v1197_v31  ;;  %2461 = vmatmul.mubr.msk.bf16.gmra.mxu1 %vm269_vm0, %v1197_v31  ;;  %v1740_v31 = vor.u32 %v1739_v26, %v1736_v25 }
  0x9e   : > { %1335 = vmatprep.mubr.bf16.mxu0 %v2659_v2  ;;  %1436 = vmatprep.mubr.bf16.mxu1 %v2659_v2 }
  0xa5   : > { %2455 = vmatmul.mubr.msk.bf16.gmra.mxu0 %vm269_vm0, %v1199_v34  ;;  %2462 = vmatmul.mubr.msk.bf16.gmra.mxu1 %vm269_vm0, %v1199_v34 }
  0xa6   : > { %1345 = vmatprep.mubr.bf16.mxu0 %v2659_v2  ;;  %1446 = vmatprep.mubr.bf16.mxu1 %v2659_v2 }
  0xad   : > { %2456 = vmatmul.mubr.msk.bf16.gmra.mxu0 %vm269_vm0, %v1201_v37  ;;  %2463 = vmatmul.mubr.msk.bf16.gmra.mxu1 %vm269_vm0, %v1201_v37 }
  0xae   : > { %1355 = vmatprep.mubr.bf16.mxu0 %v2659_v2  ;;  %1456 = vmatprep.mubr.bf16.mxu1 %v2659_v2 }
  0xb5   : > { %2457 = vmatmul.mubr.msk.bf16.gmra.mxu0 %vm269_vm0, %v1200_v36  ;;  %2464 = vmatmul.mubr.msk.bf16.gmra.mxu1 %vm269_vm0, %v1200_v36  ;;  %v1741_v36 = vsel %vm1679_vm3, %v1731_v17, %v1740_v31 }
  0xb6   : > { %1835 = vmatprep.mubr.bf16.mxu0 %v2659_v2  ;;  %1936 = vmatprep.mubr.bf16.mxu1 %v2659_v2 }
  0xbd   : > { %2488 = vmatmul.mubr.msk.bf16.vlgmr.msra.gmra.mxu0 %vm269_vm0, %v1696_v53  ;;  %2495 = vmatmul.mubr.msk.bf16.vlgmr.msra.gmra.mxu1 %vm269_vm0, %v1696_v53 }
  0xbe   : > { %1845 = vmatprep.mubr.bf16.mxu0 %v2659_v2  ;;  %1946 = vmatprep.mubr.bf16.mxu1 %v2659_v2 }
  0xc5   : > { %2489 = vmatmul.mubr.msk.bf16.gmra.mxu0 %vm269_vm0, %v1705_v60  ;;  %2496 = vmatmul.mubr.msk.bf16.gmra.mxu1 %vm269_vm0, %v1705_v60 }
  0xc6   : > { %1855 = vmatprep.mubr.bf16.mxu0 %v2659_v2  ;;  %1956 = vmatprep.mubr.bf16.mxu1 %v2659_v2 }
  0xcd   : > { %2490 = vmatmul.mubr.msk.bf16.gmra.mxu0 %vm269_vm0, %v1714_v4  ;;  %2497 = vmatmul.mubr.msk.bf16.gmra.mxu1 %vm269_vm0, %v1714_v4 }
  0xce   : > { %1865 = vmatprep.mubr.bf16.mxu0 %v2659_v2  ;;  %1966 = vmatprep.mubr.bf16.mxu1 %v2659_v2 }
  0xd5   : > { %v2936_v15 = vpop.f32.mrf.mxu0  ;;  %v2938_v16 = vpop.f32.mrf.mxu1  ;;  %2491 = vmatmul.mubr.msk.bf16.gmra.mxu0 %vm269_vm0, %v1723_v11  ;;  %2498 = vmatmul.mubr.msk.bf16.gmra.mxu1 %vm269_vm0, %v1723_v11 }
  0xd6   : > { %1875 = vmatprep.mubr.bf16.mxu0 %v2659_v2  ;;  %1976 = vmatprep.mubr.bf16.mxu1 %v2659_v2 }
  0xd7   : > { %v2944_v20 = vpop.f32.mrf.mxu0  ;;  %v2946_v21 = vpop.f32.mrf.mxu1 }
  0xd9   : > { %v2948_v22 = vpop.f32.mrf.mxu0  ;;  %v2950_v23 = vpop.f32.mrf.mxu1 }
  0xdb   : > { %v2953_v27 = vpop.f32.mrf.mxu0  ;;  %v2955_v28 = vpop.f32.mrf.mxu1 }
  0xdd   : > { %v2957_v29 = vpop.f32.mrf.mxu0  ;;  %v2959_v30 = vpop.f32.mrf.mxu1  ;;  %2492 = vmatmul.mubr.msk.bf16.gmra.mxu0 %vm269_vm0, %v1732_v24  ;;  %2499 = vmatmul.mubr.msk.bf16.gmra.mxu1 %vm269_vm0, %v1732_v24 }
  0xde   : > { %1885 = vmatprep.mubr.bf16.mxu0 %v2659_v2  ;;  %1986 = vmatprep.mubr.bf16.mxu1 %v2659_v2 }
  0xdf   : > { %v2965_v32 = vpop.f32.mrf.mxu0  ;;  %v2967_v33 = vpop.f32.mrf.mxu1 }
  0xe1   : > { %v2969_v34 = vpop.f32.mrf.mxu0  ;;  %v2971_v35 = vpop.f32.mrf.mxu1 }
  0xe3   : > { %v2974_v37 = vpop.f32.mrf.mxu0  ;;  %v2976_v38 = vpop.f32.mrf.mxu1 }
  0xe5   : > { %v2978_v39 = vpop.f32.mrf.mxu0  ;;  %v2980_v40 = vpop.f32.mrf.mxu1  ;;  %2493 = vmatmul.mubr.msk.bf16.gmra.mxu0 %vm269_vm0, %v1741_v36  ;;  %2500 = vmatmul.mubr.msk.bf16.gmra.mxu1 %vm269_vm0, %v1741_v36 }
  0xe6   : > { %1895 = vmatprep.mubr.bf16.mxu0 %v2659_v2  ;;  %1996 = vmatprep.mubr.bf16.mxu1 %v2659_v2 }
  0xe7   : > { %v2986_v41 = vpop.f32.mrf.mxu0  ;;  %v2988_v42 = vpop.f32.mrf.mxu1 }
  0xe9   : > { %v2990_v43 = vpop.f32.mrf.mxu0  ;;  %v2992_v44 = vpop.f32.mrf.mxu1 }
  0xeb   : > { %v2994_v45 = vpop.f32.mrf.mxu0  ;;  %v2996_v46 = vpop.f32.mrf.mxu1 }
  0xed   : > { %v2998_v47 = vpop.f32.mrf.mxu0  ;;  %v3000_v48 = vpop.f32.mrf.mxu1  ;;  %2494 = vmatmul.mubr.msk.bf16.gmra.mxu0 %vm269_vm0, %v1740_v31  ;;  %2501 = vmatmul.mubr.msk.bf16.gmra.mxu1 %vm269_vm0, %v1740_v31 }
  0xef   : > { %v3004_v2 = vpop.f32.mrf.mxu0  ;;  %v3006_v49 = vpop.f32.mrf.mxu1 }
  0xf1   : > { %v3008_v50 = vpop.f32.mrf.mxu0  ;;  %v3010_v51 = vpop.f32.mrf.mxu1 }
  0xf3   : > { %v3012_v52 = vpop.f32.mrf.mxu0  ;;  %v3014_v53 = vpop.f32.mrf.mxu1 }
  0xf5   : > { %v3016_v54 = vpop.f32.mrf.mxu0  ;;  %v3018_v55 = vpop.f32.mrf.mxu1 }
  0xf7   : > { %v3020_v56 = vpop.f32.mrf.mxu0  ;;  %v3022_v57 = vpop.f32.mrf.mxu1 }
  0xf9   : > { %v3024_v58 = vpop.f32.mrf.mxu0  ;;  %v3026_v59 = vpop.f32.mrf.mxu1 }
  0xfb   : > { %v3028_v60 = vpop.f32.mrf.mxu0  ;;  %v3030_v61 = vpop.f32.mrf.mxu1 }
  0xfd   : > { %v3032_v62 = vpop.f32.mrf.mxu0  ;;  %v3034_v63 = vpop.f32.mrf.mxu1 }
  0xff   : > { %v3036_v0 = vpop.f32.mrf.mxu0  ;;  %v3038_v1 = vpop.f32.mrf.mxu1 }
 0x101   : > { %v3040_v3 = vpop.f32.mrf.mxu0  ;;  %v3042_v4 = vpop.f32.mrf.mxu1 }
 0x103   : > { %v3044_v5 = vpop.f32.mrf.mxu0  ;;  %v3046_v6 = vpop.f32.mrf.mxu1 }
 0x105   : > { %v3048_v7 = vpop.f32.mrf.mxu0  ;;  %v3050_v8 = vpop.f32.mrf.mxu1 }
 0x107   : > { %v3052_v9 = vpop.f32.mrf.mxu0  ;;  %v3054_v10 = vpop.f32.mrf.mxu1 }
 0x109   : > { %v389_v11 = vpop.f32.mrf.mxu0  ;;  %v490_v12 = vpop.f32.mrf.mxu1 }
 0x10b   : > { %v390_v13 = vpop.f32.mrf.mxu0  ;;  %v491_v14 = vpop.f32.mrf.mxu1 }
 0x10d   : > { %v806_v17 = vpop.f32.mrf.mxu0  ;;  %v907_v18 = vpop.f32.mrf.mxu1 }
 0x10e   : > { %v3057_v19 = vadd.f32 %v806_v17, %v2936_v15  ;;  %v3060_v24 = vadd.f32 %v907_v18, %v2938_v16 }
 0x10f   : > { %v808_v25 = vpop.f32.mrf.mxu0  ;;  %v909_v26 = vpop.f32.mrf.mxu1 }
 0x110   : > { %v3063_v31 = vadd.f32 %v808_v25, %v2944_v20  ;;  %v3066_v36 = vadd.f32 %v909_v26, %v2946_v21 }
 0x111   : > { %v810_v11 = vpop.f32.mrf.mxu0  ;;  %v911_v12 = vpop.f32.mrf.mxu1 }
 0x112   : > { %v3069_v13 = vadd.f32 %v810_v11, %v2948_v22  ;;  %v3072_v14 = vadd.f32 %v911_v12, %v2950_v23 }
 0x113   : > { %v812_v15 = vpop.f32.mrf.mxu0  ;;  %v913_v17 = vpop.f32.mrf.mxu1 }
 0x114   : > { %v3075_v16 = vadd.f32 %v812_v15, %v2953_v27  ;;  %v3078_v18 = vadd.f32 %v913_v17, %v2955_v28 }
 0x115   : > { %v816_v20 = vpop.f32.mrf.mxu0  ;;  %v917_v25 = vpop.f32.mrf.mxu1 }
 0x116   : > { %v3081_v21 = vadd.f32 %v816_v20, %v2957_v29  ;;  %v3084_v26 = vadd.f32 %v917_v25, %v2959_v30 }
 0x117   : > { %v818_v22 = vpop.f32.mrf.mxu0  ;;  %v919_v11 = vpop.f32.mrf.mxu1 }
 0x118   : > { %v3087_v23 = vadd.f32 %v818_v22, %v2965_v32  ;;  %v3090_v12 = vadd.f32 %v919_v11, %v2967_v33 }
 0x119   : > { %v820_v27 = vpop.f32.mrf.mxu0  ;;  %v921_v15 = vpop.f32.mrf.mxu1 }
 0x11a   : > { %v3093_v28 = vadd.f32 %v820_v27, %v2969_v34  ;;  %v3096_v17 = vadd.f32 %v921_v15, %v2971_v35 }
 0x11b   : > { %v822_v29 = vpop.f32.mrf.mxu0  ;;  %v923_v20 = vpop.f32.mrf.mxu1 }
 0x11c   : > { %v3099_v30 = vadd.f32 %v822_v29, %v2974_v37  ;;  %v3102_v25 = vadd.f32 %v923_v20, %v2976_v38 }
 0x11d   : > { %v826_v32 = vpop.f32.mrf.mxu0  ;;  %v927_v22 = vpop.f32.mrf.mxu1 }
 0x11e   : > { %v3105_v33 = vadd.f32 %v826_v32, %v2978_v39  ;;  %v3108_v11 = vadd.f32 %v927_v22, %v2980_v40 }
 0x11f   : > { %v828_v34 = vpop.f32.mrf.mxu0  ;;  %v929_v27 = vpop.f32.mrf.mxu1 }
 0x120   : > { %v3111_v35 = vadd.f32 %v828_v34, %v2986_v41  ;;  %v3114_v15 = vadd.f32 %v929_v27, %v2988_v42 }
 0x121   : > { %v830_v37 = vpop.f32.mrf.mxu0  ;;  %v931_v29 = vpop.f32.mrf.mxu1 }
 0x122   : > { %v3117_v38 = vadd.f32 %v830_v37, %v2990_v43  ;;  %v3120_v20 = vadd.f32 %v931_v29, %v2992_v44 }
 0x123   : > { %v832_v39 = vpop.f32.mrf.mxu0  ;;  %v933_v32 = vpop.f32.mrf.mxu1 }
 0x124   : > { %v3123_v40 = vadd.f32 %v832_v39, %v2994_v45  ;;  %v3126_v22 = vadd.f32 %v933_v32, %v2996_v46 }
 0x125   : > { %v836_v41 = vpop.f32.mrf.mxu0  ;;  %v937_v34 = vpop.f32.mrf.mxu1 }
 0x126   : > { %v3129_v42 = vadd.f32 %v836_v41, %v2998_v47  ;;  %v3132_v27 = vadd.f32 %v937_v34, %v3000_v48 }
 0x127   : > { %v838_v43 = vpop.f32.mrf.mxu0  ;;  %v939_v37 = vpop.f32.mrf.mxu1 }
 0x128   : > { %3447 = vst [vmem:[#allocation3_spill] sm:$0xff] %v3129_v42  ;;  %3448 = vst [vmem:[#allocation4_spill] sm:$0xff] %v3132_v27  ;;  %v3135_v44 = vadd.f32 %v838_v43, %v3004_v2  ;;  %v3138_v29 = vadd.f32 %v939_v37, %v3006_v49 }
 0x129   : > { %v840_v45 = vpop.f32.mrf.mxu0  ;;  %v941_v39 = vpop.f32.mrf.mxu1 }
 0x12a   : > { %3449 = vst [vmem:[#allocation5_spill] sm:$0xff] %v3135_v44  ;;  %3450 = vst [vmem:[#allocation6_spill] sm:$0xff] %v3138_v29  ;;  %v3141_v46 = vadd.f32 %v840_v45, %v3008_v50  ;;  %v3144_v32 = vadd.f32 %v941_v39, %v3010_v51 }
 0x12b   : > { %v842_v47 = vpop.f32.mrf.mxu0  ;;  %v943_v41 = vpop.f32.mrf.mxu1 }
 0x12c   : > { %3451 = vst [vmem:[#allocation7_spill] sm:$0xff] %v3141_v46  ;;  %3452 = vst [vmem:[#allocation8_spill] sm:$0xff] %v3144_v32  ;;  %v3147_v48 = vadd.f32 %v842_v47, %v3012_v52  ;;  %v3150_v34 = vadd.f32 %v943_v41, %v3014_v53 }
 0x12d   : > { %v846_v2 = vpop.f32.mrf.mxu0  ;;  %v947_v43 = vpop.f32.mrf.mxu1 }
 0x12e   : > { %3453 = vst [vmem:[#allocation9_spill] sm:$0xff] %v3147_v48  ;;  %3454 = vst [vmem:[#allocation10_spill] sm:$0xff] %v3150_v34  ;;  %v3153_v49 = vadd.f32 %v846_v2, %v3016_v54  ;;  %v3156_v37 = vadd.f32 %v947_v43, %v3018_v55 }
 0x12f   : > { %v848_v50 = vpop.f32.mrf.mxu0  ;;  %v949_v45 = vpop.f32.mrf.mxu1 }
 0x130   : > { %3455 = vst [vmem:[#allocation11_spill] sm:$0xff] %v3153_v49  ;;  %3456 = vst [vmem:[#allocation12_spill] sm:$0xff] %v3156_v37  ;;  %v3159_v51 = vadd.f32 %v848_v50, %v3020_v56  ;;  %v3162_v39 = vadd.f32 %v949_v45, %v3022_v57 }
 0x131   : > { %v850_v52 = vpop.f32.mrf.mxu0  ;;  %v951_v47 = vpop.f32.mrf.mxu1 }
 0x132   : > { %3457 = vst [vmem:[#allocation13_spill] sm:$0xff] %v3159_v51  ;;  %3458 = vst [vmem:[#allocation14_spill] sm:$0xff] %v3162_v39  ;;  %v3165_v53 = vadd.f32 %v850_v52, %v3024_v58  ;;  %v3168_v41 = vadd.f32 %v951_v47, %v3026_v59 }
 0x133   : > { %v852_v54 = vpop.f32.mrf.mxu0  ;;  %v953_v2 = vpop.f32.mrf.mxu1 }
 0x134   : > { %3459 = vst [vmem:[#allocation15_spill] sm:$0xff] %v3165_v53  ;;  %3460 = vst [vmem:[#allocation16_spill] sm:$0xff] %v3168_v41  ;;  %v3171_v55 = vadd.f32 %v852_v54, %v3028_v60  ;;  %v3174_v43 = vadd.f32 %v953_v2, %v3030_v61 }
 0x135   : > { %v856_v56 = vpop.f32.mrf.mxu0  ;;  %v957_v50 = vpop.f32.mrf.mxu1 }
 0x136   : > { %3461 = vst [vmem:[#allocation17_spill] sm:$0xff] %v3171_v55  ;;  %3462 = vst [vmem:[#allocation18_spill] sm:$0xff] %v3174_v43  ;;  %v3177_v57 = vadd.f32 %v856_v56, %v3032_v62  ;;  %v3180_v45 = vadd.f32 %v957_v50, %v3034_v63 }
 0x137   : > { %v858_v58 = vpop.f32.mrf.mxu0  ;;  %v959_v52 = vpop.f32.mrf.mxu1 }
 0x138   : > { %3463 = vst [vmem:[#allocation19_spill] sm:$0xff] %v3177_v57  ;;  %3464 = vst [vmem:[#allocation20_spill] sm:$0xff] %v3180_v45  ;;  %v3183_v59 = vadd.f32 %v858_v58, %v3036_v0  ;;  %v3186_v47 = vadd.f32 %v959_v52, %v3038_v1 }
 0x139   : > { %v860_v60 = vpop.f32.mrf.mxu0  ;;  %v961_v54 = vpop.f32.mrf.mxu1 }
 0x13a   : > { %3465 = vst [vmem:[#allocation21_spill] sm:$0xff] %v3183_v59  ;;  %3466 = vst [vmem:[#allocation22_spill] sm:$0xff] %v3186_v47  ;;  %v3189_v61 = vadd.f32 %v860_v60, %v3040_v3  ;;  %v3192_v2 = vadd.f32 %v961_v54, %v3042_v4 }
 0x13b   : > { %v862_v62 = vpop.f32.mrf.mxu0  ;;  %v963_v56 = vpop.f32.mrf.mxu1 }
 0x13c   : > { %3467 = vst [vmem:[#allocation23_spill] sm:$0xff] %v3189_v61  ;;  %3468 = vst [vmem:[#allocation24_spill] sm:$0xff] %v3192_v2  ;;  %v3195_v63 = vadd.f32 %v862_v62, %v3044_v5  ;;  %v3198_v50 = vadd.f32 %v963_v56, %v3046_v6 }
 0x13d   : > { %v866_v0 = vpop.f32.mrf.mxu0  ;;  %v967_v58 = vpop.f32.mrf.mxu1 }
 0x13e   : > { %3469 = vst [vmem:[#allocation25_spill] sm:$0xff] %v3195_v63  ;;  %3470 = vst [vmem:[#allocation26_spill] sm:$0xff] %v3198_v50  ;;  %v3201_v1 = vadd.f32 %v866_v0, %v3048_v7  ;;  %v3204_v52 = vadd.f32 %v967_v58, %v3050_v8 }
 0x13f   : > { %v868_v3 = vpop.f32.mrf.mxu0  ;;  %v969_v60 = vpop.f32.mrf.mxu1 }
 0x140   : > { %3471 = vst [vmem:[#allocation27_spill] sm:$0xff] %v3201_v1  ;;  %3472 = vst [vmem:[#allocation28_spill] sm:$0xff] %v3204_v52  ;;  %v3207_v4 = vadd.f32 %v868_v3, %v3052_v9  ;;  %v3210_v54 = vadd.f32 %v969_v60, %v3054_v10 }
 0x141   : > { %v870_v5 = vpop.f32.mrf.mxu0  ;;  %v971_v62 = vpop.f32.mrf.mxu1 }
 0x142   : > { %3473 = vst [vmem:[#allocation29_spill] sm:$0xff] %v3207_v4  ;;  %3474 = vst [vmem:[#allocation30_spill] sm:$0xff] %v3210_v54 }
 0x143   : > { %v871_v6 = vpop.f32.mrf.mxu0  ;;  %v972_v56 = vpop.f32.mrf.mxu1 }
 0x145   : > { %v1297_v50 = vpop.f32.mrf.mxu0  ;;  %v1398_v63 = vpop.f32.mrf.mxu1 }
 0x147   : > { %v1299_v2 = vpop.f32.mrf.mxu0  ;;  %v1400_v7 = vpop.f32.mrf.mxu1 }
 0x149   : > { %v3212_v0 = vpop.f32.mrf.mxu0  ;;  %v3214_v8 = vpop.f32.mrf.mxu1 }
 0x14b   : > { %v3216_v58 = vpop.f32.mrf.mxu0  ;;  %v3218_v52 = vpop.f32.mrf.mxu1 }
 0x14d   : > { %v3220_v9 = vpop.f32.mrf.mxu0  ;;  %v3222_v10 = vpop.f32.mrf.mxu1 }
 0x14f   : > { %v3224_v3 = vpop.f32.mrf.mxu0  ;;  %v3226_v60 = vpop.f32.mrf.mxu1 }
 0x151   : > { %v3228_v5 = vpop.f32.mrf.mxu0  ;;  %v3230_v62 = vpop.f32.mrf.mxu1 }
 0x153   : > { %v3232_v6 = vpop.f32.mrf.mxu0  ;;  %v3234_v56 = vpop.f32.mrf.mxu1 }
 0x155   : > { %v3236_v54 = vpop.f32.mrf.mxu0  ;;  %v3238_v4 = vpop.f32.mrf.mxu1 }
 0x157   : > { %v3240_v1 = vpop.f32.mrf.mxu0  ;;  %v3242_v61 = vpop.f32.mrf.mxu1 }
 0x159   : > { %v3244_v47 = vpop.f32.mrf.mxu0  ;;  %v3246_v59 = vpop.f32.mrf.mxu1 }
 0x15b   : > { %v3248_v45 = vpop.f32.mrf.mxu0  ;;  %v3250_v57 = vpop.f32.mrf.mxu1 }
 0x15d   : > { %v3252_v43 = vpop.f32.mrf.mxu0  ;;  %v3254_v55 = vpop.f32.mrf.mxu1 }
 0x15e   : > { %3475 = vst [vmem:[#allocation31_spill] sm:$0xff] %v3252_v43  ;;  %3476 = vst [vmem:[#allocation32_spill] sm:$0xff] %v3254_v55 }
 0x15f   : > { %v3256_v41 = vpop.f32.mrf.mxu0  ;;  %v3258_v53 = vpop.f32.mrf.mxu1 }
 0x160   : > { %3477 = vst [vmem:[#allocation33_spill] sm:$0xff] %v3256_v41  ;;  %3478 = vst [vmem:[#allocation34_spill] sm:$0xff] %v3258_v53 }
 0x161   : > { %v3260_v39 = vpop.f32.mrf.mxu0  ;;  %v3262_v51 = vpop.f32.mrf.mxu1 }
 0x162   : > { %3479 = vst [vmem:[#allocation35_spill] sm:$0xff] %v3260_v39  ;;  %3480 = vst [vmem:[#allocation36_spill] sm:$0xff] %v3262_v51 }
 0x163   : > { %v3264_v37 = vpop.f32.mrf.mxu0  ;;  %v3266_v49 = vpop.f32.mrf.mxu1 }
 0x164   : > { %3481 = vst [vmem:[#allocation37_spill] sm:$0xff] %v3264_v37  ;;  %3482 = vst [vmem:[#allocation38_spill] sm:$0xff] %v3266_v49 }
 0x165   : > { %v3268_v34 = vpop.f32.mrf.mxu0  ;;  %v3270_v48 = vpop.f32.mrf.mxu1 }
 0x166   : > { %3483 = vst [vmem:[#allocation39_spill] sm:$0xff] %v3268_v34  ;;  %3484 = vst [vmem:[#allocation40_spill] sm:$0xff] %v3270_v48 }
 0x167   : > { %v3272_v32 = vpop.f32.mrf.mxu0  ;;  %v3274_v46 = vpop.f32.mrf.mxu1 }
 0x168   : > { %3485 = vst [vmem:[#allocation41_spill] sm:$0xff] %v3272_v32  ;;  %3486 = vst [vmem:[#allocation42_spill] sm:$0xff] %v3274_v46 }
 0x169   : > { %v3276_v29 = vpop.f32.mrf.mxu0  ;;  %v3278_v41 = vpop.f32.mrf.mxu1 }
 0x16a   : > { %3487 = vst [vmem:[#allocation43_spill] sm:$0xff] %v3276_v29  ;;  %3488 = vst [vmem:[#allocation44_spill] sm:$0xff] %v3278_v41 }
 0x16b   : > { %v3280_v53 = vpop.f32.mrf.mxu0  ;;  %v3282_v39 = vpop.f32.mrf.mxu1 }
 0x16c   : > { %3489 = vst [vmem:[#allocation45_spill] sm:$0xff] %v3280_v53  ;;  %3490 = vst [vmem:[#allocation46_spill] sm:$0xff] %v3282_v39 }
 0x16d   : > { %v3284_v51 = vpop.f32.mrf.mxu0  ;;  %v3286_v37 = vpop.f32.mrf.mxu1 }
 0x16e   : > { %3491 = vst [vmem:[#allocation47_spill] sm:$0xff] %v3284_v51  ;;  %3492 = vst [vmem:[#allocation48_spill] sm:$0xff] %v3286_v37 }
 0x16f   : > { %v3288_v49 = vpop.f32.mrf.mxu0  ;;  %v3290_v34 = vpop.f32.mrf.mxu1 }
 0x170   : > { %3493 = vst [vmem:[#allocation49_spill] sm:$0xff] %v3288_v49  ;;  %3494 = vst [vmem:[#allocation50_spill] sm:$0xff] %v3290_v34 }
 0x171   : > { %v3292_v48 = vpop.f32.mrf.mxu0  ;;  %v3294_v32 = vpop.f32.mrf.mxu1 }
 0x172   : > { %3495 = vst [vmem:[#allocation51_spill] sm:$0xff] %v3292_v48  ;;  %3496 = vst [vmem:[#allocation52_spill] sm:$0xff] %v3294_v32  ;;  %v1465_v32 = vadd.f32 %v1297_v50, %v3057_v19 }
 0x173   : > { %v3296_v46 = vpop.f32.mrf.mxu0  ;;  %v3298_v29 = vpop.f32.mrf.mxu1 }
 0x174   : > { %3497 = vst [vmem:[#allocation53_spill] sm:$0xff] %v3296_v46  ;;  %3498 = vst [vmem:[#allocation54_spill] sm:$0xff] %v3298_v29  ;;  %v1467_v46 = vadd.f32 %v1398_v63, %v3060_v24  ;;  %v1466_v29 = vadd.f32 %v1299_v2, %v3063_v31  ;;  %v1470_v24 = vadd.f32 %v3216_v58, %v3075_v16 }
 0x175   : > { %v3300_v41 = vpop.f32.mrf.mxu0  ;;  %v3302_v53 = vpop.f32.mrf.mxu1  ;;  %v1472_v31 = vadd.f32 %v3218_v52, %v3078_v18  ;;  %v1473_v16 = vadd.f32 %v3220_v9, %v3081_v21  ;;  %v1475_v18 = vadd.f32 %v3222_v10, %v3084_v26  ;;  %v1477_v26 = vadd.f32 %v3228_v5, %v3093_v28 }
 0x176   : > { %3499 = vst [vmem:[#allocation55_spill] sm:$0xff] %v3300_v41  ;;  %3500 = vst [vmem:[#allocation56_spill] sm:$0xff] %v3302_v53  ;;  %v1468_v41 = vadd.f32 %v1400_v7, %v3066_v36  ;;  %v1480_v10 = vadd.f32 %v3234_v56, %v3102_v25  ;;  %v1483_v25 = vadd.f32 %v3238_v4, %v3108_v11 }
 0x177   : > { %v3304_v39 = vpop.f32.mrf.mxu0  ;;  %v3306_v51 = vpop.f32.mrf.mxu1 }
 0x178   : > { %3501 = vst [vmem:[#allocation57_spill] sm:$0xff] %v3304_v39  ;;  %3502 = vst [vmem:[#allocation58_spill] sm:$0xff] %v3306_v51 }
 0x179   : > { %v1361_v37 = vpop.f32.mrf.mxu0  ;;  %v1462_v49 = vpop.f32.mrf.mxu1 }
 0x17b   : > { %v1362_v44 = vpop.f32.mrf.mxu0  ;;  %v1463_v34 = vpop.f32.mrf.mxu1 }
 0x17c   : > { %v1469_v44 = vadd.f32 %v3212_v0, %v3069_v13  ;;  %v1471_v34 = vadd.f32 %v3214_v8, %v3072_v14  ;;  %v3323_v13 = vld [vmem:[%s3445_s2] ss:$0 sm:$0xff] }
 0x17d   : > { %v1837_v55 = vpop.f32.mrf.mxu0  ;;  %v1938_v48 = vpop.f32.mrf.mxu1 }
 0x17e   : > { %v2005_v43 = vadd.f32 %v1837_v55, %v1465_v32  ;;  %v2007_v39 = vadd.f32 %v1938_v48, %v1467_v46 }
 0x17f   : > { %v1839_v27 = vpop.f32.mrf.mxu0  ;;  %v1940_v53 = vpop.f32.mrf.mxu1 }
 0x180   : > { %v2006_v42 = vadd.f32 %v1839_v27, %v1466_v29  ;;  %v2008_v51 = vadd.f32 %v1940_v53, %v1468_v41  ;;  %v1476_v41 = vadd.f32 %v3226_v60, %v3090_v12  ;;  %v1478_v12 = vadd.f32 %v3232_v6, %v3099_v30 }
 0x181   : > { %v1841_v49 = vpop.f32.mrf.mxu0  ;;  %v1942_v19 = vpop.f32.mrf.mxu1  ;;  %v1481_v30 = vadd.f32 %v3236_v54, %v3105_v33  ;;  %v1482_v6 = vadd.f32 %v3240_v1, %v3111_v35 }
 0x182   : > { %v2161_v36 = vmax.f32 %v2005_v43, %v2006_v42  ;;  %v2174_v37 = vmax.f32 %v2007_v39, %v2008_v51  ;;  %v2009_v32 = vadd.f32 %v1841_v49, %v1469_v44  ;;  %v2011_v14 = vadd.f32 %v1942_v19, %v1471_v34 }
 0x183   : > { %v1843_v46 = vpop.f32.mrf.mxu0  ;;  %v1944_v27 = vpop.f32.mrf.mxu1  ;;  %v1474_v39 = vadd.f32 %v3224_v3, %v3087_v23  ;;  %v1479_v23 = vadd.f32 %v3230_v62, %v3096_v17 }
 0x184   : > { %v2187_v29 = vmax.f32 %v2161_v36, %v2174_v37  ;;  %v2010_v48 = vadd.f32 %v1843_v46, %v1470_v24  ;;  %v2012_v53 = vadd.f32 %v1944_v27, %v1472_v31  ;;  %v1484_v37 = vadd.f32 %v3242_v61, %v3114_v15 }
 0x185   : > { %v1847_v42 = vpop.f32.mrf.mxu0  ;;  %v1948_v51 = vpop.f32.mrf.mxu1  ;;  %v1486_v15 = vadd.f32 %v3248_v45, %v3123_v40  ;;  %v3503_v40 = vld [vmem:[#allocation3_spill] sm:$0xff] }
 0x186   : > { %v2162_v55 = vmax.f32 %v2009_v32, %v2010_v48  ;;  %v2175_v43 = vmax.f32 %v2011_v14, %v2012_v53  ;;  %v2207_v2 = vadd.f32 %v3323_v13, %v2187_v29  ;;  %v2013_v63 = vadd.f32 %v1847_v42, %v1473_v16  ;;  %v3504_v45 = vld [vmem:[#allocation31_spill] sm:$0xff] }
 0x187   : > { %v1849_v50 = vpop.f32.mrf.mxu0  ;;  %v1950_v52 = vpop.f32.mrf.mxu1  ;;  %v2015_v21 = vadd.f32 %v1948_v51, %v1475_v18  ;;  %v1485_v48 = vadd.f32 %v3244_v47, %v3117_v38  ;;  %v1487_v53 = vadd.f32 %v3246_v59, %v3120_v20  ;;  %v1488_v18 = vadd.f32 %v3250_v57, %v3126_v22  ;;  %v3507_v57 = vld [vmem:[#allocation5_spill] sm:$0xff] }
 0x188   : > { %v2188_v7 = vmax.f32 %v2162_v55, %v2175_v43  ;;  %v2014_v0 = vadd.f32 %v1849_v50, %v1474_v39  ;;  %v2016_v8 = vadd.f32 %v1950_v52, %v1476_v41  ;;  %v2220_v34 = vmax.f32 %v2207_v2, 0.0  ;;  %v3505_v52 = vld [vmem:[#allocation4_spill] sm:$0xff] }
 0x189   : > { %v1851_v58 = vpop.f32.mrf.mxu0  ;;  %v1952_v9 = vpop.f32.mrf.mxu1  ;;  %v1489_v50 = vadd.f32 %v3504_v45, %v3503_v40  ;;  %v3526_v40 = vld [vmem:[#allocation42_spill] sm:$0xff] }
 0x18a   : > { %v2208_v3 = vadd.f32 %v3323_v13, %v2188_v7  ;;  %v2163_v60 = vmax.f32 %v2013_v63, %v2014_v0  ;;  %v2176_v44 = vmax.f32 %v2015_v21, %v2016_v8  ;;  %v2017_v49 = vadd.f32 %v1851_v58, %v1477_v26  ;;  %v3506_v7 = vld [vmem:[#allocation32_spill] sm:$0xff]  ;;  %v3508_v21 = vld [vmem:[#allocation33_spill] sm:$0xff] }
 0x18b   : > { %v2019_v19 = vadd.f32 %v1952_v9, %v1479_v23  ;;  %v1853_v28 = vpop.f32.mrf.mxu0  ;;  %v1954_v5 = vpop.f32.mrf.mxu1  ;;  %v1491_v22 = vadd.f32 %v3506_v7, %v3505_v52  ;;  %v1490_v0 = vadd.f32 %v3508_v21, %v3507_v57  ;;  %v3509_v23 = vld [vmem:[#allocation6_spill] sm:$0xff] }
 0x18c   : > { %v2221_v24 = vmax.f32 %v2208_v3, 0.0  ;;  %v2189_v17 = vmax.f32 %v2163_v60, %v2176_v44  ;;  %v2018_v62 = vadd.f32 %v1853_v28, %v1478_v12  ;;  %v2020_v31 = vadd.f32 %v1954_v5, %v1480_v10  ;;  %v3510_v12 = vld [vmem:[#allocation34_spill] sm:$0xff] }
 0x18d   : > { %v1857_v56 = vpop.f32.mrf.mxu0  ;;  %v1958_v36 = vpop.f32.mrf.mxu1  ;;  %v1492_v58 = vadd.f32 %v3510_v12, %v3509_v23 }
 0x18e   : > { %v2534_v32 = vpack.c.bf16 %v2221_v24, %v2220_v34  ;;  %v2164_v33 = vmax.f32 %v2017_v49, %v2018_v62  ;;  %v2177_v54 = vmax.f32 %v2019_v19, %v2020_v31  ;;  %v2209_v11 = vadd.f32 %v3323_v13, %v2189_v17  ;;  %v3511_v17 = vld [vmem:[#allocation7_spill] sm:$0xff] }
 0x18f   : > { %v2021_v4 = vadd.f32 %v1857_v56, %v1481_v30  ;;  %v1859_v46 = vpop.f32.mrf.mxu0  ;;  %v1960_v35 = vpop.f32.mrf.mxu1  ;;  %v2023_v27 = vadd.f32 %v1958_v36, %v1483_v25  ;;  %v3512_v62 = vld [vmem:[#allocation35_spill] sm:$0xff]  ;;  %v3513_v30 = vld [vmem:[#allocation8_spill] sm:$0xff]  ;;  %v3515_v56 = vld [vmem:[#allocation9_spill] sm:$0xff] }
 0x190   : > { %2535 = vst [vmem:[%s3354_s14] sm:$0xff] %v2534_v32   ;;  %v2190_v1 = vmax.f32 %v2164_v33, %v2177_v54  ;;  %v2022_v29 = vadd.f32 %v1859_v46, %v1482_v6  ;;  %v2024_v14 = vadd.f32 %v1960_v35, %v1484_v37  ;;  %v2222_v41 = vmax.f32 %v2209_v11, 0.0  ;;  %v3514_v25 = vld [vmem:[#allocation36_spill] sm:$0xff]  ;;  %v3516_v36 = vld [vmem:[#allocation37_spill] sm:$0xff]  ;;  %v3517_v54 = vld [vmem:[#allocation10_spill] sm:$0xff] }
 0x191   : > { %v1861_v61 = vpop.f32.mrf.mxu0  ;;  %v1962_v16 = vpop.f32.mrf.mxu1  ;;  %v1493_v31 = vadd.f32 %v3512_v62, %v3511_v17  ;;  %v1495_v6 = vadd.f32 %v3514_v25, %v3513_v30  ;;  %v1494_v37 = vadd.f32 %v3516_v36, %v3515_v56  ;;  %v3518_v11 = vld [vmem:[#allocation38_spill] sm:$0xff] }
 0x192   : > { %v2210_v42 = vadd.f32 %v3323_v13, %v2190_v1  ;;  %v2165_v51 = vmax.f32 %v2021_v4, %v2022_v29  ;;  %v2178_v39 = vmax.f32 %v2023_v27, %v2024_v14  ;;  %v2025_v55 = vadd.f32 %v1861_v61, %v1485_v48  ;;  %v3534_v17 = vld [vmem:[#allocation46_spill] sm:$0xff] }
 0x193   : > { %v2027_v43 = vadd.f32 %v1962_v16, %v1487_v53  ;;  %v1863_v2 = vpop.f32.mrf.mxu0  ;;  %v1964_v38 = vpop.f32.mrf.mxu1  ;;  %v1496_v4 = vadd.f32 %v3518_v11, %v3517_v54 }
 0x194   : > { %v2223_v47 = vmax.f32 %v2210_v42, 0.0  ;;  %v2191_v63 = vmax.f32 %v2165_v51, %v2178_v39  ;;  %v2026_v20 = vadd.f32 %v1863_v2, %v1486_v15  ;;  %v2028_v59 = vadd.f32 %v1964_v38, %v1488_v18  ;;  %v3519_v42 = vld [vmem:[#allocation11_spill] sm:$0xff]  ;;  %v3523_v2 = vld [vmem:[#allocation13_spill] sm:$0xff] }
 0x195   : > { %v1867_v8 = vpop.f32.mrf.mxu0  ;;  %v1968_v26 = vpop.f32.mrf.mxu1  ;;  %v3520_v51 = vld [vmem:[#allocation39_spill] sm:$0xff]  ;;  %v3524_v38 = vld [vmem:[#allocation41_spill] sm:$0xff] }
 0x196   : > { %v2539_v9 = vpack.c.bf16 %v2223_v47, %v2222_v41  ;;  %v2166_v10 = vmax.f32 %v2025_v55, %v2026_v20  ;;  %v2179_v3 = vmax.f32 %v2027_v43, %v2028_v59  ;;  %v2211_v60 = vadd.f32 %v3323_v13, %v2191_v63  ;;  %v3521_v41 = vld [vmem:[#allocation12_spill] sm:$0xff]  ;;  %v3525_v59 = vld [vmem:[#allocation14_spill] sm:$0xff] }
 0x197   : > { %v2029_v44 = vadd.f32 %v1867_v8, %v1489_v50  ;;  %v1869_v34 = vpop.f32.mrf.mxu0  ;;  %v1970_v49 = vpop.f32.mrf.mxu1  ;;  %v2031_v28 = vadd.f32 %v1968_v26, %v1491_v22  ;;  %v1497_v39 = vadd.f32 %v3520_v51, %v3519_v42  ;;  %v3522_v55 = vld [vmem:[#allocation40_spill] sm:$0xff]  ;;  %v1498_v47 = vadd.f32 %v3524_v38, %v3523_v2  ;;  %v3542_v42 = vld [vmem:[#allocation50_spill] sm:$0xff] }
 0x198   : > { %2561 = vst [vmem:[%s3354_s14 + $0x8] sm:$0xff] %v2539_v9   ;;  %v2192_v19 = vmax.f32 %v2166_v10, %v2179_v3  ;;  %v2030_v5 = vadd.f32 %v1869_v34, %v1490_v0  ;;  %v2032_v24 = vadd.f32 %v1970_v49, %v1492_v58  ;;  %v2224_v27 = vmax.f32 %v2211_v60, 0.0  ;;  %v3527_v58 = vld [vmem:[#allocation15_spill] sm:$0xff]  ;;  %v3529_v3 = vld [vmem:[#allocation16_spill] sm:$0xff]  ;;  %v3531_v34 = vld [vmem:[#allocation17_spill] sm:$0xff] }
 0x199   : > { %v1871_v32 = vpop.f32.mrf.mxu0  ;;  %v1972_v33 = vpop.f32.mrf.mxu1  ;;  %v1499_v43 = vadd.f32 %v3522_v55, %v3521_v41  ;;  %v1500_v45 = vadd.f32 %v3526_v40, %v3525_v59  ;;  %v3528_v9 = vld [vmem:[#allocation43_spill] sm:$0xff]  ;;  %v3530_v60 = vld [vmem:[#allocation44_spill] sm:$0xff]  ;;  %v3532_v49 = vld [vmem:[#allocation45_spill] sm:$0xff] }
 0x19a   : > { %v2212_v46 = vadd.f32 %v3323_v13, %v2192_v19  ;;  %v2167_v35 = vmax.f32 %v2029_v44, %v2030_v5  ;;  %v2180_v1 = vmax.f32 %v2031_v28, %v2032_v24  ;;  %v2033_v29 = vadd.f32 %v1871_v32, %v1493_v31  ;;  %v3533_v24 = vld [vmem:[#allocation18_spill] sm:$0xff] }
 0x19b   : > { %v2035_v14 = vadd.f32 %v1972_v33, %v1495_v6  ;;  %v1873_v48 = vpop.f32.mrf.mxu0  ;;  %v1974_v53 = vpop.f32.mrf.mxu1  ;;  %v1501_v10 = vadd.f32 %v3528_v9, %v3527_v58  ;;  %v1503_v44 = vadd.f32 %v3530_v60, %v3529_v3  ;;  %v1502_v19 = vadd.f32 %v3532_v49, %v3531_v34  ;;  %v3550_v58 = vld [vmem:[#allocation54_spill] sm:$0xff] }
 0x19c   : > { %v2225_v15 = vmax.f32 %v2212_v46, 0.0  ;;  %v2193_v61 = vmax.f32 %v2167_v35, %v2180_v1  ;;  %v2034_v16 = vadd.f32 %v1873_v48, %v1494_v37  ;;  %v2036_v18 = vadd.f32 %v1974_v53, %v1496_v4  ;;  %v3535_v46 = vld [vmem:[#allocation19_spill] sm:$0xff]  ;;  %v3539_v48 = vld [vmem:[#allocation21_spill] sm:$0xff] }
 0x19d   : > { %v1877_v63 = vpop.f32.mrf.mxu0  ;;  %v1978_v20 = vpop.f32.mrf.mxu1  ;;  %v1504_v62 = vadd.f32 %v3534_v17, %v3533_v24  ;;  %v3536_v35 = vld [vmem:[#allocation47_spill] sm:$0xff]  ;;  %v3540_v53 = vld [vmem:[#allocation49_spill] sm:$0xff] }
 0x19e   : > { %v2544_v50 = vpack.c.bf16 %v2225_v15, %v2224_v27  ;;  %v2168_v52 = vmax.f32 %v2033_v29, %v2034_v16  ;;  %v2181_v7 = vmax.f32 %v2035_v14, %v2036_v18  ;;  %v2213_v22 = vadd.f32 %v3323_v13, %v2193_v61  ;;  %v3537_v27 = vld [vmem:[#allocation20_spill] sm:$0xff]  ;;  %v3541_v18 = vld [vmem:[#allocation22_spill] sm:$0xff] }
 0x19f   : > { %v2037_v57 = vadd.f32 %v1877_v63, %v1497_v39  ;;  %v1879_v21 = vpop.f32.mrf.mxu0  ;;  %v1980_v0 = vpop.f32.mrf.mxu1  ;;  %v2039_v26 = vadd.f32 %v1978_v20, %v1499_v43  ;;  %v1505_v1 = vadd.f32 %v3536_v35, %v3535_v46  ;;  %v3538_v29 = vld [vmem:[#allocation48_spill] sm:$0xff]  ;;  %v1506_v15 = vadd.f32 %v3540_v53, %v3539_v48  ;;  %v3558_v46 = vld [vmem:[#allocation58_spill] sm:$0xff] }
 0x1a0   : > { %2562 = vst [vmem:[%s3354_s14 + $0x10] sm:$0xff] %v2544_v50   ;;  %v2194_v8 = vmax.f32 %v2168_v52, %v2181_v7  ;;  %v2038_v23 = vadd.f32 %v1879_v21, %v1498_v47  ;;  %v2040_v12 = vadd.f32 %v1980_v0, %v1500_v45  ;;  %v2226_v6 = vmax.f32 %v2213_v22, 0.0  ;;  %v3543_v45 = vld [vmem:[#allocation23_spill] sm:$0xff]  ;;  %v3545_v7 = vld [vmem:[#allocation24_spill] sm:$0xff]  ;;  %v3547_v21 = vld [vmem:[#allocation25_spill] sm:$0xff] }
 0x1a1   : > { %v1881_v28 = vpop.f32.mrf.mxu0  ;;  %v1982_v5 = vpop.f32.mrf.mxu1  ;;  %v1507_v14 = vadd.f32 %v3538_v29, %v3537_v27  ;;  %v1508_v51 = vadd.f32 %v3542_v42, %v3541_v18  ;;  %v3544_v50 = vld [vmem:[#allocation51_spill] sm:$0xff]  ;;  %v3546_v22 = vld [vmem:[#allocation52_spill] sm:$0xff]  ;;  %v3548_v0 = vld [vmem:[#allocation53_spill] sm:$0xff] }
 0x1a2   : > { %v2214_v31 = vadd.f32 %v3323_v13, %v2194_v8  ;;  %v2169_v30 = vmax.f32 %v2037_v57, %v2038_v23  ;;  %v2182_v25 = vmax.f32 %v2039_v26, %v2040_v12  ;;  %v2041_v56 = vadd.f32 %v1881_v28, %v1501_v10  ;;  %v3549_v12 = vld [vmem:[#allocation26_spill] sm:$0xff] }
 0x1a3   : > { %v2043_v36 = vadd.f32 %v1982_v5, %v1503_v44  ;;  %v1883_v37 = vpop.f32.mrf.mxu0  ;;  %v1984_v32 = vpop.f32.mrf.mxu1  ;;  %v1509_v52 = vadd.f32 %v3544_v50, %v3543_v45  ;;  %v1511_v57 = vadd.f32 %v3546_v22, %v3545_v7  ;;  %v1510_v8 = vadd.f32 %v3548_v0, %v3547_v21 }
 0x1a4   : > { %v2227_v33 = vmax.f32 %v2214_v31, 0.0  ;;  %v2195_v54 = vmax.f32 %v2169_v30, %v2182_v25  ;;  %v2042_v11 = vadd.f32 %v1883_v37, %v1502_v19  ;;  %v2044_v4 = vadd.f32 %v1984_v32, %v1504_v62  ;;  %v3551_v31 = vld [vmem:[#allocation27_spill] sm:$0xff]  ;;  %v3555_v37 = vld [vmem:[#allocation29_spill] sm:$0xff] }
 0x1a5   : > { %v1887_v61 = vpop.f32.mrf.mxu0  ;;  %v1988_v16 = vpop.f32.mrf.mxu1  ;;  %v1512_v9 = vadd.f32 %v3550_v58, %v3549_v12  ;;  %v3552_v30 = vld [vmem:[#allocation55_spill] sm:$0xff]  ;;  %v3556_v32 = vld [vmem:[#allocation57_spill] sm:$0xff] }
 0x1a6   : > { %v2549_v39 = vpack.c.bf16 %v2227_v33, %v2226_v6  ;;  %v2170_v41 = vmax.f32 %v2041_v56, %v2042_v11  ;;  %v2183_v55 = vmax.f32 %v2043_v36, %v2044_v4  ;;  %v2215_v43 = vadd.f32 %v3323_v13, %v2195_v54  ;;  %v3553_v6 = vld [vmem:[#allocation28_spill] sm:$0xff]  ;;  %v3557_v4 = vld [vmem:[#allocation30_spill] sm:$0xff] }
 0x1a7   : > { %v2045_v2 = vadd.f32 %v1887_v61, %v1505_v1  ;;  %v1889_v38 = vpop.f32.mrf.mxu0  ;;  %v1990_v47 = vpop.f32.mrf.mxu1  ;;  %v2047_v20 = vadd.f32 %v1988_v16, %v1507_v14  ;;  %v1513_v25 = vadd.f32 %v3552_v30, %v3551_v31  ;;  %v3554_v56 = vld [vmem:[#allocation56_spill] sm:$0xff]  ;;  %v1514_v33 = vadd.f32 %v3556_v32, %v3555_v37 }
 0x1a8   : > { %2563 = vst [vmem:[%s3354_s14 + $0x18] sm:$0xff] %v2549_v39   ;;  %v2196_v63 = vmax.f32 %v2170_v41, %v2183_v55  ;;  %v2046_v59 = vadd.f32 %v1889_v38, %v1506_v15  ;;  %v2048_v40 = vadd.f32 %v1990_v47, %v1508_v51  ;;  %v2228_v44 = vmax.f32 %v2215_v43, 0.0 }
 0x1a9   : > { %v1891_v26 = vpop.f32.mrf.mxu0  ;;  %v1992_v23 = vpop.f32.mrf.mxu1  ;;  %v1515_v36 = vadd.f32 %v3554_v56, %v3553_v6  ;;  %v1516_v35 = vadd.f32 %v3558_v46, %v3557_v4 }
 0x1aa   : > { %v2216_v10 = vadd.f32 %v3323_v13, %v2196_v63  ;;  %v2171_v3 = vmax.f32 %v2045_v2, %v2046_v59  ;;  %v2184_v60 = vmax.f32 %v2047_v20, %v2048_v40  ;;  %v2049_v34 = vadd.f32 %v1891_v26, %v1509_v52 }
 0x1ab   : > { %v2051_v49 = vadd.f32 %v1992_v23, %v1511_v57  ;;  %v1893_v19 = vpop.f32.mrf.mxu0  ;;  %v1994_v28 = vpop.f32.mrf.mxu1 }
 0x1ac   : > { %v2229_v5 = vmax.f32 %v2216_v10, 0.0  ;;  %v2197_v24 = vmax.f32 %v2171_v3, %v2184_v60  ;;  %v2050_v17 = vadd.f32 %v1893_v19, %v1510_v8  ;;  %v2052_v62 = vadd.f32 %v1994_v28, %v1512_v9 }
 0x1ad   : > { %v1897_v54 = vpop.f32.mrf.mxu0  ;;  %v1998_v11 = vpop.f32.mrf.mxu1 }
 0x1ae   : > { %v2554_v1 = vpack.c.bf16 %v2229_v5, %v2228_v44  ;;  %v2172_v27 = vmax.f32 %v2049_v34, %v2050_v17  ;;  %v2185_v29 = vmax.f32 %v2051_v49, %v2052_v62  ;;  %v2217_v14 = vadd.f32 %v3323_v13, %v2197_v24 }
 0x1af   : > { %v2053_v48 = vadd.f32 %v1897_v54, %v1513_v25  ;;  %v1899_v53 = vpop.f32.mrf.mxu0  ;;  %v2000_v15 = vpop.f32.mrf.mxu1  ;;  %v2055_v16 = vadd.f32 %v1998_v11, %v1515_v36 }
 0x1b0   : > { %2564 = vst [vmem:[%s3354_s14 + $0x20] sm:$0xff] %v2554_v1   ;;  %v2198_v61 = vmax.f32 %v2172_v27, %v2185_v29  ;;  %v2054_v18 = vadd.f32 %v1899_v53, %v1514_v33  ;;  %v2056_v42 = vadd.f32 %v2000_v15, %v1516_v35  ;;  %v2230_v47 = vmax.f32 %v2217_v14, 0.0 }
 0x1b1   : > { %v1901_v51 = vpop.f32.mrf.mxu0  ;;  %v2002_v39 = vpop.f32.mrf.mxu1 }
 0x1b2   : > { %v2218_v41 = vadd.f32 %v3323_v13, %v2198_v61  ;;  %v2173_v55 = vmax.f32 %v2053_v48, %v2054_v18  ;;  %v2186_v43 = vmax.f32 %v2055_v16, %v2056_v42 }
 0x1b3   : > { %v1902_v2 = vpop.f32.mrf.mxu0  ;;  %v2003_v38 = vpop.f32.mrf.mxu1 }
 0x1b4   : > { %v2231_v63 = vmax.f32 %v2218_v41, 0.0  ;;  %v2199_v20 = vmax.f32 %v2173_v55, %v2186_v43 }
 0x1b6   : > { %v2559_v59 = vpack.c.bf16 %v2231_v63, %v2230_v47  ;;  %v2219_v40 = vadd.f32 %v3323_v13, %v2199_v20 }
 0x1b8   : > { %2565 = vst [vmem:[%s3354_s14 + $0x28] sm:$0xff] %v2559_v59   ;;  %v2232_v45 = vmax.f32 %v2219_v40, 0.0 }
 0x1ba   : > { %v2530_v50 = vpack.c.bf16 %v2232_v45, %v2232_v45 }
 0x1bc   : > { %2298 = vst [vmem:[%s3354_s14 + $0x30] sm:$0xf] %v2530_v50 }
 0x1bd PF: > { %s13_s12 = sadd.s32 1, %s2657_s12  }
 0x1be   : > { %p10_p4 = scmp.ge.s32.totalorder %s13_s12, 4  }
 0x1c0   :  { %12 = sbr.rel (!%p10_p4) target bundleno = 1 (0x1), region = 65 }

// kernel: conv_forward.5
= control target key start
LH: loop header
LB: loop body
LE: loop exit
PB: predicated region body
PF: predicated region fallthrough
CT: control target
= control target key end

     0   :  { %s1244_s24 = smov 0   ;;  %s1246_s25 = smov 0   ;;  %s1444_s0 = inlined_call_operand.vmem [shape: bf16[16,384], index: 0, kind: input, shape index: {}]   ;;  %s1445_s1 = inlined_call_operand.vmem [shape: bf16[384,128], index: 1, kind: input, shape index: {}]   ;;  %s1446_s2 = inlined_call_operand.vmem [shape: f32[1,128], index: 2, kind: input, shape index: {}]   ;;  %s1447_s3 = inlined_call_operand.vmem [shape: bf16[128,128], index: 3, kind: input, shape index: {}]   ;;  %s1448_s4 = inlined_call_operand.vmem [shape: f32[1,128], index: 4, kind: input, shape index: {}]   ;;  %s1449_s5 = inlined_call_operand.vmem [shape: bf16[128,128], index: 5, kind: input, shape index: {}]   ;;  %s1450_s6 = inlined_call_operand.vmem [shape: f32[1,128], index: 6, kind: input, shape index: {}]   ;;  %s1451_s7 = inlined_call_operand.vmem [shape: f32[16,128], index: 7, kind: output, shape index: {}]  }
   0x1   :  { %s1248_s26 = smov 0  }
   0x2 LB: > { %s29_s27 = sadd.s32 1, %s1196_s25  ;;  %p948_p0 = scmp.ge.s32.totalorder %s1200_s26, 1  ;;  %s1200_s26 = sphi %s1248_s26, %s17_s26   ;;  %s1196_s25 = sphi %s1246_s25, %s1453_s25   ;;  %s1192_s24 = sphi %s1244_s24, %s1452_s24  }
   0x3   : > { %p31_p1 = scmp.ge.s32.totalorder %s29_s27, 2  ;;  %p267_p2 = scmp.lt.s32.totalorder %s1200_s26, 3 }
   0x5   : > { %s1455_s27 = smov (%p31_p1, %s29_s27), 0  ;;  %p268_p3 = pnand %p948_p0, %p267_p2 }
   0x6   : > { %p308_p4 = scmp.lt.s32.totalorder (!%p268_p3), %s1192_s24, 1 }
   0x7   : > { %271 = sbr.rel (%p268_p3) target bundleno = 649 (0x289), region = 48 }
   0xc   : > { %v1135_v0 = vld [vmem:[%s1445_s1 + $0x78] sm:$0xff]   ;;  %v1202_v1 = vmov 0.0   ;;  %vm1203_vm0 = vmmov 0   ;;  %v1138_v4 = vld [vmem:[%s1445_s1 + $0x70] sm:$0xff]   ;;  %v1141_v7 = vld [vmem:[%s1445_s1 + $0x68] sm:$0xff]   ;;  %s1457_s24 = smov (!%p308_p4, %s1192_s24), 1 }
   0xd   : > { %1048 = vmatprep.subr.bf16.mxu1 %v1202_v1  ;;  %v1136_v2 = vld [vmem:[%s1445_s1 + $0xb8] sm:$0xff]   ;;  %999 = vmatprep.subr.bf16.mxu0 %v1135_v0  ;;  %v1139_v5 = vld [vmem:[%s1445_s1 + $0xb0] sm:$0xff]   ;;  %v1142_v8 = vld [vmem:[%s1445_s1 + $0xa8] sm:$0xff]   ;;  %s1108_s18 = smul.u32 12, %s1457_s24  ;;  %s950_s17 = sshll.u32 %s1457_s24, 3 }
   0xe   : > { %v1137_v3 = vld [vmem:[%s1445_s1 + $0x38] sm:$0xff]   ;;  %1064 = vmatprep.mubr.msk.bf16.mxu1 %vm1203_vm0, %v1202_v1  ;;  %1049 = vmatpush3.bf16.msra.mxu1 %v1136_v2  ;;  %v1140_v6 = vld [vmem:[%s1445_s1 + $0x30] sm:$0xff]   ;;  %v1143_v9 = vld [vmem:[%s1445_s1 + $0x28] sm:$0xff]   ;;  %s326_s22 = scalar_lea.vmem %s1451_s7, %s950_s17 }
   0xf   : > { %1000 = vmatpush3.bf16.msra.mxu0 %v1137_v3  ;;  %1050 = vmatprep.subr.bf16.mxu1 %v1202_v1  ;;  %v1144_v10 = vld [vmem:[%s1445_s1 + $0x60] sm:$0xff]   ;;  %v1147_v13 = vld [vmem:[%s1445_s1 + $0x58] sm:$0xff]   ;;  %v1150_v16 = vld [vmem:[%s1445_s1 + $0x50] sm:$0xff]   ;;  %s315_s8 = scalar_lea.vmem %s1444_s0, %s1108_s18 }
  0x10   : > { %1001 = vmatprep.subr.bf16.mxu0 %v1138_v4  ;;  %v1145_v11 = vld [vmem:[%s1445_s1 + $0xa0] sm:$0xff]   ;;  %v1148_v14 = vld [vmem:[%s1445_s1 + $0x98] sm:$0xff]   ;;  %v1151_v17 = vld [vmem:[%s1445_s1 + $0x90] sm:$0xff]  }
  0x11   : > { %v1146_v12 = vld [vmem:[%s1445_s1 + $0x20] sm:$0xff]   ;;  %v1149_v15 = vld [vmem:[%s1445_s1 + $0x18] sm:$0xff]   ;;  %v1152_v18 = vld [vmem:[%s1445_s1 + $0x10] sm:$0xff]  }
  0x12   : > { %1051 = vmatpush3.bf16.msra.mxu1 %v1139_v5  ;;  %v1153_v19 = vld [vmem:[%s1445_s1 + $0x48] sm:$0xff]   ;;  %v334_v22 = vld [vmem:[%s315_s8] sm:$0xff]  ;;  %v1162_v28 = vld [vmem:[%s1447_s3 + $0x38] sm:$0xff]  }
  0x13   : > { %1002 = vmatpush3.bf16.msra.mxu0 %v1140_v6  ;;  %1052 = vmatprep.subr.bf16.mxu1 %v1202_v1  ;;  %v1154_v20 = vld [vmem:[%s1445_s1 + $0x88] sm:$0xff]   ;;  %v1156_v23 = vld [vmem:[%s1445_s1 + $0x40] sm:$0xff]   ;;  %v952_v24 = vcombine.high %v334_v22, %v334_v22  ;;  %v951_v29 = vcombine.low %v334_v22, %v334_v22  ;;  %v1163_v30 = vld [vmem:[%s1447_s3 + $0x30] sm:$0xff]  }
  0x14   : > { %1003 = vmatprep.subr.bf16.mxu0 %v1141_v7  ;;  %v1155_v21 = vld [vmem:[%s1445_s1 + $0x8] sm:$0xff]   ;;  %v1157_v25 = vld [vmem:[%s1445_s1 + $0x80] sm:$0xff]   ;;  %v1166_v33 = vld [vmem:[%s1447_s3 + $0x18] sm:$0xff]  }
  0x15   : > { %571 = vmatprep.mubr.bf16.mxu0 %v952_v24  ;;  %v1158_v26 = vld [vmem:[%s1445_s1] sm:$0xff]   ;;  %v1161_v27 = vld [vmem:[%s315_s8 + $0x8] ss:$0 sps:$4 sm:$0xff]   ;;  %v1167_v34 = vld [vmem:[%s1447_s3 + $0x10] sm:$0xff]  }
  0x16   : > { %1053 = vmatpush3.bf16.msra.mxu1 %v1142_v8  ;;  %v1164_v31 = vld [vmem:[%s1447_s3 + $0x28] sm:$0xff]   ;;  %v1165_v32 = vld [vmem:[%s1447_s3 + $0x20] sm:$0xff]   ;;  %v1170_v37 = vld [vmem:[%s1449_s5 + $0x38] sm:$0xff]  }
  0x17   : > { %1004 = vmatpush3.bf16.msra.mxu0 %v1143_v9  ;;  %1054 = vmatprep.subr.bf16.mxu1 %v1202_v1  ;;  %v1168_v35 = vld [vmem:[%s1447_s3 + $0x8] sm:$0xff]   ;;  %v1169_v36 = vld [vmem:[%s1447_s3] sm:$0xff]   ;;  %v1171_v38 = vld [vmem:[%s1449_s5 + $0x30] sm:$0xff]  }
  0x18   : > { %1005 = vmatprep.subr.bf16.mxu0 %v1144_v10  ;;  %v1172_v39 = vld [vmem:[%s1449_s5 + $0x28] sm:$0xff]   ;;  %v1173_v40 = vld [vmem:[%s1449_s5 + $0x20] sm:$0xff]   ;;  %v1174_v41 = vld [vmem:[%s1449_s5 + $0x18] sm:$0xff]  }
  0x19   : > { %v1175_v42 = vld [vmem:[%s1449_s5 + $0x10] sm:$0xff]   ;;  %v978_v49 = vld [vmem:[%s1446_s2] ss:$0 sm:$0xff]  ;;  %v1176_v57 = vld [vmem:[%s1449_s5 + $0x8] sm:$0xff]  }
  0x1a   : > { %1055 = vmatpush3.bf16.msra.mxu1 %v1145_v11  ;;  %v1177_v58 = vld [vmem:[%s1449_s5] sm:$0xff]  }
  0x1b   : > { %1006 = vmatpush3.bf16.msra.mxu0 %v1146_v12  ;;  %1056 = vmatprep.subr.bf16.mxu1 %v1202_v1  ;;  %v979_v59 = vld [vmem:[%s1448_s4] ss:$0 sm:$0xff] }
  0x1c   : > { %1007 = vmatprep.subr.bf16.mxu0 %v1147_v13 }
  0x1e   : > { %1057 = vmatpush3.bf16.msra.mxu1 %v1148_v14 }
  0x1f   : > { %1008 = vmatpush3.bf16.msra.mxu0 %v1149_v15  ;;  %1058 = vmatprep.subr.bf16.mxu1 %v1202_v1 }
  0x20   : > { %1009 = vmatprep.subr.bf16.mxu0 %v1150_v16 }
  0x22   : > { %1059 = vmatpush3.bf16.msra.mxu1 %v1151_v17 }
  0x23   : > { %1010 = vmatpush3.bf16.msra.mxu0 %v1152_v18  ;;  %1060 = vmatprep.subr.bf16.mxu1 %v1202_v1 }
  0x24   : > { %1011 = vmatprep.subr.bf16.mxu0 %v1153_v19 }
  0x26   : > { %1061 = vmatpush3.bf16.msra.mxu1 %v1154_v20 }
  0x27   : > { %1012 = vmatpush3.bf16.msra.mxu0 %v1155_v21  ;;  %1062 = vmatprep.subr.bf16.mxu1 %v1202_v1 }
  0x28   : > { %1013 = vmatprep.subr.bf16.mxu0 %v1156_v23 }
  0x2a   : > { %1063 = vmatpush3.bf16.msra.mxu1 %v1157_v25 }
  0x2b   : > { %1014 = vmatpush3.bf16.msra.mxu0 %v1158_v26  ;;  %1088 = vmatprep.subr.bf16.mxu1 %v1202_v1 }
  0x2c   : > { %1068 = vmatprep.subr.bf16.mxu0 %v1202_v1 }
  0x2d   : > { %1065 = vmatmul.mubr.bf16.vlgmr.msra.gmra.mxu1 %v1161_v27 }
  0x2e   : > { %572 = vmatmul.mubr.bf16.vlgmr.msra.gmra.mxu0 %v951_v29  ;;  %1104 = vmatprep.mubr.msk.bf16.mxu1 %vm1203_vm0, %v1202_v1 }
  0x2f   : > { %1069 = vmatpush3.bf16.msra.mxu0 %v1162_v28  ;;  %1084 = vmatprep.mubr.msk.bf16.mxu0 %vm1203_vm0, %v1202_v1 }
  0x30   : > { %1070 = vmatprep.subr.bf16.mxu0 %v1202_v1  ;;  %1089 = vmatpush3.bf16.msra.mxu1 %v1170_v37 }
  0x31   : > { %1090 = vmatprep.subr.bf16.mxu1 %v1202_v1 }
  0x33   : > { %1071 = vmatpush3.bf16.msra.mxu0 %v1163_v30 }
  0x34   : > { %1072 = vmatprep.subr.bf16.mxu0 %v1202_v1  ;;  %1091 = vmatpush3.bf16.msra.mxu1 %v1171_v38 }
  0x35   : > { %1092 = vmatprep.subr.bf16.mxu1 %v1202_v1 }
  0x37   : > { %1073 = vmatpush3.bf16.msra.mxu0 %v1164_v31 }
  0x38   : > { %1074 = vmatprep.subr.bf16.mxu0 %v1202_v1  ;;  %1093 = vmatpush3.bf16.msra.mxu1 %v1172_v39 }
  0x39   : > { %1094 = vmatprep.subr.bf16.mxu1 %v1202_v1 }
  0x3b   : > { %1075 = vmatpush3.bf16.msra.mxu0 %v1165_v32 }
  0x3c   : > { %1076 = vmatprep.subr.bf16.mxu0 %v1202_v1  ;;  %1095 = vmatpush3.bf16.msra.mxu1 %v1173_v40 }
  0x3d   : > { %1096 = vmatprep.subr.bf16.mxu1 %v1202_v1 }
  0x3f   : > { %1077 = vmatpush3.bf16.msra.mxu0 %v1166_v33 }
  0x40   : > { %1078 = vmatprep.subr.bf16.mxu0 %v1202_v1  ;;  %1097 = vmatpush3.bf16.msra.mxu1 %v1174_v41 }
  0x41   : > { %1098 = vmatprep.subr.bf16.mxu1 %v1202_v1 }
  0x43   : > { %1079 = vmatpush3.bf16.msra.mxu0 %v1167_v34 }
  0x44   : > { %1080 = vmatprep.subr.bf16.mxu0 %v1202_v1  ;;  %1099 = vmatpush3.bf16.msra.mxu1 %v1175_v42 }
  0x45   : > { %1100 = vmatprep.subr.bf16.mxu1 %v1202_v1 }
  0x47   : > { %1081 = vmatpush3.bf16.msra.mxu0 %v1168_v35 }
  0x48   : > { %1082 = vmatprep.subr.bf16.mxu0 %v1202_v1  ;;  %1101 = vmatpush3.bf16.msra.mxu1 %v1176_v57 }
  0x49   : > { %1102 = vmatprep.subr.bf16.mxu1 %v1202_v1  ;;  %v988_v1 = vld [vmem:[%s1450_s6] ss:$0 sm:$0xff] }
  0x4b   : > { %1083 = vmatpush3.bf16.msra.mxu0 %v1169_v36 }
  0x4c   : > { %1103 = vmatpush3.bf16.msra.mxu1 %v1177_v58 }
  0xed   : > { %v613_v43 = vpop.f32.mrf.mxu1 }
  0xee   : > { %v1015_v44 = vpop.f32.mrf.mxu0 }
  0xef   : > { %v1066_v45 = vpop.f32.mrf.mxu1 }
  0xf0   : > { %v1016_v46 = vpop.f32.mrf.mxu0 }
  0xf1   : > { %v1017_v47 = vadd.f32 %v1016_v46, %v1015_v44  ;;  %v616_v48 = vpop.f32.mrf.mxu1 }
  0xf2   : > { %v1018_v50 = vpop.f32.mrf.mxu0 }
  0xf3   : > { %v614_v51 = vadd.f32 %v1017_v47, %v613_v43  ;;  %v1067_v52 = vpop.f32.mrf.mxu1 }
  0xf4   : > { %v1019_v53 = vpop.f32.mrf.mxu0 }
  0xf5   : > { %v632_v54 = vadd.f32 %v978_v49, %v614_v51 }
  0xf7   : > { %v633_v55 = vmax.f32 %v632_v54, 0.0 }
  0xf9   : > { %v634_v56 = vpack.c.bf16 %v633_v55, %v633_v55 }
  0xfb   : > { %1085 = vmatmul.mubr.bf16.vlgmr.msra.gmra.mxu0 %v634_v56 }
 0x1bb   : > { %v740_v60 = vpop.f32.mrf.mxu0 }
 0x1bc   : > { %v741_v61 = vadd.f32 %v979_v59, %v740_v60 }
 0x1bd   : > { %v1086_v62 = vpop.f32.mrf.mxu0 }
 0x1be   : > { %v746_v63 = vmax.f32 %v741_v61, 0.0 }
 0x1bf   : > { %v743_v0 = vpop.f32.mrf.mxu0 }
 0x1c0   : > { %v747_v2 = vpack.c.bf16 %v746_v63, %v746_v63 }
 0x1c1   : > { %v1087_v3 = vpop.f32.mrf.mxu0 }
 0x1c2   : > { %1105 = vmatmul.mubr.bf16.vlgmr.msra.gmra.mxu1 %v747_v2 }
 0x282   : > { %v853_v4 = vpop.f32.mrf.mxu1 }
 0x283   : > { %v854_v5 = vadd.f32 %v988_v1, %v853_v4 }
 0x284   : > { %v1106_v6 = vpop.f32.mrf.mxu1 }
 0x285   : > { %859 = vst [vmem:[%s326_s22] sm:$0xff] %v854_v5 }
 0x286   : > { %v856_v7 = vpop.f32.mrf.mxu1 }
 0x288   : > { %v1107_v8 = vpop.f32.mrf.mxu1 }
 0x289 PF: > { %s17_s26 = sadd.s32 1, %s1200_s26   ;;  %s1452_s24 = smov %s1196_s25 }
 0x28a   : > { %p14_p5 = scmp.ge.s32.totalorder %s17_s26, 4   ;;  %s1453_s25 = smov %s1455_s27 }
 0x28c   :  { %16 = sbr.rel (!%p14_p5) target bundleno = 2 (0x2), region = 89 }

// kernel: conv_forward.4
= control target key start
LH: loop header
LB: loop body
LE: loop exit
PB: predicated region body
PF: predicated region fallthrough
CT: control target
= control target key end

     0   :  { %vm582_vm0 = vsmask.f32 7424  ;;  %vm1131_vm1 = vcmask 1045504   ;;  %vm1608_vm2 = vsmask.f32 5376  ;;  %s2965_s22 = smov 64   ;;  %s3623_s1 = inlined_call_operand.vmem [shape: bf16[4,512,128], index: 1, kind: input, shape index: {}]   ;;  %s3624_s0 = inlined_call_operand.vmem [shape: bf16[48,512], index: 0, kind: input, shape index: {}]   ;;  %s3625_s2 = inlined_call_operand.vmem [shape: f32[1,32], index: 2, kind: input, shape index: {}]   ;;  %s3626_s3 = inlined_call_operand.vmem [shape: bf16[48,32], index: 3, kind: output, shape index: {}]  }
   0x1   :  { %v2795_v0 = vld [vmem:[%s3623_s1 + $0x78] sm:$0xff]   ;;  %v2799_v4 = vld [vmem:[%s3623_s1 + $0x70] sm:$0xff]   ;;  %v2803_v8 = vld [vmem:[%s3623_s1 + $0x68] sm:$0xff]   ;;  %vm2132_vm3 = vcmask 257024  }
   0x2   :  { %v2796_v1 = vld [vmem:[%s3623_s1 + $0xf8] sm:$0xff]   ;;  %2521 = vmatprep.subr.bf16.mxu0 %v2795_v0  ;;  %v2800_v5 = vld [vmem:[%s3623_s1 + $0xf0] sm:$0xff]   ;;  %v2804_v9 = vld [vmem:[%s3623_s1 + $0xe8] sm:$0xff]  }
   0x3   :  { %v2797_v2 = vld [vmem:[%s3623_s1 + $0x38] sm:$0xff]   ;;  %2555 = vmatprep.subr.bf16.mxu1 %v2796_v1  ;;  %v2801_v6 = vld [vmem:[%s3623_s1 + $0x30] sm:$0xff]   ;;  %v2805_v10 = vld [vmem:[%s3623_s1 + $0x28] sm:$0xff]  }
   0x4   :  { %v2798_v3 = vld [vmem:[%s3623_s1 + $0xb8] sm:$0xff]   ;;  %2522 = vmatpush3.bf16.msra.mxu0 %v2797_v2  ;;  %v2802_v7 = vld [vmem:[%s3623_s1 + $0xb0] sm:$0xff]   ;;  %v2806_v11 = vld [vmem:[%s3623_s1 + $0xa8] sm:$0xff]  }
   0x5   :  { %2556 = vmatpush3.bf16.msra.mxu1 %v2798_v3  ;;  %2523 = vmatprep.subr.bf16.mxu0 %v2799_v4  ;;  %v2807_v12 = vld [vmem:[%s3623_s1 + $0x60] sm:$0xff]   ;;  %v2811_v16 = vld [vmem:[%s3623_s1 + $0x58] sm:$0xff]   ;;  %v2815_v20 = vld [vmem:[%s3623_s1 + $0x50] sm:$0xff]  }
   0x6   :  { %2557 = vmatprep.subr.bf16.mxu1 %v2800_v5  ;;  %v2808_v13 = vld [vmem:[%s3623_s1 + $0xe0] sm:$0xff]   ;;  %v2812_v17 = vld [vmem:[%s3623_s1 + $0xd8] sm:$0xff]   ;;  %v2816_v21 = vld [vmem:[%s3623_s1 + $0xd0] sm:$0xff]  }
   0x7   :  { %v2809_v14 = vld [vmem:[%s3623_s1 + $0x20] sm:$0xff]   ;;  %v2813_v18 = vld [vmem:[%s3623_s1 + $0x18] sm:$0xff]   ;;  %v2817_v22 = vld [vmem:[%s3623_s1 + $0x10] sm:$0xff]  }
   0x8   :  { %2524 = vmatpush3.bf16.msra.mxu0 %v2801_v6  ;;  %v2810_v15 = vld [vmem:[%s3623_s1 + $0xa0] sm:$0xff]   ;;  %v2814_v19 = vld [vmem:[%s3623_s1 + $0x98] sm:$0xff]   ;;  %v2818_v23 = vld [vmem:[%s3623_s1 + $0x90] sm:$0xff]  }
   0x9   :  { %2558 = vmatpush3.bf16.msra.mxu1 %v2802_v7  ;;  %2525 = vmatprep.subr.bf16.mxu0 %v2803_v8  ;;  %v2819_v24 = vld [vmem:[%s3623_s1 + $0x48] sm:$0xff]   ;;  %v2823_v28 = vld [vmem:[%s3623_s1 + $0x40] sm:$0xff]   ;;  %v3088_v33 = vld [vmem:[%s3624_s0 + $0x10] sm:$0xff] }
   0xa   :  { %2559 = vmatprep.subr.bf16.mxu1 %v2804_v9  ;;  %v2820_v25 = vld [vmem:[%s3623_s1 + $0xc8] sm:$0xff]   ;;  %v2824_v29 = vld [vmem:[%s3623_s1 + $0xc0] sm:$0xff]   ;;  %v3102_v37 = vld [vmem:[%s3624_s0 + $0x18] sm:$0xff] }
   0xb   :  { %v2821_v26 = vld [vmem:[%s3623_s1 + $0x8] sm:$0xff]   ;;  %v2825_v30 = vld [vmem:[%s3623_s1] sm:$0xff]   ;;  %v2831_v40 = vld [vmem:[%s3623_s1 + $0x178] sm:$0xff]  }
   0xc   :  { %2526 = vmatpush3.bf16.msra.mxu0 %v2805_v10  ;;  %v2822_v27 = vld [vmem:[%s3623_s1 + $0x88] sm:$0xff]   ;;  %v2826_v31 = vld [vmem:[%s3623_s1 + $0x80] sm:$0xff]   ;;  %v2832_v41 = vld [vmem:[%s3623_s1 + $0x1f8] sm:$0xff]  }
   0xd   :  { %2560 = vmatpush3.bf16.msra.mxu1 %v2806_v11  ;;  %2527 = vmatprep.subr.bf16.mxu0 %v2807_v12  ;;  %v15_v32 = vld [vmem:[%s3624_s0] sm:$0xff]  ;;  %v16_v34 = vld [vmem:[%s3624_s0 + $0x8] sm:$0xff]  ;;  %v2833_v42 = vld [vmem:[%s3623_s1 + $0x138] sm:$0xff]  }
   0xe   :  { %2561 = vmatprep.subr.bf16.mxu1 %v2808_v13  ;;  %v3094_v35 = vcombine.low %v15_v32, %v3088_v33  ;;  %v3097_v36 = vcombine.high %v15_v32, %v3088_v33  ;;  %v3105_v38 = vcombine.low %v16_v34, %v3102_v37  ;;  %v3108_v39 = vcombine.high %v16_v34, %v3102_v37  ;;  %v2834_v43 = vld [vmem:[%s3623_s1 + $0x1b8] sm:$0xff]   ;;  %v2835_v44 = vld [vmem:[%s3623_s1 + $0x170] sm:$0xff]   ;;  %v2839_v48 = vld [vmem:[%s3623_s1 + $0x168] sm:$0xff]  }
   0xf   :  { %v2836_v45 = vld [vmem:[%s3623_s1 + $0x1f0] sm:$0xff]   ;;  %v2840_v49 = vld [vmem:[%s3623_s1 + $0x1e8] sm:$0xff]   ;;  %v19_v53 = vld [vmem:[%s3624_s0 + $0x20] sm:$0xff] }
  0x10   :  { %2528 = vmatpush3.bf16.msra.mxu0 %v2809_v14  ;;  %367 = vmatprep.mubr.bf16.mxu0 %v3097_v36  ;;  %v2837_v46 = vld [vmem:[%s3623_s1 + $0x130] sm:$0xff]   ;;  %v2841_v50 = vld [vmem:[%s3623_s1 + $0x128] sm:$0xff]   ;;  %v598_v51 = vshll.u32 %v3097_v36, 16  ;;  %v596_v55 = vshrl.u32 %v3097_v36, 16  ;;  %v622_v56 = vshll.u32 %v3108_v39, 16  ;;  %v620_v60 = vshrl.u32 %v3108_v39, 16 }
  0x11   :  { %2562 = vmatpush3.bf16.msra.mxu1 %v2810_v15  ;;  %2529 = vmatprep.subr.bf16.mxu0 %v2811_v16  ;;  %v2838_v47 = vld [vmem:[%s3623_s1 + $0x1b0] sm:$0xff]   ;;  %v2842_v52 = vld [vmem:[%s3623_s1 + $0x1a8] sm:$0xff]   ;;  %v2848_v62 = vld [vmem:[%s3623_s1 + $0x160] sm:$0xff]   ;;  %v584_v8 = vshrl.u32 %v3094_v35, 16  ;;  %v586_v11 = vshll.u32 %v3094_v35, 16 }
  0x12   :  { %2563 = vmatprep.subr.bf16.mxu1 %v2812_v17  ;;  %423 = vmatprep.mubr.bf16.mxu1 %v3108_v39  ;;  %v21_v54 = vld [vmem:[%s3624_s0 + $0x30] sm:$0xff]  ;;  %v3164_v58 = vld [vmem:[%s3624_s0 + $0x2c] ss:$16 sps:$4 sm:$0xff]   ;;  %v3172_v61 = vld [vmem:[%s3624_s0 + $0x28] ss:$16 sps:$4 sm:$0xff]   ;;  %v600_v63 = vrot.slane %v598_v51, 1 }
  0x13   :  { %v3159_v57 = vcombine.high %v19_v53, %v21_v54  ;;  %v3166_v59 = vcombine.low %v19_v53, %v21_v54  ;;  %v2849_v0 = vld [vmem:[%s3623_s1 + $0x1e0] sm:$0xff]   ;;  %v624_v1 = vrot.slane %v622_v56, 1  ;;  %v627_v5 = vshll.u32 %v3164_v58, 16  ;;  %v2852_v6 = vld [vmem:[%s3623_s1 + $0x158] sm:$0xff]   ;;  %v3214_v14 = vld [vmem:[%s3624_s0 + $0x48] sm:$0xff] }
  0x14   :  { %2530 = vmatpush3.bf16.msra.mxu0 %v2813_v18  ;;  %v2850_v2 = vld [vmem:[%s3623_s1 + $0x120] sm:$0xff]   ;;  %v2853_v7 = vld [vmem:[%s3623_s1 + $0x1d8] sm:$0xff]   ;;  %v601_v10 = vor.u32 %v600_v63, %v596_v55  ;;  %v610_v18 = vshll.u32 %v3105_v38, 16  ;;  %v615_v36 = vshll.u32 %v3172_v61, 16  ;;  %v2867_v39 = vld [vmem:[%s3623_s1 + $0x188] sm:$0xff]  }
  0x15   :  { %2564 = vmatpush3.bf16.msra.mxu1 %v2814_v19  ;;  %2531 = vmatprep.subr.bf16.mxu0 %v2815_v20  ;;  %v603_v3 = vshll.u32 %v3159_v57, 16  ;;  %v2851_v4 = vld [vmem:[%s3623_s1 + $0x1a0] sm:$0xff]   ;;  %v2854_v9 = vld [vmem:[%s3623_s1 + $0x118] sm:$0xff]   ;;  %v625_v16 = vor.u32 %v624_v1, %v620_v60  ;;  %v3220_v17 = vrot.slane %v627_v5, 1  ;;  %v2153_v20 = vcombine.high %v3214_v14, %v3214_v14  ;;  %v2876_v54 = vld [vmem:[%s3623_s1 + $0x270] sm:$0xff]  }
  0x16   :  { %2565 = vmatprep.subr.bf16.mxu1 %v2816_v21  ;;  %v2855_v12 = vld [vmem:[%s3623_s1 + $0x198] sm:$0xff]   ;;  %v3209_v13 = vld [vmem:[%s3624_s0 + $0x40] sm:$0xff]  ;;  %v612_v34 = vrot.slane %v610_v18, 1  ;;  %v639_v55 = vshrl.u32 %v3159_v57, 16  ;;  %v2877_v56 = vld [vmem:[%s3623_s1 + $0x2f0] sm:$0xff]   ;;  %v655_v60 = vshrl.u32 %v3164_v58, 16 }
  0x17   :  { %v3218_v15 = vrot.slane %v603_v3, 1  ;;  %v2151_v19 = vcombine.high %v3209_v13, %v3209_v13  ;;  %v2150_v21 = vcombine.low %v3209_v13, %v3209_v13  ;;  %v630_v32 = vsel %vm582_vm0, %v625_v16, %v3220_v17  ;;  %v2873_v51 = vld [vmem:[%s3623_s1 + $0x2f8] sm:$0xff]  }
  0x18   :  { %2532 = vmatpush3.bf16.msra.mxu0 %v2817_v22  ;;  %v2152_v22 = vcombine.low %v3214_v14, %v3214_v14  ;;  %v2875_v53 = vld [vmem:[%s3623_s1 + $0x2b8] sm:$0xff]   ;;  %v631_v63 = vshrl.u32 %v3166_v59, 16  ;;  %v647_v1 = vshrl.u32 %v3172_v61, 16 }
  0x19   :  { %2566 = vmatpush3.bf16.msra.mxu1 %v2818_v23  ;;  %2533 = vmatprep.subr.bf16.mxu0 %v2819_v24  ;;  %v2860_v23 = vld [vmem:[%s3623_s1 + $0x150] sm:$0xff]  }
  0x1a   :  { %2567 = vmatprep.subr.bf16.mxu1 %v2820_v25  ;;  %v2861_v24 = vld [vmem:[%s3623_s1 + $0x1d0] sm:$0xff]   ;;  %v608_v25 = vshrl.u32 %v3105_v38, 16 }
  0x1c   :  { %2534 = vmatpush3.bf16.msra.mxu0 %v2821_v26  ;;  %v2862_v26 = vld [vmem:[%s3623_s1 + $0x110] sm:$0xff]  }
  0x1d   :  { %2568 = vmatpush3.bf16.msra.mxu1 %v2822_v27  ;;  %2535 = vmatprep.subr.bf16.mxu0 %v2823_v28  ;;  %v588_v27 = vrot.slane %v586_v11, 1  ;;  %v2863_v28 = vld [vmem:[%s3623_s1 + $0x190] sm:$0xff]  }
  0x1e   :  { %2569 = vmatprep.subr.bf16.mxu1 %v2824_v29  ;;  %v606_v29 = vsel %vm582_vm0, %v601_v10, %v3218_v15  ;;  %v657_v10 = vor.u32 %v655_v60, %v3220_v17  ;;  %v2887_v17 = vld [vmem:[%s3623_s1 + $0x2a8] sm:$0xff]  }
  0x1f   :  { %v2902_v60 = vld [vmem:[%s3623_s1 + $0x208] sm:$0xff]  }
  0x20   :  { %2536 = vmatpush3.bf16.msra.mxu0 %v2825_v30  ;;  %v591_v30 = vshll.u32 %v3166_v59, 16 }
  0x21   :  { %2570 = vmatpush3.bf16.msra.mxu1 %v2826_v31  ;;  %2589 = vmatprep.subr.bf16.mxu0 %v2831_v40  ;;  %v2864_v31 = vld [vmem:[%s3623_s1 + $0x148] sm:$0xff]   ;;  %v2868_v40 = vld [vmem:[%s3623_s1 + $0x140] sm:$0xff]  }
  0x22   :  { %2623 = vmatprep.subr.bf16.mxu1 %v2832_v41  ;;  %v593_v41 = vrot.slane %v591_v30, 1 }
  0x23   :  { %368 = vmatmul.mubr.bf16.vlgmr.msra.gmra.mxu0 %v3094_v35  ;;  %v2865_v35 = vld [vmem:[%s3623_s1 + $0x1c8] sm:$0xff]  }
  0x24   :  { %424 = vmatmul.mubr.bf16.vlgmr.msra.gmra.mxu1 %v3105_v38  ;;  %2590 = vmatpush3.bf16.msra.mxu0 %v2833_v42  ;;  %v2866_v38 = vld [vmem:[%s3623_s1 + $0x108] sm:$0xff]   ;;  %v2869_v42 = vld [vmem:[%s3623_s1 + $0x1c0] sm:$0xff]  }
  0x25   :  { %2624 = vmatpush3.bf16.msra.mxu1 %v2834_v43  ;;  %2591 = vmatprep.subr.bf16.mxu0 %v2835_v44  ;;  %v589_v43 = vor.u32 %v588_v27, %v584_v8  ;;  %v613_v44 = vor.u32 %v612_v34, %v608_v25  ;;  %v2884_v8 = vld [vmem:[%s3623_s1 + $0x268] sm:$0xff]  }
  0x26   :  { %2625 = vmatprep.subr.bf16.mxu1 %v2836_v45  ;;  %375 = vmatprep.mubr.bf16.mxu0 %v3159_v57  ;;  %v617_v45 = vrot.slane %v615_v36, 1 }
  0x27   :  { %431 = vmatprep.mubr.bf16.mxu1 %v3164_v58 }
  0x28   :  { %2592 = vmatpush3.bf16.msra.mxu0 %v2837_v46  ;;  %v2870_v46 = vld [vmem:[%s3623_s1 + $0x100] sm:$0xff]  }
  0x29   :  { %2626 = vmatpush3.bf16.msra.mxu1 %v2838_v47  ;;  %2593 = vmatprep.subr.bf16.mxu0 %v2839_v48  ;;  %v2871_v47 = vld [vmem:[%s3623_s1 + $0x180] sm:$0xff]   ;;  %v2872_v48 = vld [vmem:[%s3623_s1 + $0x278] sm:$0xff]  }
  0x2a   :  { %2627 = vmatprep.subr.bf16.mxu1 %v2840_v49  ;;  %v594_v49 = vsel %vm582_vm0, %v589_v43, %v593_v41  ;;  %v2892_v43 = vld [vmem:[%s3623_s1 + $0x258] sm:$0xff]  }
  0x2b   :  { %376 = vmatmul.mubr.bf16.gmra.mxu0 %v3166_v59 }
  0x2c   :  { %2594 = vmatpush3.bf16.msra.mxu0 %v2841_v50  ;;  %432 = vmatmul.mubr.bf16.gmra.mxu1 %v3172_v61  ;;  %v618_v50 = vsel %vm582_vm0, %v613_v44, %v617_v45 }
  0x2d   :  { %2628 = vmatpush3.bf16.msra.mxu1 %v2842_v52  ;;  %2595 = vmatprep.subr.bf16.mxu0 %v2848_v62  ;;  %v2874_v52 = vld [vmem:[%s3623_s1 + $0x238] sm:$0xff]   ;;  %v2878_v62 = vld [vmem:[%s3623_s1 + $0x230] sm:$0xff]  }
  0x2e   :  { %2629 = vmatprep.subr.bf16.mxu1 %v2849_v0  ;;  %383 = vmatprep.mubr.bf16.mxu0 %v2151_v19  ;;  %v2879_v0 = vld [vmem:[%s3623_s1 + $0x2b0] sm:$0xff]   ;;  %v633_v19 = vor.u32 %v631_v63, %v593_v41 }
  0x2f   :  { %439 = vmatprep.mubr.bf16.mxu1 %v2153_v20 }
  0x30   :  { %2596 = vmatpush3.bf16.msra.mxu0 %v2850_v2  ;;  %v467_v2 = vld [vmem:[%s3624_s0 + $0x50] sm:$0x11] }
  0x31   :  { %2630 = vmatpush3.bf16.msra.mxu1 %v2851_v4  ;;  %2597 = vmatprep.subr.bf16.mxu0 %v2852_v6  ;;  %v468_v4 = vld [vmem:[%s3624_s0 + $0x58] sm:$0x11]  ;;  %v2259_v5 = vcombine.high %v3209_v13, %v467_v2 }
  0x32   :  { %2631 = vmatprep.subr.bf16.mxu1 %v2853_v7  ;;  %v2261_v6 = vcombine.high %v3214_v14, %v468_v4  ;;  %v2258_v7 = vcombine.low %v3209_v13, %v467_v2  ;;  %v2260_v11 = vcombine.low %v3214_v14, %v468_v4  ;;  %v1133_v2 = vrot.slane %v3166_v59, 2  ;;  %v2906_v4 = vld [vmem:[%s3623_s1 + $0x200] sm:$0xff]   ;;  %v2955_v59 = vld [vmem:[%s3624_s0 + $0x28] ss:$16 sps:$4 sm:$0xff]  }
  0x33   :  { %384 = vmatmul.mubr.bf16.gmra.mxu0 %v2150_v21  ;;  %v643_v16 = vshll.u32 %v2259_v5, 16  ;;  %v2886_v21 = vld [vmem:[%s3623_s1 + $0x228] sm:$0xff]   ;;  %v666_v36 = vshrl.u32 %v2259_v5, 16  ;;  %v1136_v5 = vrot.slane %v3159_v57, 2 }
  0x34   :  { %2598 = vmatpush3.bf16.msra.mxu0 %v2854_v9  ;;  %440 = vmatmul.mubr.bf16.gmra.mxu1 %v2152_v22  ;;  %v641_v9 = vor.u32 %v639_v55, %v3218_v15  ;;  %v659_v18 = vshll.u32 %v2261_v6, 16  ;;  %v635_v20 = vshll.u32 %v2258_v7, 16  ;;  %v649_v15 = vor.u32 %v647_v1, %v617_v45  ;;  %v2893_v45 = vld [vmem:[%s3623_s1 + $0x2d8] sm:$0xff]   ;;  %v2905_v1 = vld [vmem:[%s3623_s1 + $0x2c0] sm:$0xff]  }
  0x35   :  { %2632 = vmatpush3.bf16.msra.mxu1 %v2855_v12  ;;  %2599 = vmatprep.subr.bf16.mxu0 %v2860_v23  ;;  %v2885_v12 = vld [vmem:[%s3623_s1 + $0x2e8] sm:$0xff]   ;;  %v651_v22 = vshll.u32 %v2260_v11, 16  ;;  %v645_v23 = vrot.slane %v643_v16, 1  ;;  %v669_v41 = vshrl.u32 %v2260_v11, 16 }
  0x36   :  { %2633 = vmatprep.subr.bf16.mxu1 %v2861_v24  ;;  %911 = vmatprep.mubr.bf16.mxu0 %v606_v29  ;;  %v661_v24 = vrot.slane %v659_v18, 1  ;;  %v637_v25 = vrot.slane %v635_v20, 1  ;;  %v1007_v11 = vld [vmem:[%s3624_s0 + $0x8] sm:$0xcc]  ;;  %v1142_v18 = vrot.slane %v3164_v58, 2 }
  0x37   :  { %967 = vmatprep.mubr.bf16.mxu1 %v630_v32  ;;  %v653_v27 = vrot.slane %v651_v22, 1  ;;  %v646_v29 = vsel %vm582_vm0, %v641_v9, %v645_v23  ;;  %v2361_v16 = vcombine.high %v1007_v11, %v3102_v37  ;;  %v2948_v57 = vld [vmem:[%s3624_s0] ss:$16 sps:$4 sm:$0xfc]  }
  0x38   :  { %2600 = vmatpush3.bf16.msra.mxu0 %v2862_v26  ;;  %v2888_v26 = vld [vmem:[%s3623_s1 + $0x260] sm:$0xff]   ;;  %v638_v32 = vsel %vm582_vm0, %v633_v19, %v637_v25 }
  0x39   :  { %2634 = vmatpush3.bf16.msra.mxu1 %v2863_v28  ;;  %2601 = vmatprep.subr.bf16.mxu0 %v2864_v31  ;;  %v2889_v28 = vld [vmem:[%s3623_s1 + $0x2e0] sm:$0xff]   ;;  %v662_v31 = vsel %vm582_vm0, %v657_v10, %v661_v24  ;;  %v654_v34 = vsel %vm582_vm0, %v649_v15, %v653_v27  ;;  %v1141_v22 = vrot.slane %v2361_v16, 2  ;;  %v1623_v16 = vrot.slane %v591_v30, 3 }
  0x3a   :  { %2635 = vmatprep.subr.bf16.mxu1 %v2865_v35  ;;  %v2890_v35 = vld [vmem:[%s3623_s1 + $0x220] sm:$0xff]  }
  0x3c   :  { %2602 = vmatpush3.bf16.msra.mxu0 %v2866_v38  ;;  %v2891_v38 = vld [vmem:[%s3623_s1 + $0x2a0] sm:$0xff]  }
  0x3d   :  { %2636 = vmatpush3.bf16.msra.mxu1 %v2867_v39  ;;  %2603 = vmatprep.subr.bf16.mxu0 %v2868_v40  ;;  %v672_v39 = vshrl.u32 %v2261_v6, 16  ;;  %v663_v40 = vshrl.u32 %v2258_v7, 16  ;;  %v2907_v6 = vld [vmem:[%s3623_s1 + $0x280] sm:$0xff]  }
  0x3e   :  { %2637 = vmatprep.subr.bf16.mxu1 %v2869_v42  ;;  %v668_v42 = vor.u32 %v666_v36, %v645_v23  ;;  %v1006_v7 = vld [vmem:[%s3624_s0] sm:$0xcc]  ;;  %v1143_v23 = vsel %vm1131_vm1, %v1141_v22, %v1142_v18 }
  0x3f   :  { %v674_v44 = vor.u32 %v672_v39, %v661_v24  ;;  %v2358_v9 = vcombine.low %v1006_v7, %v3088_v33  ;;  %v2359_v10 = vcombine.high %v1006_v7, %v3088_v33  ;;  %v2913_v33 = vld [vmem:[%s3623_s1 + $0x3f8] sm:$0xff]   ;;  %v2944_v7 = vld [vmem:[%s3623_s1 + $0x340] sm:$0xff]  }
  0x40   :  { %2604 = vmatpush3.bf16.msra.mxu0 %v2870_v46  ;;  %v2894_v46 = vld [vmem:[%s3623_s1 + $0x218] sm:$0xff]  }
  0x41   :  { %2638 = vmatpush3.bf16.msra.mxu1 %v2871_v47  ;;  %2657 = vmatprep.subr.bf16.mxu0 %v2872_v48  ;;  %v665_v47 = vor.u32 %v663_v40, %v637_v25  ;;  %v671_v48 = vor.u32 %v669_v41, %v653_v27  ;;  %v1132_v19 = vrot.slane %v2358_v9, 2  ;;  %v1135_v20 = vrot.slane %v2359_v10, 2  ;;  %v2916_v25 = vld [vmem:[%s3623_s1 + $0x370] sm:$0xff]   ;;  %v2925_v41 = vld [vmem:[%s3623_s1 + $0x3e8] sm:$0xff]   ;;  %v2945_v9 = vld [vmem:[%s3623_s1 + $0x3c0] sm:$0xff]  }
  0x42   :  { %2691 = vmatprep.subr.bf16.mxu1 %v2873_v51  ;;  %v2897_v51 = vld [vmem:[%s3623_s1 + $0x2d0] sm:$0xff]   ;;  %v1640_v10 = vrot.slane %v603_v3, 3 }
  0x43   :  { %912 = vmatmul.mubr.bf16.vlgmr.msra.gmra.mxu0 %v594_v49  ;;  %v2895_v49 = vld [vmem:[%s3623_s1 + $0x298] sm:$0xff]   ;;  %v1134_v58 = vsel %vm1131_vm1, %v1132_v19, %v1133_v2  ;;  %v2918_v27 = vld [vmem:[%s3623_s1 + $0x330] sm:$0xff]  }
  0x44   :  { %968 = vmatmul.mubr.bf16.vlgmr.msra.gmra.mxu1 %v618_v50  ;;  %2658 = vmatpush3.bf16.msra.mxu0 %v2874_v52  ;;  %v2896_v50 = vld [vmem:[%s3623_s1 + $0x250] sm:$0xff]   ;;  %v2954_v19 = vld [vmem:[%s3624_s0 + $0xc] ss:$16 sps:$4 sm:$0xfc]  }
  0x45   :  { %2692 = vmatpush3.bf16.msra.mxu1 %v2875_v53  ;;  %2659 = vmatprep.subr.bf16.mxu0 %v2876_v54  ;;  %v2898_v52 = vld [vmem:[%s3623_s1 + $0x210] sm:$0xff]   ;;  %v2900_v54 = vld [vmem:[%s3623_s1 + $0x248] sm:$0xff]  }
  0x46   :  { %2693 = vmatprep.subr.bf16.mxu1 %v2877_v56  ;;  %919 = vmatprep.mubr.bf16.mxu0 %v646_v29  ;;  %v2899_v53 = vld [vmem:[%s3623_s1 + $0x290] sm:$0xff]   ;;  %v2901_v56 = vld [vmem:[%s3623_s1 + $0x2c8] sm:$0xff]  }
  0x47   :  { %975 = vmatprep.mubr.bf16.mxu1 %v662_v31  ;;  %v1016_v29 = vld [vmem:[%s3624_s0 + $0x50] sm:$0x33] }
  0x48   :  { %2660 = vmatpush3.bf16.msra.mxu0 %v2878_v62  ;;  %v2903_v62 = vld [vmem:[%s3623_s1 + $0x288] sm:$0xff]   ;;  %v2367_v31 = vcombine.high %v3209_v13, %v1016_v29  ;;  %v2950_v3 = vld [vmem:[%s3624_s0 + $0x4] ss:$16 sps:$4 sm:$0xfc]  }
  0x49   :  { %2694 = vmatpush3.bf16.msra.mxu1 %v2879_v0  ;;  %2661 = vmatprep.subr.bf16.mxu0 %v2884_v8  ;;  %v2904_v0 = vld [vmem:[%s3623_s1 + $0x240] sm:$0xff]   ;;  %v1139_v8 = vrot.slane %v3172_v61, 2  ;;  %v2912_v61 = vld [vmem:[%s3623_s1 + $0x378] sm:$0xff]   ;;  %v1627_v30 = vshrl.u32 %v2950_v3, 16 }
  0x4a   :  { %2695 = vmatprep.subr.bf16.mxu1 %v2885_v12  ;;  %v2360_v12 = vcombine.low %v1007_v11, %v3102_v37  ;;  %v1137_v37 = vsel %vm1131_vm1, %v1135_v20, %v1136_v5  ;;  %v1146_v39 = vrot.slane %v2367_v31, 2  ;;  %v2946_v11 = vld [vmem:[%s3623_s1 + $0x300] sm:$0xff]   ;;  %v1610_v20 = vshrl.u32 %v2948_v57, 16 }
  0x4b   :  { %920 = vmatmul.mubr.bf16.gmra.mxu0 %v638_v32  ;;  %v1017_v32 = vld [vmem:[%s3624_s0 + $0x58] sm:$0x33] }
  0x4c   :  { %2662 = vmatpush3.bf16.msra.mxu0 %v2886_v21  ;;  %976 = vmatmul.mubr.bf16.gmra.mxu1 %v654_v34  ;;  %v2914_v21 = vld [vmem:[%s3623_s1 + $0x338] sm:$0xff]   ;;  %v1138_v15 = vrot.slane %v2360_v12, 2  ;;  %v2366_v34 = vcombine.low %v3209_v13, %v1016_v29  ;;  %v2368_v36 = vcombine.low %v3214_v14, %v1017_v32  ;;  %v1620_v12 = vrot.slane %v631_v63, 2 }
  0x4d   :  { %2696 = vmatpush3.bf16.msra.mxu1 %v2887_v17  ;;  %2663 = vmatprep.subr.bf16.mxu0 %v2888_v26  ;;  %v2915_v17 = vld [vmem:[%s3623_s1 + $0x3b8] sm:$0xff]   ;;  %v2917_v26 = vld [vmem:[%s3623_s1 + $0x3f0] sm:$0xff]  }
  0x4e   :  { %2697 = vmatprep.subr.bf16.mxu1 %v2889_v28  ;;  %927 = vmatprep.mubr.bf16.mxu0 %v668_v42  ;;  %v1140_v24 = vsel %vm1131_vm1, %v1138_v15, %v1139_v8  ;;  %v2919_v28 = vld [vmem:[%s3623_s1 + $0x3b0] sm:$0xff]   ;;  %v1144_v40 = vrot.slane %v2366_v34, 2  ;;  %v2926_v42 = vld [vmem:[%s3623_s1 + $0x328] sm:$0xff]   ;;  %v1613_v15 = vshll.u32 %v2948_v57, 16 }
  0x4f   :  { %983 = vmatprep.mubr.bf16.mxu1 %v674_v44 }
  0x50   :  { %2664 = vmatpush3.bf16.msra.mxu0 %v2890_v35  ;;  %v2369_v35 = vcombine.high %v3214_v14, %v1017_v32  ;;  %v1147_v14 = vsel %vm1131_vm1, %v1136_v5, %v1146_v39  ;;  %v1145_v44 = vsel %vm1131_vm1, %v1133_v2, %v1144_v40  ;;  %v2940_v2 = vld [vmem:[%s3623_s1 + $0x348] sm:$0xff]   ;;  %v1615_v29 = vrot.slane %v1613_v15, 3 }
  0x51   :  { %2698 = vmatpush3.bf16.msra.mxu1 %v2891_v38  ;;  %2665 = vmatprep.subr.bf16.mxu0 %v2892_v43  ;;  %v2924_v38 = vld [vmem:[%s3623_s1 + $0x368] sm:$0xff]   ;;  %v1148_v43 = vrot.slane %v2368_v36, 2  ;;  %v2958_v36 = vld [vmem:[%s3624_s0 + $0x44] ss:$16 sps:$4 sm:$0x7f]  }
  0x52   :  { %2699 = vmatprep.subr.bf16.mxu1 %v2893_v45  ;;  %v1150_v13 = vrot.slane %v2369_v35, 2  ;;  %v2927_v45 = vld [vmem:[%s3623_s1 + $0x3a8] sm:$0xff]  }
  0x53   :  { %928 = vmatmul.mubr.bf16.gmra.mxu0 %v665_v47  ;;  %v1149_v47 = vsel %vm1131_vm1, %v1139_v8, %v1148_v43  ;;  %v2942_v5 = vld [vmem:[%s3623_s1 + $0x308] sm:$0xff]   ;;  %v1637_v8 = vrot.slane %v639_v55, 2  ;;  %v2947_v55 = vld [vmem:[%s3623_s1 + $0x380] sm:$0xff]  }
  0x54   :  { %2666 = vmatpush3.bf16.msra.mxu0 %v2894_v46  ;;  %984 = vmatmul.mubr.bf16.gmra.mxu1 %v671_v48  ;;  %v1151_v46 = vsel %vm1131_vm1, %v1142_v18, %v1150_v13  ;;  %v2928_v48 = vld [vmem:[%s3623_s1 + $0x360] sm:$0xff]   ;;  %v2952_v18 = vld [vmem:[%s3624_s0 + $0x8] ss:$16 sps:$4 sm:$0xfc]  }
  0x55   :  { %2700 = vmatpush3.bf16.msra.mxu1 %v2895_v49  ;;  %2667 = vmatprep.subr.bf16.mxu0 %v2896_v50  ;;  %v2929_v49 = vld [vmem:[%s3623_s1 + $0x3e0] sm:$0xff]   ;;  %v3540_v63 = vor.u32 %v1640_v10, %v1637_v8  ;;  %v1644_v22 = vshrl.u32 %v2952_v18, 16 }
  0x56   :  { %2701 = vmatprep.subr.bf16.mxu1 %v2897_v51  ;;  %1388 = vmatprep.mubr.bf16.mxu0 %v1137_v37  ;;  %v2930_v50 = vld [vmem:[%s3623_s1 + $0x320] sm:$0xff]   ;;  %v1647_v37 = vshll.u32 %v2952_v18, 16 }
  0x57   :  { %1444 = vmatprep.mubr.bf16.mxu1 %v1143_v23  ;;  %v2931_v51 = vld [vmem:[%s3623_s1 + $0x3a0] sm:$0xff]   ;;  %v1646_v35 = vrot.slane %v1644_v22, 2 }
  0x58   :  { %2668 = vmatpush3.bf16.msra.mxu0 %v2898_v52  ;;  %v2932_v52 = vld [vmem:[%s3623_s1 + $0x358] sm:$0xff]  }
  0x59   :  { %2702 = vmatpush3.bf16.msra.mxu1 %v2899_v53  ;;  %2669 = vmatprep.subr.bf16.mxu0 %v2900_v54  ;;  %v2933_v53 = vld [vmem:[%s3623_s1 + $0x3d8] sm:$0xff]  }
  0x5a   :  { %2703 = vmatprep.subr.bf16.mxu1 %v2901_v56  ;;  %v2934_v54 = vld [vmem:[%s3623_s1 + $0x318] sm:$0xff]  }
  0x5b   :  { %v2935_v56 = vld [vmem:[%s3623_s1 + $0x398] sm:$0xff]  }
  0x5c   :  { %2670 = vmatpush3.bf16.msra.mxu0 %v2902_v60  ;;  %v2936_v60 = vld [vmem:[%s3623_s1 + $0x350] sm:$0xff]  }
  0x5d   :  { %2704 = vmatpush3.bf16.msra.mxu1 %v2903_v62  ;;  %2671 = vmatprep.subr.bf16.mxu0 %v2904_v0  ;;  %v2937_v62 = vld [vmem:[%s3623_s1 + $0x3d0] sm:$0xff]  }
  0x5e   :  { %2705 = vmatprep.subr.bf16.mxu1 %v2905_v1  ;;  %v2938_v0 = vld [vmem:[%s3623_s1 + $0x310] sm:$0xff]  }
  0x5f   :  { %v2939_v1 = vld [vmem:[%s3623_s1 + $0x390] sm:$0xff]  }
  0x60   :  { %2672 = vmatpush3.bf16.msra.mxu0 %v2906_v4  ;;  %v2941_v4 = vld [vmem:[%s3623_s1 + $0x3c8] sm:$0xff]  }
  0x61   :  { %2706 = vmatpush3.bf16.msra.mxu1 %v2907_v6  ;;  %2725 = vmatprep.subr.bf16.mxu0 %v2912_v61  ;;  %v2943_v6 = vld [vmem:[%s3623_s1 + $0x388] sm:$0xff]   ;;  %v1630_v61 = vshll.u32 %v2950_v3, 16 }
  0x62   :  { %2759 = vmatprep.subr.bf16.mxu1 %v2913_v33  ;;  %v3551_v33 = vor.u32 %v1623_v16, %v1620_v12 }
  0x63   :  { %1389 = vmatmul.mubr.bf16.vlgmr.msra.gmra.mxu0 %v1134_v58  ;;  %v1652_v58 = vshrl.u32 %v2955_v59, 16  ;;  %v1632_v23 = vrot.slane %v1630_v61, 3 }
  0x64   :  { %1445 = vmatmul.mubr.bf16.vlgmr.msra.gmra.mxu1 %v1140_v24  ;;  %2726 = vmatpush3.bf16.msra.mxu0 %v2914_v21  ;;  %v2957_v21 = vld [vmem:[%s3624_s0 + $0x2c] ss:$16 sps:$4 sm:$0xff]   ;;  %v1661_v24 = vshrl.u32 %v2954_v19, 16 }
  0x65   :  { %2760 = vmatpush3.bf16.msra.mxu1 %v2915_v17  ;;  %2727 = vmatprep.subr.bf16.mxu0 %v2916_v25  ;;  %v1629_v17 = vrot.slane %v1627_v30, 2  ;;  %v1664_v25 = vshll.u32 %v2954_v19, 16 }
  0x66   :  { %2761 = vmatprep.subr.bf16.mxu1 %v2917_v26  ;;  %1396 = vmatprep.mubr.bf16.mxu0 %v1147_v14  ;;  %v1669_v26 = vshrl.u32 %v2957_v21, 16  ;;  %v1663_v32 = vrot.slane %v1661_v24, 2  ;;  %v1655_v14 = vshll.u32 %v2955_v59, 16 }
  0x67   :  { %1452 = vmatprep.mubr.bf16.mxu1 %v1151_v46  ;;  %v1633_v31 = vor.u32 %v1632_v23, %v1629_v17  ;;  %v1666_v34 = vrot.slane %v1664_v25, 3 }
  0x68   :  { %2728 = vmatpush3.bf16.msra.mxu0 %v2918_v27  ;;  %v1672_v27 = vshll.u32 %v2957_v21, 16 }
  0x69   :  { %2762 = vmatpush3.bf16.msra.mxu1 %v2919_v28  ;;  %2729 = vmatprep.subr.bf16.mxu0 %v2924_v38  ;;  %v1612_v28 = vrot.slane %v1610_v20, 2  ;;  %v1671_v38 = vrot.slane %v1669_v26, 2 }
  0x6a   :  { %2763 = vmatprep.subr.bf16.mxu1 %v2925_v41  ;;  %v1649_v41 = vrot.slane %v1647_v37, 3 }
  0x6b   :  { %1397 = vmatmul.mubr.bf16.gmra.mxu0 %v1145_v44  ;;  %v2960_v44 = vld [vmem:[%s3624_s0 + $0x4c] ss:$16 sps:$4 sm:$0x7f]  }
  0x6c   :  { %1453 = vmatmul.mubr.bf16.gmra.mxu1 %v1149_v47  ;;  %2730 = vmatpush3.bf16.msra.mxu0 %v2926_v42  ;;  %v1642_v42 = vsel %vm1608_vm2, %v1633_v31, %v3540_v63  ;;  %v1650_v47 = vor.u32 %v1649_v41, %v1646_v35 }
  0x6d   :  { %2764 = vmatpush3.bf16.msra.mxu1 %v2927_v45  ;;  %2731 = vmatprep.subr.bf16.mxu0 %v2928_v48  ;;  %v1687_v48 = vshrl.u32 %v2958_v36, 16 }
  0x6e   :  { %2765 = vmatprep.subr.bf16.mxu1 %v2929_v49  ;;  %1404 = vmatprep.mubr.bf16.mxu0 %v1146_v39  ;;  %v1674_v39 = vrot.slane %v1672_v27, 3  ;;  %v2962_v49 = vld [vmem:[%s3624_s0 + $0x40] ss:$16 sps:$4 sm:$0x7f]  }
  0x6f   :  { %1460 = vmatprep.mubr.bf16.mxu1 %v1150_v13  ;;  %v1667_v13 = vor.u32 %v1666_v34, %v1663_v32 }
  0x70   :  { %2732 = vmatpush3.bf16.msra.mxu0 %v2930_v50  ;;  %v1675_v45 = vor.u32 %v1674_v39, %v1671_v38  ;;  %v1657_v50 = vrot.slane %v1655_v14, 3 }
  0x71   :  { %2766 = vmatpush3.bf16.msra.mxu1 %v2931_v51  ;;  %2733 = vmatprep.subr.bf16.mxu0 %v2932_v52  ;;  %v1690_v51 = vshll.u32 %v2958_v36, 16  ;;  %v1705_v52 = vshrl.u32 %v2960_v44, 16 }
  0x72   :  { %2767 = vmatprep.subr.bf16.mxu1 %v2933_v53  ;;  %v1708_v53 = vshll.u32 %v2960_v44, 16 }
  0x73   :  { %1405 = vmatmul.mubr.bf16.gmra.mxu0 %v1144_v40  ;;  %v1616_v40 = vor.u32 %v1615_v29, %v1612_v28 }
  0x74   :  { %1461 = vmatmul.mubr.bf16.gmra.mxu1 %v1148_v43  ;;  %2734 = vmatpush3.bf16.msra.mxu0 %v2934_v54  ;;  %v1654_v43 = vrot.slane %v1652_v58, 2  ;;  %v1676_v54 = vsel %vm1608_vm2, %v1667_v13, %v1675_v45 }
  0x75   :  { %2768 = vmatpush3.bf16.msra.mxu1 %v2935_v56  ;;  %2735 = vmatprep.subr.bf16.mxu0 %v2936_v60  ;;  %v1625_v46 = vsel %vm1608_vm2, %v1616_v40, %v3551_v33  ;;  %v1689_v56 = vrot.slane %v1687_v48, 2  ;;  %v1678_v60 = vshrl.u32 %v2962_v49, 16 }
  0x76   :  { %2769 = vmatprep.subr.bf16.mxu1 %v2937_v62  ;;  %1949 = vmatprep.mubr.bf16.mxu0 %v1642_v42  ;;  %v1681_v62 = vshll.u32 %v2962_v49, 16 }
  0x77   :  { %2005 = vmatprep.mubr.bf16.mxu1 %v1676_v54 }
  0x78   :  { %2736 = vmatpush3.bf16.msra.mxu0 %v2938_v0  ;;  %v2963_v0 = vld [vmem:[%s3624_s0 + $0x48] ss:$16 sps:$4 sm:$0x7f]   ;;  %s2964_s0 = smov 96  }
  0x79   :  { %2770 = vmatpush3.bf16.msra.mxu1 %v2939_v1  ;;  %2737 = vmatprep.subr.bf16.mxu0 %v2940_v2  ;;  %v1658_v1 = vor.u32 %v1657_v50, %v1654_v43  ;;  %v1692_v2 = vrot.slane %v1690_v51, 3  ;;  %v1696_v8 = vshrl.u32 %v2963_v0, 16 }
  0x7a   :  { %2771 = vmatprep.subr.bf16.mxu1 %v2941_v4  ;;  %v1707_v4 = vrot.slane %v1705_v52, 2 }
  0x7b   :  { %v1659_v10 = vsel %vm1608_vm2, %v1650_v47, %v1658_v1  ;;  %v1698_v16 = vrot.slane %v1696_v8, 2 }
  0x7c   :  { %2738 = vmatpush3.bf16.msra.mxu0 %v2942_v5  ;;  %v1710_v5 = vrot.slane %v1708_v53, 3 }
  0x7d   :  { %2772 = vmatpush3.bf16.msra.mxu1 %v2943_v6  ;;  %2739 = vmatprep.subr.bf16.mxu0 %v2944_v7  ;;  %v1680_v6 = vrot.slane %v1678_v60, 2  ;;  %v1683_v7 = vrot.slane %v1681_v62, 3 }
  0x7e   :  { %2773 = vmatprep.subr.bf16.mxu1 %v2945_v9  ;;  %v1699_v9 = vshll.u32 %v2963_v0, 16  ;;  %v1711_v12 = vor.u32 %v1710_v5, %v1707_v4 }
  0x80   :  { %2740 = vmatpush3.bf16.msra.mxu0 %v2946_v11  ;;  %v1693_v11 = vor.u32 %v1692_v2, %v1689_v56  ;;  %v1701_v57 = vrot.slane %v1699_v9, 3  ;;  %v1712_v18 = vsel %vm1608_vm2, %v1675_v45, %v1711_v12 }
  0x81   :  { %2774 = vmatpush3.bf16.msra.mxu1 %v2947_v55  ;;  %v1684_v55 = vor.u32 %v1683_v7, %v1680_v6 }
  0x82   :  { %v1694_v3 = vsel %vm1608_vm2, %v3540_v63, %v1693_v11  ;;  %v1702_v30 = vor.u32 %v1701_v57, %v1698_v16 }
  0x83   :  { %1950 = vmatmul.mubr.bf16.vlgmr.msra.gmra.mxu0 %v1625_v46  ;;  %v1685_v59 = vsel %vm1608_vm2, %v3551_v33, %v1684_v55 }
  0x84   :  { %2006 = vmatmul.mubr.bf16.vlgmr.msra.gmra.mxu1 %v1659_v10  ;;  %1957 = vmatprep.mubr.bf16.mxu0 %v1694_v3  ;;  %v1703_v61 = vsel %vm1608_vm2, %v1658_v1, %v1702_v30 }
  0x85   :  { %2013 = vmatprep.mubr.bf16.mxu1 %v1712_v18 }
  0x8b   :  { %1958 = vmatmul.mubr.bf16.gmra.mxu0 %v1685_v59 }
  0x8c   :  { %1965 = vmatprep.mubr.bf16.mxu0 %v1693_v11  ;;  %2014 = vmatmul.mubr.bf16.gmra.mxu1 %v1703_v61 }
  0x8d   :  { %2021 = vmatprep.mubr.bf16.mxu1 %v1711_v12 }
  0x93   :  { %1966 = vmatmul.mubr.bf16.gmra.mxu0 %v1684_v55 }
  0x94   :  { %2022 = vmatmul.mubr.bf16.gmra.mxu1 %v1702_v30 }
  0xe3   :  { %v2537_v19 = vpop.f32.mrf.mxu0 }
  0xe4   :  { %v2571_v20 = vpop.f32.mrf.mxu1 }
  0xe5   :  { %v2538_v21 = vpop.f32.mrf.mxu0 }
  0xe6   :  { %v2539_v63 = vadd.f32 %v2538_v21, %v2537_v19  ;;  %v2572_v15 = vpop.f32.mrf.mxu1 }
  0xe7   :  { %v2573_v22 = vadd.f32 %v2572_v15, %v2571_v20  ;;  %v2540_v37 = vpop.f32.mrf.mxu0 }
  0xe8   :  { %v2574_v58 = vpop.f32.mrf.mxu1 }
  0xe9   :  { %v426_v17 = vadd.f32 %v2573_v22, %v2539_v63  ;;  %v2541_v23 = vpop.f32.mrf.mxu0 }
  0xea   :  { %v2542_v33 = vadd.f32 %v2541_v23, %v2540_v37  ;;  %v2575_v24 = vpop.f32.mrf.mxu1 }
  0xeb   :  { %v2576_v25 = vadd.f32 %v2575_v24, %v2574_v58  ;;  %v2543_v27 = vpop.f32.mrf.mxu0 }
  0xec   :  { %v2577_v28 = vpop.f32.mrf.mxu1 }
  0xed   :  { %v429_v26 = vadd.f32 %v2576_v25, %v2542_v33  ;;  %v2544_v29 = vpop.f32.mrf.mxu0 }
  0xee   :  { %v2578_v31 = vpop.f32.mrf.mxu1  ;;  %v2545_v32 = vadd.f32 %v2544_v29, %v2543_v27 }
  0xef   :  { %v2579_v34 = vadd.f32 %v2578_v31, %v2577_v28  ;;  %v2546_v35 = vpop.f32.mrf.mxu0 }
  0xf0   :  { %v2580_v36 = vpop.f32.mrf.mxu1 }
  0xf1   :  { %v434_v38 = vadd.f32 %v2579_v34, %v2545_v32  ;;  %v2547_v39 = vpop.f32.mrf.mxu0 }
  0xf2   :  { %v2581_v40 = vpop.f32.mrf.mxu1  ;;  %v2548_v41 = vadd.f32 %v2547_v39, %v2546_v35 }
  0xf3   :  { %v2582_v42 = vadd.f32 %v2581_v40, %v2580_v36  ;;  %v2549_v43 = vpop.f32.mrf.mxu0 }
  0xf4   :  { %v2583_v14 = vpop.f32.mrf.mxu1 }
  0xf5   :  { %v437_v13 = vadd.f32 %v2582_v42, %v2548_v41  ;;  %v2550_v44 = vpop.f32.mrf.mxu0 }
  0xf6   :  { %v2584_v45 = vpop.f32.mrf.mxu1  ;;  %v2551_v46 = vadd.f32 %v2550_v44, %v2549_v43 }
  0xf7   :  { %v2585_v47 = vadd.f32 %v2584_v45, %v2583_v14  ;;  %v2552_v48 = vpop.f32.mrf.mxu0 }
  0xf8   :  { %v2586_v49 = vpop.f32.mrf.mxu1 }
  0xf9   :  { %v442_v50 = vadd.f32 %v2585_v47, %v2551_v46  ;;  %v2553_v51 = vpop.f32.mrf.mxu0 }
  0xfa   :  { %v2587_v52 = vpop.f32.mrf.mxu1 }
 0x103   :  { %v2605_v53 = vpop.f32.mrf.mxu0 }
 0x104   :  { %v2639_v54 = vpop.f32.mrf.mxu1 }
 0x105   :  { %v2606_v56 = vpop.f32.mrf.mxu0 }
 0x106   :  { %v2640_v60 = vpop.f32.mrf.mxu1  ;;  %v2607_v62 = vadd.f32 %v2606_v56, %v2605_v53 }
 0x107   :  { %v2641_v0 = vadd.f32 %v2640_v60, %v2639_v54  ;;  %v2608_v1 = vpop.f32.mrf.mxu0 }
 0x108   :  { %v2642_v2 = vpop.f32.mrf.mxu1 }
 0x109   :  { %v970_v4 = vadd.f32 %v2641_v0, %v2607_v62  ;;  %v2609_v5 = vpop.f32.mrf.mxu0 }
 0x10a   :  { %v2643_v6 = vpop.f32.mrf.mxu1  ;;  %v2610_v8 = vadd.f32 %v2609_v5, %v2608_v1 }
 0x10b   :  { %v3580_v7 = vadd.f32 %v970_v4, %v426_v17  ;;  %v2644_v9 = vadd.f32 %v2643_v6, %v2642_v2  ;;  %v2611_v12 = vpop.f32.mrf.mxu0 }
 0x10c   :  { %v2645_v55 = vpop.f32.mrf.mxu1 }
 0x10d   :  { %v973_v10 = vadd.f32 %v2644_v9, %v2610_v8  ;;  %v2612_v16 = vpop.f32.mrf.mxu0 }
 0x10e   :  { %v2646_v57 = vpop.f32.mrf.mxu1  ;;  %v2613_v3 = vadd.f32 %v2612_v16, %v2611_v12 }
 0x10f   :  { %v3582_v11 = vadd.f32 %v973_v10, %v429_v26  ;;  %v2647_v18 = vadd.f32 %v2646_v57, %v2645_v55  ;;  %v2614_v59 = vpop.f32.mrf.mxu0 }
 0x110   :  { %v2648_v30 = vpop.f32.mrf.mxu1 }
 0x111   :  { %v978_v61 = vadd.f32 %v2647_v18, %v2613_v3  ;;  %v2615_v19 = vpop.f32.mrf.mxu0 }
 0x112   :  { %v2649_v20 = vpop.f32.mrf.mxu1  ;;  %v2616_v63 = vadd.f32 %v2615_v19, %v2614_v59 }
 0x113   :  { %v3584_v21 = vadd.f32 %v978_v61, %v434_v38  ;;  %v2650_v15 = vadd.f32 %v2649_v20, %v2648_v30  ;;  %v2617_v22 = vpop.f32.mrf.mxu0 }
 0x114   :  { %v2651_v37 = vpop.f32.mrf.mxu1 }
 0x115   :  { %v981_v58 = vadd.f32 %v2650_v15, %v2616_v63  ;;  %v2618_v17 = vpop.f32.mrf.mxu0 }
 0x116   :  { %v2652_v23 = vpop.f32.mrf.mxu1  ;;  %v2619_v24 = vadd.f32 %v2618_v17, %v2617_v22 }
 0x117   :  { %v3586_v33 = vadd.f32 %v981_v58, %v437_v13  ;;  %v2653_v25 = vadd.f32 %v2652_v23, %v2651_v37  ;;  %v2620_v26 = vpop.f32.mrf.mxu0 }
 0x118   :  { %v2654_v27 = vpop.f32.mrf.mxu1 }
 0x119   :  { %v986_v28 = vadd.f32 %v2653_v25, %v2619_v24  ;;  %v2621_v29 = vpop.f32.mrf.mxu0 }
 0x11a   :  { %v2655_v31 = vpop.f32.mrf.mxu1 }
 0x11b   :  { %v3588_v32 = vadd.f32 %v986_v28, %v442_v50 }
 0x123   :  { %v2673_v34 = vpop.f32.mrf.mxu0 }
 0x124   :  { %v2707_v35 = vpop.f32.mrf.mxu1 }
 0x125   :  { %v2674_v36 = vpop.f32.mrf.mxu0 }
 0x126   :  { %v2708_v38 = vpop.f32.mrf.mxu1  ;;  %v2675_v0 = vadd.f32 %v2674_v36, %v2673_v34 }
 0x127   :  { %v2676_v39 = vpop.f32.mrf.mxu0  ;;  %v2709_v1 = vadd.f32 %v2708_v38, %v2707_v35 }
 0x128   :  { %v2710_v40 = vpop.f32.mrf.mxu1 }
 0x129   :  { %v2677_v41 = vpop.f32.mrf.mxu0  ;;  %v1447_v6 = vadd.f32 %v2709_v1, %v2675_v0 }
 0x12a   :  { %v2711_v42 = vpop.f32.mrf.mxu1  ;;  %v2678_v8 = vadd.f32 %v2677_v41, %v2676_v39 }
 0x12b   :  { %v2679_v43 = vpop.f32.mrf.mxu0  ;;  %v2712_v9 = vadd.f32 %v2711_v42, %v2710_v40  ;;  %v1468_v20 = vadd.f32 %v1447_v6, %v3580_v7 }
 0x12c   :  { %v2713_v13 = vpop.f32.mrf.mxu1 }
 0x12d   :  { %v2680_v14 = vpop.f32.mrf.mxu0  ;;  %v1450_v30 = vadd.f32 %v2712_v9, %v2678_v8 }
 0x12e   :  { %v2714_v44 = vpop.f32.mrf.mxu1  ;;  %v2681_v3 = vadd.f32 %v2680_v14, %v2679_v43 }
 0x12f   :  { %v2682_v45 = vpop.f32.mrf.mxu0  ;;  %v2715_v18 = vadd.f32 %v2714_v44, %v2713_v13  ;;  %v1469_v26 = vadd.f32 %v1450_v30, %v3582_v11 }
 0x130   :  { %v2716_v46 = vpop.f32.mrf.mxu1 }
 0x131   :  { %v2683_v47 = vpop.f32.mrf.mxu0  ;;  %v1455_v17 = vadd.f32 %v2715_v18, %v2681_v3 }
 0x132   :  { %v2717_v48 = vpop.f32.mrf.mxu1  ;;  %v2684_v23 = vadd.f32 %v2683_v47, %v2682_v45 }
 0x133   :  { %v2685_v49 = vpop.f32.mrf.mxu0  ;;  %v2718_v24 = vadd.f32 %v2717_v48, %v2716_v46  ;;  %v1470_v39 = vadd.f32 %v1455_v17, %v3584_v21 }
 0x134   :  { %v2719_v51 = vpop.f32.mrf.mxu1 }
 0x135   :  { %v2686_v50 = vpop.f32.mrf.mxu0  ;;  %v1458_v36 = vadd.f32 %v2718_v24, %v2684_v23 }
 0x136   :  { %v2720_v52 = vpop.f32.mrf.mxu1  ;;  %v2687_v40 = vadd.f32 %v2686_v50, %v2685_v49 }
 0x137   :  { %v2688_v53 = vpop.f32.mrf.mxu0  ;;  %v2721_v41 = vadd.f32 %v2720_v52, %v2719_v51  ;;  %v1471_v47 = vadd.f32 %v1458_v36, %v3586_v33 }
 0x138   :  { %v2722_v54 = vpop.f32.mrf.mxu1 }
 0x139   :  { %v2689_v56 = vpop.f32.mrf.mxu0  ;;  %v1463_v48 = vadd.f32 %v2721_v41, %v2687_v40 }
 0x13a   :  { %v2723_v60 = vpop.f32.mrf.mxu1 }
 0x13b   :  { %v1472_v56 = vadd.f32 %v1463_v48, %v3588_v32 }
 0x143   :  { %v2741_v62 = vpop.f32.mrf.mxu0 }
 0x144   :  { %v2775_v5 = vpop.f32.mrf.mxu1 }
 0x145   :  { %v2742_v2 = vpop.f32.mrf.mxu0 }
 0x146   :  { %v2743_v10 = vadd.f32 %v2742_v2, %v2741_v62  ;;  %v2776_v55 = vpop.f32.mrf.mxu1 }
 0x147   :  { %v2744_v4 = vpop.f32.mrf.mxu0  ;;  %v2777_v16 = vadd.f32 %v2776_v55, %v2775_v5 }
 0x148   :  { %v2778_v59 = vpop.f32.mrf.mxu1 }
 0x149   :  { %v2745_v12 = vpop.f32.mrf.mxu0  ;;  %v2008_v61 = vadd.f32 %v2777_v16, %v2743_v10 }
 0x14a   :  { %v2746_v19 = vadd.f32 %v2745_v12, %v2744_v4  ;;  %v2779_v15 = vpop.f32.mrf.mxu1  ;;  %v2510_v12 = vld [vmem:[%s3625_s2] ss:$0 sm:$0xff] }
 0x14b   :  { %v2747_v57 = vpop.f32.mrf.mxu0  ;;  %v2780_v22 = vadd.f32 %v2779_v15, %v2778_v59  ;;  %v2029_v37 = vadd.f32 %v2008_v61, %v1468_v20 }
 0x14c   :  { %v2781_v25 = vpop.f32.mrf.mxu1 }
 0x14d   :  { %v2748_v63 = vpop.f32.mrf.mxu0  ;;  %v2011_v27 = vadd.f32 %v2780_v22, %v2746_v19  ;;  %2049 = vrot.lane.b32.xlu0 %v2029_v37, %s2964_s0 }
 0x14e   :  { %v2749_v28 = vadd.f32 %v2748_v63, %v2747_v57  ;;  %v2782_v31 = vpop.f32.mrf.mxu1 }
 0x14f   :  { %v2750_v58 = vpop.f32.mrf.mxu0  ;;  %v2783_v34 = vadd.f32 %v2782_v31, %v2781_v25  ;;  %v2030_v7 = vadd.f32 %v2011_v27, %v1469_v26 }
 0x150   :  { %v2784_v38 = vpop.f32.mrf.mxu1 }
 0x151   :  { %v2751_v29 = vpop.f32.mrf.mxu0  ;;  %v2016_v42 = vadd.f32 %v2783_v34, %v2749_v28  ;;  %2051 = vrot.lane.b32.xlu0 %v2030_v7, %s2964_s0 }
 0x152   :  { %v2752_v11 = vadd.f32 %v2751_v29, %v2750_v58  ;;  %v2785_v13 = vpop.f32.mrf.mxu1 }
 0x153   :  { %v2753_v35 = vpop.f32.mrf.mxu0  ;;  %v2786_v14 = vadd.f32 %v2785_v13, %v2784_v38  ;;  %v2031_v44 = vadd.f32 %v2016_v42, %v1470_v39 }
 0x154   :  { %v2787_v46 = vpop.f32.mrf.mxu1 }
 0x155   :  { %v2754_v43 = vpop.f32.mrf.mxu0  ;;  %v2019_v53 = vadd.f32 %v2786_v14, %v2752_v11  ;;  %2053 = vrot.lane.b32.xlu1 %v2031_v44, %s2964_s0 }
 0x156   :  { %v2755_v54 = vadd.f32 %v2754_v43, %v2753_v35  ;;  %v2788_v49 = vpop.f32.mrf.mxu1 }
 0x157   :  { %v2756_v45 = vpop.f32.mrf.mxu0  ;;  %v2789_v51 = vadd.f32 %v2788_v49, %v2787_v46  ;;  %v2032_v50 = vadd.f32 %v2019_v53, %v1471_v47 }
 0x158   :  { %v2790_v52 = vpop.f32.mrf.mxu1 }
 0x159   :  { %v2757_v21 = vpop.f32.mrf.mxu0  ;;  %v2024_v60 = vadd.f32 %v2789_v51, %v2755_v54  ;;  %2055 = vrot.lane.b32.xlu1 %v2032_v50, %s2964_s0 }
 0x15a   :  { %v2791_v62 = vpop.f32.mrf.mxu1 }
 0x15b   :  { %v2033_v0 = vadd.f32 %v2024_v60, %v1472_v56 }
 0x15d   :  { %2057 = vrot.lane.b32.xlu0 %v2033_v0, %s2964_s0 }
 0x1bf   :  { %v2050_v33 = vpop.permute.xlu0 %2049 }
 0x1c0   :  { %v2064_v1 = vmax.f32 %v2029_v37, %v2050_v33 }
 0x1c2   :  { %2074 = vrot.lane.b32.xlu1 %v2064_v1, %s2965_s22 }
 0x1c3   :  { %v2052_v2 = vpop.permute.xlu0 %2051 }
 0x1c4   :  { %v2065_v4 = vmax.f32 %v2030_v7, %v2052_v2 }
 0x1c6   :  { %2076 = vrot.lane.b32.xlu0 %v2065_v4, %s2965_s22 }
 0x1c7   :  { %v2054_v5 = vpop.permute.xlu1 %2053 }
 0x1c8   :  { %v2066_v6 = vmax.f32 %v2031_v44, %v2054_v5 }
 0x1ca   :  { %2078 = vrot.lane.b32.xlu1 %v2066_v6, %s2965_s22 }
 0x1cb   :  { %v2056_v8 = vpop.permute.xlu1 %2055 }
 0x1cc   :  { %v2067_v9 = vmax.f32 %v2032_v50, %v2056_v8 }
 0x1ce   :  { %2080 = vrot.lane.b32.xlu0 %v2067_v9, %s2965_s22 }
 0x1cf   :  { %v2058_v32 = vpop.permute.xlu0 %2057 }
 0x1d0   :  { %v2068_v10 = vmax.f32 %v2033_v0, %v2058_v32 }
 0x1d2   :  { %2082 = vrot.lane.b32.xlu1 %v2068_v10, %s2965_s22 }
 0x234   :  { %v2075_v55 = vpop.permute.xlu1 %2074 }
 0x235   :  { %v2089_v16 = vmax.f32 %v2064_v1, %v2075_v55 }
 0x237   :  { %v2101_v57 = vadd.f32 %v2510_v12, %v2089_v16 }
 0x238   :  { %v2077_v3 = vpop.permute.xlu0 %2076 }
 0x239   :  { %v2106_v18 = vmax.f32 %v2101_v57, 0.0  ;;  %v2090_v59 = vmax.f32 %v2065_v4, %v2077_v3 }
 0x23b   :  { %v2516_v30 = vpack.c.bf16 %v2106_v18, %v2106_v18  ;;  %v2102_v61 = vadd.f32 %v2510_v12, %v2090_v59 }
 0x23c   :  { %v2079_v19 = vpop.permute.xlu1 %2078 }
 0x23d   :  { %2133 = vst.msk [vmem:[%s3626_s3] sm:$0xf] %vm2132_vm3, %v2516_v30  ;;  %v2107_v20 = vmax.f32 %v2102_v61, 0.0  ;;  %v2091_v63 = vmax.f32 %v2066_v6, %v2079_v19 }
 0x23f   :  { %v2517_v15 = vpack.c.bf16 %v2107_v20, %v2107_v20  ;;  %v2103_v22 = vadd.f32 %v2510_v12, %v2091_v63 }
 0x240   :  { %v2081_v37 = vpop.permute.xlu0 %2080 }
 0x241   :  { %2134 = vst.msk [vmem:[%s3626_s3 + $0x4] sm:$0xf] %vm2132_vm3, %v2517_v15  ;;  %v2108_v58 = vmax.f32 %v2103_v22, 0.0  ;;  %v2092_v17 = vmax.f32 %v2067_v9, %v2081_v37 }
 0x243   :  { %v2518_v23 = vpack.c.bf16 %v2108_v58, %v2108_v58  ;;  %v2104_v24 = vadd.f32 %v2510_v12, %v2092_v17 }
 0x244   :  { %v2083_v25 = vpop.permute.xlu1 %2082 }
 0x245   :  { %2135 = vst.msk [vmem:[%s3626_s3 + $0x8] sm:$0xf] %vm2132_vm3, %v2518_v23  ;;  %v2109_v26 = vmax.f32 %v2104_v24, 0.0  ;;  %v2093_v27 = vmax.f32 %v2068_v10, %v2083_v25 }
 0x247   :  { %v2519_v28 = vpack.c.bf16 %v2109_v26, %v2109_v26  ;;  %v2105_v29 = vadd.f32 %v2510_v12, %v2093_v27 }
 0x249   :  { %2136 = vst.msk [vmem:[%s3626_s3 + $0xc] sm:$0xf] %vm2132_vm3, %v2519_v28  ;;  %v2110_v31 = vmax.f32 %v2105_v29, 0.0 }
 0x24b   :  { %v2520_v34 = vpack.c.bf16 %v2110_v31, %v2110_v31 }
 0x24d   :  { %2137 = vst.msk [vmem:[%s3626_s3 + $0x10] sm:$0xf] %vm2132_vm3, %v2520_v34 }

</bundles_post_ra>
